<compile_context>
chip_gen: v6e
topology: v6e:2x2x1
jax: 0.10.0
libtpu: 0.0.40
codegen_flags: <defaults>
</compile_context>

<pallas_src>
import functools

import jax
import jax.numpy as jnp
from jax.experimental import pallas as pl
from jax.experimental.pallas import tpu as pltpu


# ----------------------------------------------------------------------------
# Helpers
# ----------------------------------------------------------------------------
def _vmem_spec():
    return pl.BlockSpec(memory_space=pltpu.MemorySpace.VMEM)


def _round_up(x, m):
    return ((x + m - 1) // m) * m


# ----------------------------------------------------------------------------
# Fused encoder + decoder + heads kernel (single pallas_call, no grid)
# ----------------------------------------------------------------------------
def _fused_encdec(enc_emb2, dec_emb2, w_head, b_head, params, *, S, Bp, P, L, H):
    """enc_emb2: (S*Bp, E)    time-major, batch-padded encoder embeddings.
       dec_emb2: (P*L*Bp, E)  decoder embeddings for every teacher-forcing step.
       w_head  : (L*H, A+T)   fused flatten -> [actFCL | tarFCL] weight.
       b_head  : (1, A+T)     fused bias (includes flatten-bias contribution).
       Returns (P*Bp, A+T) f32."""
    G = 4 * H
    AT = w_head.shape[1]

    def kernel(enc_emb_ref, dec_emb_ref,
               enc_wih_ref, enc_whh_ref, enc_b_ref,
               dec_wih_ref, dec_whh_ref, dec_b_ref,
               w_head_ref, b_head_ref,
               out_ref,
               enc_xg_ref, dec_xg_ref, hs_ref):
        f32 = jnp.float32

        # ---- Hoisted input projections: one big-M MXU matmul per LSTM ------
        enc_xg_ref[...] = (
            jnp.dot(enc_emb_ref[...], enc_wih_ref[...],
                    preferred_element_type=f32) + enc_b_ref[...])   # (S*Bp, 4H)
        dec_xg_ref[...] = (
            jnp.dot(dec_emb_ref[...], dec_wih_ref[...],
                    preferred_element_type=f32) + dec_b_ref[...])   # (P*L*Bp, 4H)

        # ---- Loop-invariant loads, hoisted out of the recurrences ----------
        enc_whh = enc_whh_ref[...]          # (H, 4H)
        dec_whh = dec_whh_ref[...]          # (H, 4H)

        def cell(xg, h, c, whh):
            gates = xg + jnp.dot(h, whh, preferred_element_type=f32)  # (Bp,4H)
            # Full-width transcendentals (one EUP push each), then lane-slice.
            sig = jax.nn.sigmoid(gates)
            th = jnp.tanh(gates)
            i = sig[:, 0 * H:1 * H]
            f = sig[:, 1 * H:2 * H]
            o = sig[:, 3 * H:4 * H]
            g = th[:, 2 * H:3 * H]
            c_new = f * c + i * g
            h_new = o * jnp.tanh(c_new)
            return h_new, c_new

        h = jnp.zeros((Bp, H), f32)
        c = jnp.zeros((Bp, H), f32)

        # ---- Encoder: unrolled recurrence; allout is never materialized ----
        for t in range(S):
            h, c = cell(enc_xg_ref[pl.ds(t * Bp, Bp), :], h, c, enc_whh)

        # ---- Decoder: recurrence only; stash h_t, heads are deferred -------
        for p in range(P):
            for t in range(L):
                step = p * L + t
                h, c = cell(dec_xg_ref[pl.ds(step * Bp, Bp), :], h, c, dec_whh)
                hs_ref[pl.ds(p * Bp, Bp), pl.ds(t * H, H)] = h

        # ---- Deferred flatten + heads: single fused MXU matmul, one store --
        out_ref[...] = (
            jnp.dot(hs_ref[...], w_head_ref[...],
                    preferred_element_type=f32) + b_head_ref[...])   # (P*Bp, A+T)

    out_shape = jax.ShapeDtypeStruct((P * Bp, AT), jnp.float32)
    return pl.pallas_call(
        kernel,
        out_shape=out_shape,
        in_specs=[_vmem_spec() for _ in range(10)],
        out_specs=_vmem_spec(),
        scratch_shapes=[pltpu.VMEM((S * Bp, G), jnp.float32),
                        pltpu.VMEM((P * L * Bp, G), jnp.float32),
                        pltpu.VMEM((P * Bp, L * H), jnp.float32)],
    )(enc_emb2, dec_emb2,
      params["enc_wih_t"], params["enc_whh_t"], params["enc_b"],
      params["dec_wih_t"], params["dec_whh_t"], params["dec_b"],
      w_head, b_head)


# ----------------------------------------------------------------------------
# EncoderDecoder forward (teacher forcing)
# ----------------------------------------------------------------------------
def encoder_decoder_forward(params, ins, outs, *, hidDim, numAct, numTar,
                            numPred):
    B, S = ins.shape
    L = numAct + numTar
    Bp = max(8, _round_up(B, 8))        # pad batch to a full sublane tile
    pad = Bp - B
    E = params["enc_embed"].shape[1]

    # --- Encoder embeddings: gather once, time-major, batch-padded, 2D.
    enc_emb = jnp.take(params["enc_embed"], ins, axis=0)      # (B, S, E)
    enc_emb = jnp.transpose(enc_emb, (1, 0, 2))               # (S, B, E)
    enc_emb = jnp.pad(enc_emb, ((0, 0), (0, pad), (0, 0)))    # (S, Bp, E)
    enc_emb2 = enc_emb.reshape(S * Bp, E).astype(jnp.float32)

    # --- Decoder inputs for ALL prediction steps, precomputed up-front.
    # step 0: zero token vector; step p>0: onehot(outs[:, :, p-1]).
    oh_act = jax.nn.one_hot(outs[:, 0, :], numAct, dtype=jnp.int32)   # (B,P,A)
    oh_tar = jax.nn.one_hot(outs[:, 1, :], numTar, dtype=jnp.int32)   # (B,P,T)
    oh = jnp.concatenate([oh_act, oh_tar], axis=-1)                   # (B,P,L)
    oh = jnp.transpose(oh, (1, 0, 2))                                 # (P,B,L)
    in_dec = jnp.concatenate(
        [jnp.zeros((1, B, L), jnp.int32), oh[:numPred - 1]], axis=0)  # (P,B,L)

    # NOTE: faithful to the PyTorch module, the decoder embedding is applied
    # to the 0/1 one-hot *values* (so only rows 0/1 of dec_embed are read).
    dec_emb = jnp.take(params["dec_embed"], in_dec, axis=0)           # (P,B,L,E)
    dec_emb = jnp.transpose(dec_emb, (0, 2, 1, 3))                    # (P,L,B,E)
    dec_emb = jnp.pad(dec_emb, ((0, 0), (0, 0), (0, pad), (0, 0)))
    dec_emb2 = dec_emb.reshape(numPred * L * Bp, E).astype(jnp.float32)

    # --- Fuse flatten(H->1) + [actFCL | tarFCL] into one weight + one bias.
    # head[b,j] = sum_{t,k} h_t[b,k]*wf[k]*wat[t,j] + bf*sum_t wat[t,j] + bat[j]
    wat = jnp.concatenate([params["act_w"], params["tar_w"]], axis=1)  # (L,A+T)
    bat = jnp.concatenate([params["act_b"], params["tar_b"]], axis=1)  # (1,A+T)
    wf = params["flatten_w"][0]                                        # (H,)
    w_head = (wf[None, :, None] * wat[:, None, :]).reshape(
        L * hidDim, numAct + numTar).astype(jnp.float32)               # (L*H,A+T)
    b_head = (bat + params["flatten_b"][0, 0]
              * jnp.sum(wat, axis=0, keepdims=True)).astype(jnp.float32)

    out = _fused_encdec(enc_emb2, dec_emb2, w_head, b_head, params,
                        S=S, Bp=Bp, P=numPred, L=L, H=hidDim)
    out = out.reshape(numPred, Bp, numAct + numTar)                    # (P,Bp,A+T)

    actions = jnp.transpose(out[:, :B, :numAct], (1, 2, 0))   # (B, numAct, P)
    targets = jnp.transpose(out[:, :B, numAct:], (1, 2, 0))   # (B, numTar, P)
    return actions, targets


# ----------------------------------------------------------------------------
# Pure-JAX reference (mirrors the PyTorch module) for correctness checking
# ----------------------------------------------------------------------------
def reference_forward(params, ins, outs, *, hidDim, numAct, numTar, numPred):
    B = ins.shape[0]
    L = numAct + numTar
    hp = jax.lax.Precision.HIGHEST

    def lstm(emb_bte, h, c, wih_t, whh_t, b):
        hs = []
        for t in range(emb_bte.shape[1]):
            gates = (jnp.dot(emb_bte[:, t, :], wih_t, precision=hp)
                     + jnp.dot(h, whh_t, precision=hp) + b)
            i = jax.nn.sigmoid(gates[:, 0 * hidDim:1 * hidDim])
            f = jax.nn.sigmoid(gates[:, 1 * hidDim:2 * hidDim])
            g = jnp.tanh(gates[:, 2 * hidDim:3 * hidDim])
            o = jax.nn.sigmoid(gates[:, 3 * hidDim:4 * hidDim])
            c = f * c + i * g
            h = o * jnp.tanh(c)
            hs.append(h)
        return jnp.stack(hs, axis=1), h, c

    h = jnp.zeros((B, hidDim), jnp.float32)
    c = jnp.zeros((B, hidDim), jnp.float32)
    enc_emb = jnp.take(params["enc_embed"], ins, axis=0)
    _, h, c = lstm(enc_emb, h, c, params["enc_wih_t"], params["enc_whh_t"],
                   params["enc_b"])

    in_dec = jnp.zeros((B, L), jnp.int32)
    acts, tars = [], []
    for p in range(numPred):
        dec_emb = jnp.take(params["dec_embed"], in_dec, axis=0)
        allout, h, c = lstm(dec_emb, h, c, params["dec_wih_t"],
                            params["dec_whh_t"], params["dec_b"])
        flat = (jnp.sum(allout * params["flatten_w"][0], axis=-1)
                + params["flatten_b"][0, 0])                       # (B, L)
        acts.append(jnp.dot(flat, params["act_w"], precision=hp)
                    + params["act_b"])
        tars.append(jnp.dot(flat, params["tar_w"], precision=hp)
                    + params["tar_b"])
        oh_a = jax.nn.one_hot(outs[:, 0, p], numAct, dtype=jnp.int32)
        oh_t = jax.nn.one_hot(outs[:, 1, p], numTar, dtype=jnp.int32)
        in_dec = jnp.concatenate([oh_a, oh_t], axis=1)
    return jnp.stack(acts, axis=-1), jnp.stack(tars, axis=-1)


# ----------------------------------------------------------------------------
# Deterministic parameter construction
# ----------------------------------------------------------------------------
def init_params(key, *, hidDim, numAct, numTar, embedDim, numWords):
    L = numAct + numTar
    ks = jax.random.split(key, 16)
    n = lambda k, shape, s=0.1: (s * jax.random.normal(k, shape)).astype(
        jnp.float32)
    return {
        # Encoder
        "enc_embed": n(ks[0], (numWords, embedDim)),
        "enc_wih_t": n(ks[1], (embedDim, 4 * hidDim)),
        "enc_whh_t": n(ks[2], (hidDim, 4 * hidDim)),
        "enc_b":     n(ks[3], (1, 4 * hidDim)),
        # Decoder (vocab = numAct + numTar)
        "dec_embed": n(ks[4], (L, embedDim)),
        "dec_wih_t": n(ks[5], (embedDim, 4 * hidDim)),
        "dec_whh_t": n(ks[6], (hidDim, 4 * hidDim)),
        "dec_b":     n(ks[7], (1, 4 * hidDim)),
        # flatten: Linear(hidDim, 1)
        "flatten_w": n(ks[8], (1, hidDim)),
        "flatten_b": n(ks[9], (1, 1)),
        # actFCL: Linear(L, numAct);  tarFCL: Linear(L, numTar)  (stored ^T)
        "act_w": n(ks[10], (L, numAct)),
        "act_b": n(ks[11], (1, numAct)),
        "tar_w": n(ks[12], (L, numTar)),
        "tar_b": n(ks[13], (1, numTar)),
    }


if __name__ == "__main__":
    # Small shapes consistent with the module.
    hidDim, numAct, numTar, numPred, embedDim, numWords = 32, 4, 4, 3, 16, 20
    B, S = 2, 8  # numEp episodes, encoder sequence length

    key = jax.random.PRNGKey(0)
    kp, ki, ka, kt = jax.random.split(key, 4)
    params = init_params(kp, hidDim=hidDim, numAct=numAct, numTar=numTar,
                         embedDim=embedDim, numWords=numWords)

    ins = jax.random.randint(ki, (B, S), 0, numWords, dtype=jnp.int32)
    outs = jnp.stack(
        [jax.random.randint(ka, (B, numPred), 0, numAct, dtype=jnp.int32),
         jax.random.randint(kt, (B, numPred), 0, numTar, dtype=jnp.int32)],
        axis=1)                                   # (B, 2, numPred)

    fwd = jax.jit(functools.partial(
        encoder_decoder_forward, hidDim=hidDim, numAct=numAct,
        numTar=numTar, numPred=numPred))
    actions, targets = fwd(params, ins, outs)
    jax.block_until_ready((actions, targets))

    assert actions.shape == (B, numAct, numPred)
    assert targets.shape == (B, numTar, numPred)

    # Correctness check against a pure-JAX reference of the PyTorch forward.
    a_ref, t_ref = reference_forward(params, ins, outs, hidDim=hidDim,
                                     numAct=numAct, numTar=numTar,
                                     numPred=numPred)
    assert jnp.allclose(actions, a_ref, atol=2e-3, rtol=2e-2), \
        float(jnp.max(jnp.abs(actions - a_ref)))
    assert jnp.allclose(targets, t_ref, atol=2e-3, rtol=2e-2), \
        float(jnp.max(jnp.abs(targets - t_ref)))

    print("KERNEL_OK")
</pallas_src>

<mosaic_0001>
module attributes {stable_mosaic.version = 11 : i64} {
  func.func @kernel(%arg0: memref<64x16xf32, #tpu.memory_space<vmem>>, %arg1: memref<192x16xf32, #tpu.memory_space<vmem>>, %arg2: memref<16x128xf32, #tpu.memory_space<vmem>>, %arg3: memref<32x128xf32, #tpu.memory_space<vmem>>, %arg4: memref<1x128xf32, #tpu.memory_space<vmem>>, %arg5: memref<16x128xf32, #tpu.memory_space<vmem>>, %arg6: memref<32x128xf32, #tpu.memory_space<vmem>>, %arg7: memref<1x128xf32, #tpu.memory_space<vmem>>, %arg8: memref<256x8xf32, #tpu.memory_space<vmem>>, %arg9: memref<1x8xf32, #tpu.memory_space<vmem>>, %arg10: memref<24x8xf32, #tpu.memory_space<vmem>>, %arg11: memref<64x128xf32, #tpu.memory_space<vmem>>, %arg12: memref<192x128xf32, #tpu.memory_space<vmem>>, %arg13: memref<24x256xf32, #tpu.memory_space<vmem>>) attributes {dimension_semantics = [], scalar_prefetch = 0 : i64, scratch_operands = 3 : i64, tpu.core_type = #tpu.core_type<tc>} {
    %c0 = arith.constant 0 : index
    %c0_0 = arith.constant 0 : index
    %0 = vector.load %arg0[%c0, %c0_0] : memref<64x16xf32, #tpu.memory_space<vmem>>, vector<64x16xf32>
    %c0_1 = arith.constant 0 : index
    %c0_2 = arith.constant 0 : index
    %1 = vector.load %arg2[%c0_1, %c0_2] : memref<16x128xf32, #tpu.memory_space<vmem>>, vector<16x128xf32>
    %cst = arith.constant dense<0.000000e+00> : vector<64x128xf32>
    %2 = tpu.matmul %0, %1, %cst {dimension_numbers = #tpu.dot_dimension_numbers<[1], [0], [0], [1], [0, 0, 1, 1], [], []>} : vector<64x16xf32>, vector<16x128xf32>, vector<64x128xf32> -> vector<64x128xf32>
    %c0_3 = arith.constant 0 : index
    %c0_4 = arith.constant 0 : index
    %3 = vector.load %arg4[%c0_3, %c0_4] : memref<1x128xf32, #tpu.memory_space<vmem>>, vector<1x128xf32>
    %4 = vector.broadcast %3 : vector<1x128xf32> to vector<64x128xf32>
    %5 = arith.addf %2, %4 : vector<64x128xf32>
    %c0_5 = arith.constant 0 : index
    %c0_6 = arith.constant 0 : index
    %6 = vector.load %arg11[%c0_5, %c0_6] : memref<64x128xf32, #tpu.memory_space<vmem>>, vector<64x128xf32>
    tpu.vector_store %arg11[%c0_5, %c0_6], %5 {strides = array<i32>} : memref<64x128xf32, #tpu.memory_space<vmem>>, vector<64x128xf32>,
    %c0_7 = arith.constant 0 : index
    %c0_8 = arith.constant 0 : index
    %7 = vector.load %arg1[%c0_7, %c0_8] : memref<192x16xf32, #tpu.memory_space<vmem>>, vector<192x16xf32>
    %c0_9 = arith.constant 0 : index
    %c0_10 = arith.constant 0 : index
    %8 = vector.load %arg5[%c0_9, %c0_10] : memref<16x128xf32, #tpu.memory_space<vmem>>, vector<16x128xf32>
    %cst_11 = arith.constant dense<0.000000e+00> : vector<192x128xf32>
    %9 = tpu.matmul %7, %8, %cst_11 {dimension_numbers = #tpu.dot_dimension_numbers<[1], [0], [0], [1], [0, 0, 1, 1], [], []>} : vector<192x16xf32>, vector<16x128xf32>, vector<192x128xf32> -> vector<192x128xf32>
    %c0_12 = arith.constant 0 : index
    %c0_13 = arith.constant 0 : index
    %10 = vector.load %arg7[%c0_12, %c0_13] : memref<1x128xf32, #tpu.memory_space<vmem>>, vector<1x128xf32>
    %11 = vector.broadcast %10 : vector<1x128xf32> to vector<192x128xf32>
    %12 = arith.addf %9, %11 : vector<192x128xf32>
    %c0_14 = arith.constant 0 : index
    %c0_15 = arith.constant 0 : index
    %13 = vector.load %arg12[%c0_14, %c0_15] : memref<192x128xf32, #tpu.memory_space<vmem>>, vector<192x128xf32>
    tpu.vector_store %arg12[%c0_14, %c0_15], %12 {strides = array<i32>} : memref<192x128xf32, #tpu.memory_space<vmem>>, vector<192x128xf32>,
    %c0_16 = arith.constant 0 : index
    %c0_17 = arith.constant 0 : index
    %14 = vector.load %arg3[%c0_16, %c0_17] : memref<32x128xf32, #tpu.memory_space<vmem>>, vector<32x128xf32>
    %c0_18 = arith.constant 0 : index
    %c0_19 = arith.constant 0 : index
    %15 = vector.load %arg6[%c0_18, %c0_19] : memref<32x128xf32, #tpu.memory_space<vmem>>, vector<32x128xf32>
    %cst_20 = arith.constant 0.000000e+00 : f32
    %16 = vector.broadcast %cst_20 : f32 to vector<8x32xf32>
    %cst_21 = arith.constant 0.000000e+00 : f32
    %17 = vector.broadcast %cst_21 : f32 to vector<8x32xf32>
    %c0_22 = arith.constant 0 : index
    %c0_23 = arith.constant 0 : index
    %18 = vector.load %arg11[%c0_22, %c0_23] : memref<64x128xf32, #tpu.memory_space<vmem>>, vector<8x128xf32>
    %cst_24 = arith.constant dense<0.000000e+00> : vector<8x128xf32>
    %19 = tpu.matmul %16, %14, %cst_24 {dimension_numbers = #tpu.dot_dimension_numbers<[1], [0], [0], [1], [0, 0, 1, 1], [], []>} : vector<8x32xf32>, vector<32x128xf32>, vector<8x128xf32> -> vector<8x128xf32>
    %20 = arith.addf %18, %19 : vector<8x128xf32>
    %21 = arith.negf %20 : vector<8x128xf32>
    %22 = math.exp %21 : vector<8x128xf32>
    %cst_25 = arith.constant 1.000000e+00 : f32
    %23 = vector.broadcast %cst_25 : f32 to vector<8x128xf32>
    %24 = arith.addf %23, %22 : vector<8x128xf32>
    %25 = arith.divf %23, %24 : vector<8x128xf32>
    %26 = math.tanh %20 : vector<8x128xf32>
    %27 = vector.extract_strided_slice %25 {offsets = [0, 0], sizes = [8, 32], strides = [1, 1]} : vector<8x128xf32> to vector<8x32xf32>
    %28 = vector.extract_strided_slice %25 {offsets = [0, 32], sizes = [8, 32], strides = [1, 1]} : vector<8x128xf32> to vector<8x32xf32>
    %29 = vector.extract_strided_slice %25 {offsets = [0, 96], sizes = [8, 32], strides = [1, 1]} : vector<8x128xf32> to vector<8x32xf32>
    %30 = vector.extract_strided_slice %26 {offsets = [0, 64], sizes = [8, 32], strides = [1, 1]} : vector<8x128xf32> to vector<8x32xf32>
    %31 = arith.mulf %28, %17 : vector<8x32xf32>
    %32 = arith.mulf %27, %30 : vector<8x32xf32>
    %33 = arith.addf %31, %32 : vector<8x32xf32>
    %34 = math.tanh %33 : vector<8x32xf32>
    %35 = arith.mulf %29, %34 : vector<8x32xf32>
    %c8 = arith.constant 8 : index
    %c0_26 = arith.constant 0 : index
    %36 = vector.load %arg11[%c8, %c0_26] : memref<64x128xf32, #tpu.memory_space<vmem>>, vector<8x128xf32>
    %cst_27 = arith.constant dense<0.000000e+00> : vector<8x128xf32>
    %37 = tpu.matmul %35, %14, %cst_27 {dimension_numbers = #tpu.dot_dimension_numbers<[1], [0], [0], [1], [0, 0, 1, 1], [], []>} : vector<8x32xf32>, vector<32x128xf32>, vector<8x128xf32> -> vector<8x128xf32>
    %38 = arith.addf %36, %37 : vector<8x128xf32>
    %39 = arith.negf %38 : vector<8x128xf32>
    %40 = math.exp %39 : vector<8x128xf32>
    %cst_28 = arith.constant 1.000000e+00 : f32
    %41 = vector.broadcast %cst_28 : f32 to vector<8x128xf32>
    %42 = arith.addf %41, %40 : vector<8x128xf32>
    %43 = arith.divf %41, %42 : vector<8x128xf32>
    %44 = math.tanh %38 : vector<8x128xf32>
    %45 = vector.extract_strided_slice %43 {offsets = [0, 0], sizes = [8, 32], strides = [1, 1]} : vector<8x128xf32> to vector<8x32xf32>
    %46 = vector.extract_strided_slice %43 {offsets = [0, 32], sizes = [8, 32], strides = [1, 1]} : vector<8x128xf32> to vector<8x32xf32>
    %47 = vector.extract_strided_slice %43 {offsets = [0, 96], sizes = [8, 32], strides = [1, 1]} : vector<8x128xf32> to vector<8x32xf32>
    %48 = vector.extract_strided_slice %44 {offsets = [0, 64], sizes = [8, 32], strides = [1, 1]} : vector<8x128xf32> to vector<8x32xf32>
    %49 = arith.mulf %46, %33 : vector<8x32xf32>
    %50 = arith.mulf %45, %48 : vector<8x32xf32>
    %51 = arith.addf %49, %50 : vector<8x32xf32>
    %52 = math.tanh %51 : vector<8x32xf32>
    %53 = arith.mulf %47, %52 : vector<8x32xf32>
    %c16 = arith.constant 16 : index
    %c0_29 = arith.constant 0 : index
    %54 = vector.load %arg11[%c16, %c0_29] : memref<64x128xf32, #tpu.memory_space<vmem>>, vector<8x128xf32>
    %cst_30 = arith.constant dense<0.000000e+00> : vector<8x128xf32>
    %55 = tpu.matmul %53, %14, %cst_30 {dimension_numbers = #tpu.dot_dimension_numbers<[1], [0], [0], [1], [0, 0, 1, 1], [], []>} : vector<8x32xf32>, vector<32x128xf32>, vector<8x128xf32> -> vector<8x128xf32>
    %56 = arith.addf %54, %55 : vector<8x128xf32>
    %57 = arith.negf %56 : vector<8x128xf32>
    %58 = math.exp %57 : vector<8x128xf32>
    %cst_31 = arith.constant 1.000000e+00 : f32
    %59 = vector.broadcast %cst_31 : f32 to vector<8x128xf32>
    %60 = arith.addf %59, %58 : vector<8x128xf32>
    %61 = arith.divf %59, %60 : vector<8x128xf32>
    %62 = math.tanh %56 : vector<8x128xf32>
    %63 = vector.extract_strided_slice %61 {offsets = [0, 0], sizes = [8, 32], strides = [1, 1]} : vector<8x128xf32> to vector<8x32xf32>
    %64 = vector.extract_strided_slice %61 {offsets = [0, 32], sizes = [8, 32], strides = [1, 1]} : vector<8x128xf32> to vector<8x32xf32>
    %65 = vector.extract_strided_slice %61 {offsets = [0, 96], sizes = [8, 32], strides = [1, 1]} : vector<8x128xf32> to vector<8x32xf32>
    %66 = vector.extract_strided_slice %62 {offsets = [0, 64], sizes = [8, 32], strides = [1, 1]} : vector<8x128xf32> to vector<8x32xf32>
    %67 = arith.mulf %64, %51 : vector<8x32xf32>
    %68 = arith.mulf %63, %66 : vector<8x32xf32>
    %69 = arith.addf %67, %68 : vector<8x32xf32>
    %70 = math.tanh %69 : vector<8x32xf32>
    %71 = arith.mulf %65, %70 : vector<8x32xf32>
    %c24 = arith.constant 24 : index
    %c0_32 = arith.constant 0 : index
    %72 = vector.load %arg11[%c24, %c0_32] : memref<64x128xf32, #tpu.memory_space<vmem>>, vector<8x128xf32>
    %cst_33 = arith.constant dense<0.000000e+00> : vector<8x128xf32>
    %73 = tpu.matmul %71, %14, %cst_33 {dimension_numbers = #tpu.dot_dimension_numbers<[1], [0], [0], [1], [0, 0, 1, 1], [], []>} : vector<8x32xf32>, vector<32x128xf32>, vector<8x128xf32> -> vector<8x128xf32>
    %74 = arith.addf %72, %73 : vector<8x128xf32>
    %75 = arith.negf %74 : vector<8x128xf32>
    %76 = math.exp %75 : vector<8x128xf32>
    %cst_34 = arith.constant 1.000000e+00 : f32
    %77 = vector.broadcast %cst_34 : f32 to vector<8x128xf32>
    %78 = arith.addf %77, %76 : vector<8x128xf32>
    %79 = arith.divf %77, %78 : vector<8x128xf32>
    %80 = math.tanh %74 : vector<8x128xf32>
    %81 = vector.extract_strided_slice %79 {offsets = [0, 0], sizes = [8, 32], strides = [1, 1]} : vector<8x128xf32> to vector<8x32xf32>
    %82 = vector.extract_strided_slice %79 {offsets = [0, 32], sizes = [8, 32], strides = [1, 1]} : vector<8x128xf32> to vector<8x32xf32>
    %83 = vector.extract_strided_slice %79 {offsets = [0, 96], sizes = [8, 32], strides = [1, 1]} : vector<8x128xf32> to vector<8x32xf32>
    %84 = vector.extract_strided_slice %80 {offsets = [0, 64], sizes = [8, 32], strides = [1, 1]} : vector<8x128xf32> to vector<8x32xf32>
    %85 = arith.mulf %82, %69 : vector<8x32xf32>
    %86 = arith.mulf %81, %84 : vector<8x32xf32>
    %87 = arith.addf %85, %86 : vector<8x32xf32>
    %88 = math.tanh %87 : vector<8x32xf32>
    %89 = arith.mulf %83, %88 : vector<8x32xf32>
    %c32 = arith.constant 32 : index
    %c0_35 = arith.constant 0 : index
    %90 = vector.load %arg11[%c32, %c0_35] : memref<64x128xf32, #tpu.memory_space<vmem>>, vector<8x128xf32>
    %cst_36 = arith.constant dense<0.000000e+00> : vector<8x128xf32>
    %91 = tpu.matmul %89, %14, %cst_36 {dimension_numbers = #tpu.dot_dimension_numbers<[1], [0], [0], [1], [0, 0, 1, 1], [], []>} : vector<8x32xf32>, vector<32x128xf32>, vector<8x128xf32> -> vector<8x128xf32>
    %92 = arith.addf %90, %91 : vector<8x128xf32>
    %93 = arith.negf %92 : vector<8x128xf32>
    %94 = math.exp %93 : vector<8x128xf32>
    %cst_37 = arith.constant 1.000000e+00 : f32
    %95 = vector.broadcast %cst_37 : f32 to vector<8x128xf32>
    %96 = arith.addf %95, %94 : vector<8x128xf32>
    %97 = arith.divf %95, %96 : vector<8x128xf32>
    %98 = math.tanh %92 : vector<8x128xf32>
    %99 = vector.extract_strided_slice %97 {offsets = [0, 0], sizes = [8, 32], strides = [1, 1]} : vector<8x128xf32> to vector<8x32xf32>
    %100 = vector.extract_strided_slice %97 {offsets = [0, 32], sizes = [8, 32], strides = [1, 1]} : vector<8x128xf32> to vector<8x32xf32>
    %101 = vector.extract_strided_slice %97 {offsets = [0, 96], sizes = [8, 32], strides = [1, 1]} : vector<8x128xf32> to vector<8x32xf32>
    %102 = vector.extract_strided_slice %98 {offsets = [0, 64], sizes = [8, 32], strides = [1, 1]} : vector<8x128xf32> to vector<8x32xf32>
    %103 = arith.mulf %100, %87 : vector<8x32xf32>
    %104 = arith.mulf %99, %102 : vector<8x32xf32>
    %105 = arith.addf %103, %104 : vector<8x32xf32>
    %106 = math.tanh %105 : vector<8x32xf32>
    %107 = arith.mulf %101, %106 : vector<8x32xf32>
    %c40 = arith.constant 40 : index
    %c0_38 = arith.constant 0 : index
    %108 = vector.load %arg11[%c40, %c0_38] : memref<64x128xf32, #tpu.memory_space<vmem>>, vector<8x128xf32>
    %cst_39 = arith.constant dense<0.000000e+00> : vector<8x128xf32>
    %109 = tpu.matmul %107, %14, %cst_39 {dimension_numbers = #tpu.dot_dimension_numbers<[1], [0], [0], [1], [0, 0, 1, 1], [], []>} : vector<8x32xf32>, vector<32x128xf32>, vector<8x128xf32> -> vector<8x128xf32>
    %110 = arith.addf %108, %109 : vector<8x128xf32>
    %111 = arith.negf %110 : vector<8x128xf32>
    %112 = math.exp %111 : vector<8x128xf32>
    %cst_40 = arith.constant 1.000000e+00 : f32
    %113 = vector.broadcast %cst_40 : f32 to vector<8x128xf32>
    %114 = arith.addf %113, %112 : vector<8x128xf32>
    %115 = arith.divf %113, %114 : vector<8x128xf32>
    %116 = math.tanh %110 : vector<8x128xf32>
    %117 = vector.extract_strided_slice %115 {offsets = [0, 0], sizes = [8, 32], strides = [1, 1]} : vector<8x128xf32> to vector<8x32xf32>
    %118 = vector.extract_strided_slice %115 {offsets = [0, 32], sizes = [8, 32], strides = [1, 1]} : vector<8x128xf32> to vector<8x32xf32>
    %119 = vector.extract_strided_slice %115 {offsets = [0, 96], sizes = [8, 32], strides = [1, 1]} : vector<8x128xf32> to vector<8x32xf32>
    %120 = vector.extract_strided_slice %116 {offsets = [0, 64], sizes = [8, 32], strides = [1, 1]} : vector<8x128xf32> to vector<8x32xf32>
    %121 = arith.mulf %118, %105 : vector<8x32xf32>
    %122 = arith.mulf %117, %120 : vector<8x32xf32>
    %123 = arith.addf %121, %122 : vector<8x32xf32>
    %124 = math.tanh %123 : vector<8x32xf32>
    %125 = arith.mulf %119, %124 : vector<8x32xf32>
    %c48 = arith.constant 48 : index
    %c0_41 = arith.constant 0 : index
    %126 = vector.load %arg11[%c48, %c0_41] : memref<64x128xf32, #tpu.memory_space<vmem>>, vector<8x128xf32>
    %cst_42 = arith.constant dense<0.000000e+00> : vector<8x128xf32>
    %127 = tpu.matmul %125, %14, %cst_42 {dimension_numbers = #tpu.dot_dimension_numbers<[1], [0], [0], [1], [0, 0, 1, 1], [], []>} : vector<8x32xf32>, vector<32x128xf32>, vector<8x128xf32> -> vector<8x128xf32>
    %128 = arith.addf %126, %127 : vector<8x128xf32>
    %129 = arith.negf %128 : vector<8x128xf32>
    %130 = math.exp %129 : vector<8x128xf32>
    %cst_43 = arith.constant 1.000000e+00 : f32
    %131 = vector.broadcast %cst_43 : f32 to vector<8x128xf32>
    %132 = arith.addf %131, %130 : vector<8x128xf32>
    %133 = arith.divf %131, %132 : vector<8x128xf32>
    %134 = math.tanh %128 : vector<8x128xf32>
    %135 = vector.extract_strided_slice %133 {offsets = [0, 0], sizes = [8, 32], strides = [1, 1]} : vector<8x128xf32> to vector<8x32xf32>
    %136 = vector.extract_strided_slice %133 {offsets = [0, 32], sizes = [8, 32], strides = [1, 1]} : vector<8x128xf32> to vector<8x32xf32>
    %137 = vector.extract_strided_slice %133 {offsets = [0, 96], sizes = [8, 32], strides = [1, 1]} : vector<8x128xf32> to vector<8x32xf32>
    %138 = vector.extract_strided_slice %134 {offsets = [0, 64], sizes = [8, 32], strides = [1, 1]} : vector<8x128xf32> to vector<8x32xf32>
    %139 = arith.mulf %136, %123 : vector<8x32xf32>
    %140 = arith.mulf %135, %138 : vector<8x32xf32>
    %141 = arith.addf %139, %140 : vector<8x32xf32>
    %142 = math.tanh %141 : vector<8x32xf32>
    %143 = arith.mulf %137, %142 : vector<8x32xf32>
    %c56 = arith.constant 56 : index
    %c0_44 = arith.constant 0 : index
    %144 = vector.load %arg11[%c56, %c0_44] : memref<64x128xf32, #tpu.memory_space<vmem>>, vector<8x128xf32>
    %cst_45 = arith.constant dense<0.000000e+00> : vector<8x128xf32>
    %145 = tpu.matmul %143, %14, %cst_45 {dimension_numbers = #tpu.dot_dimension_numbers<[1], [0], [0], [1], [0, 0, 1, 1], [], []>} : vector<8x32xf32>, vector<32x128xf32>, vector<8x128xf32> -> vector<8x128xf32>
    %146 = arith.addf %144, %145 : vector<8x128xf32>
    %147 = arith.negf %146 : vector<8x128xf32>
    %148 = math.exp %147 : vector<8x128xf32>
    %cst_46 = arith.constant 1.000000e+00 : f32
    %149 = vector.broadcast %cst_46 : f32 to vector<8x128xf32>
    %150 = arith.addf %149, %148 : vector<8x128xf32>
    %151 = arith.divf %149, %150 : vector<8x128xf32>
    %152 = math.tanh %146 : vector<8x128xf32>
    %153 = vector.extract_strided_slice %151 {offsets = [0, 0], sizes = [8, 32], strides = [1, 1]} : vector<8x128xf32> to vector<8x32xf32>
    %154 = vector.extract_strided_slice %151 {offsets = [0, 32], sizes = [8, 32], strides = [1, 1]} : vector<8x128xf32> to vector<8x32xf32>
    %155 = vector.extract_strided_slice %151 {offsets = [0, 96], sizes = [8, 32], strides = [1, 1]} : vector<8x128xf32> to vector<8x32xf32>
    %156 = vector.extract_strided_slice %152 {offsets = [0, 64], sizes = [8, 32], strides = [1, 1]} : vector<8x128xf32> to vector<8x32xf32>
    %157 = arith.mulf %154, %141 : vector<8x32xf32>
    %158 = arith.mulf %153, %156 : vector<8x32xf32>
    %159 = arith.addf %157, %158 : vector<8x32xf32>
    %160 = math.tanh %159 : vector<8x32xf32>
    %161 = arith.mulf %155, %160 : vector<8x32xf32>
    %c0_47 = arith.constant 0 : index
    %c0_48 = arith.constant 0 : index
    %162 = vector.load %arg12[%c0_47, %c0_48] : memref<192x128xf32, #tpu.memory_space<vmem>>, vector<8x128xf32>
    %cst_49 = arith.constant dense<0.000000e+00> : vector<8x128xf32>
    %163 = tpu.matmul %161, %15, %cst_49 {dimension_numbers = #tpu.dot_dimension_numbers<[1], [0], [0], [1], [0, 0, 1, 1], [], []>} : vector<8x32xf32>, vector<32x128xf32>, vector<8x128xf32> -> vector<8x128xf32>
    %164 = arith.addf %162, %163 : vector<8x128xf32>
    %165 = arith.negf %164 : vector<8x128xf32>
    %166 = math.exp %165 : vector<8x128xf32>
    %cst_50 = arith.constant 1.000000e+00 : f32
    %167 = vector.broadcast %cst_50 : f32 to vector<8x128xf32>
    %168 = arith.addf %167, %166 : vector<8x128xf32>
    %169 = arith.divf %167, %168 : vector<8x128xf32>
    %170 = math.tanh %164 : vector<8x128xf32>
    %171 = vector.extract_strided_slice %169 {offsets = [0, 0], sizes = [8, 32], strides = [1, 1]} : vector<8x128xf32> to vector<8x32xf32>
    %172 = vector.extract_strided_slice %169 {offsets = [0, 32], sizes = [8, 32], strides = [1, 1]} : vector<8x128xf32> to vector<8x32xf32>
    %173 = vector.extract_strided_slice %169 {offsets = [0, 96], sizes = [8, 32], strides = [1, 1]} : vector<8x128xf32> to vector<8x32xf32>
    %174 = vector.extract_strided_slice %170 {offsets = [0, 64], sizes = [8, 32], strides = [1, 1]} : vector<8x128xf32> to vector<8x32xf32>
    %175 = arith.mulf %172, %159 : vector<8x32xf32>
    %176 = arith.mulf %171, %174 : vector<8x32xf32>
    %177 = arith.addf %175, %176 : vector<8x32xf32>
    %178 = math.tanh %177 : vector<8x32xf32>
    %179 = arith.mulf %173, %178 : vector<8x32xf32>
    %c0_51 = arith.constant 0 : index
    %c0_52 = arith.constant 0 : index
    %180 = vector.load %arg13[%c0_51, %c0_52] : memref<24x256xf32, #tpu.memory_space<vmem>>, vector<8x32xf32>
    tpu.vector_store %arg13[%c0_51, %c0_52], %179 {strides = array<i32>} : memref<24x256xf32, #tpu.memory_space<vmem>>, vector<8x32xf32>,
    %c8_53 = arith.constant 8 : index
    %c0_54 = arith.constant 0 : index
    %181 = vector.load %arg12[%c8_53, %c0_54] : memref<192x128xf32, #tpu.memory_space<vmem>>, vector<8x128xf32>
    %cst_55 = arith.constant dense<0.000000e+00> : vector<8x128xf32>
    %182 = tpu.matmul %179, %15, %cst_55 {dimension_numbers = #tpu.dot_dimension_numbers<[1], [0], [0], [1], [0, 0, 1, 1], [], []>} : vector<8x32xf32>, vector<32x128xf32>, vector<8x128xf32> -> vector<8x128xf32>
    %183 = arith.addf %181, %182 : vector<8x128xf32>
    %184 = arith.negf %183 : vector<8x128xf32>
    %185 = math.exp %184 : vector<8x128xf32>
    %cst_56 = arith.constant 1.000000e+00 : f32
    %186 = vector.broadcast %cst_56 : f32 to vector<8x128xf32>
    %187 = arith.addf %186, %185 : vector<8x128xf32>
    %188 = arith.divf %186, %187 : vector<8x128xf32>
    %189 = math.tanh %183 : vector<8x128xf32>
    %190 = vector.extract_strided_slice %188 {offsets = [0, 0], sizes = [8, 32], strides = [1, 1]} : vector<8x128xf32> to vector<8x32xf32>
    %191 = vector.extract_strided_slice %188 {offsets = [0, 32], sizes = [8, 32], strides = [1, 1]} : vector<8x128xf32> to vector<8x32xf32>
    %192 = vector.extract_strided_slice %188 {offsets = [0, 96], sizes = [8, 32], strides = [1, 1]} : vector<8x128xf32> to vector<8x32xf32>
    %193 = vector.extract_strided_slice %189 {offsets = [0, 64], sizes = [8, 32], strides = [1, 1]} : vector<8x128xf32> to vector<8x32xf32>
    %194 = arith.mulf %191, %177 : vector<8x32xf32>
    %195 = arith.mulf %190, %193 : vector<8x32xf32>
    %196 = arith.addf %194, %195 : vector<8x32xf32>
    %197 = math.tanh %196 : vector<8x32xf32>
    %198 = arith.mulf %192, %197 : vector<8x32xf32>
    %c0_57 = arith.constant 0 : index
    %c32_58 = arith.constant 32 : index
    %199 = vector.load %arg13[%c0_57, %c32_58] : memref<24x256xf32, #tpu.memory_space<vmem>>, vector<8x32xf32>
    tpu.vector_store %arg13[%c0_57, %c32_58], %198 {strides = array<i32>} : memref<24x256xf32, #tpu.memory_space<vmem>>, vector<8x32xf32>,
    %c16_59 = arith.constant 16 : index
    %c0_60 = arith.constant 0 : index
    %200 = vector.load %arg12[%c16_59, %c0_60] : memref<192x128xf32, #tpu.memory_space<vmem>>, vector<8x128xf32>
    %cst_61 = arith.constant dense<0.000000e+00> : vector<8x128xf32>
    %201 = tpu.matmul %198, %15, %cst_61 {dimension_numbers = #tpu.dot_dimension_numbers<[1], [0], [0], [1], [0, 0, 1, 1], [], []>} : vector<8x32xf32>, vector<32x128xf32>, vector<8x128xf32> -> vector<8x128xf32>
    %202 = arith.addf %200, %201 : vector<8x128xf32>
    %203 = arith.negf %202 : vector<8x128xf32>
    %204 = math.exp %203 : vector<8x128xf32>
    %cst_62 = arith.constant 1.000000e+00 : f32
    %205 = vector.broadcast %cst_62 : f32 to vector<8x128xf32>
    %206 = arith.addf %205, %204 : vector<8x128xf32>
    %207 = arith.divf %205, %206 : vector<8x128xf32>
    %208 = math.tanh %202 : vector<8x128xf32>
    %209 = vector.extract_strided_slice %207 {offsets = [0, 0], sizes = [8, 32], strides = [1, 1]} : vector<8x128xf32> to vector<8x32xf32>
    %210 = vector.extract_strided_slice %207 {offsets = [0, 32], sizes = [8, 32], strides = [1, 1]} : vector<8x128xf32> to vector<8x32xf32>
    %211 = vector.extract_strided_slice %207 {offsets = [0, 96], sizes = [8, 32], strides = [1, 1]} : vector<8x128xf32> to vector<8x32xf32>
    %212 = vector.extract_strided_slice %208 {offsets = [0, 64], sizes = [8, 32], strides = [1, 1]} : vector<8x128xf32> to vector<8x32xf32>
    %213 = arith.mulf %210, %196 : vector<8x32xf32>
    %214 = arith.mulf %209, %212 : vector<8x32xf32>
    %215 = arith.addf %213, %214 : vector<8x32xf32>
    %216 = math.tanh %215 : vector<8x32xf32>
    %217 = arith.mulf %211, %216 : vector<8x32xf32>
    %c0_63 = arith.constant 0 : index
    %c64 = arith.constant 64 : index
    %218 = vector.load %arg13[%c0_63, %c64] : memref<24x256xf32, #tpu.memory_space<vmem>>, vector<8x32xf32>
    tpu.vector_store %arg13[%c0_63, %c64], %217 {strides = array<i32>} : memref<24x256xf32, #tpu.memory_space<vmem>>, vector<8x32xf32>,
    %c24_64 = arith.constant 24 : index
    %c0_65 = arith.constant 0 : index
    %219 = vector.load %arg12[%c24_64, %c0_65] : memref<192x128xf32, #tpu.memory_space<vmem>>, vector<8x128xf32>
    %cst_66 = arith.constant dense<0.000000e+00> : vector<8x128xf32>
    %220 = tpu.matmul %217, %15, %cst_66 {dimension_numbers = #tpu.dot_dimension_numbers<[1], [0], [0], [1], [0, 0, 1, 1], [], []>} : vector<8x32xf32>, vector<32x128xf32>, vector<8x128xf32> -> vector<8x128xf32>
    %221 = arith.addf %219, %220 : vector<8x128xf32>
    %222 = arith.negf %221 : vector<8x128xf32>
    %223 = math.exp %222 : vector<8x128xf32>
    %cst_67 = arith.constant 1.000000e+00 : f32
    %224 = vector.broadcast %cst_67 : f32 to vector<8x128xf32>
    %225 = arith.addf %224, %223 : vector<8x128xf32>
    %226 = arith.divf %224, %225 : vector<8x128xf32>
    %227 = math.tanh %221 : vector<8x128xf32>
    %228 = vector.extract_strided_slice %226 {offsets = [0, 0], sizes = [8, 32], strides = [1, 1]} : vector<8x128xf32> to vector<8x32xf32>
    %229 = vector.extract_strided_slice %226 {offsets = [0, 32], sizes = [8, 32], strides = [1, 1]} : vector<8x128xf32> to vector<8x32xf32>
    %230 = vector.extract_strided_slice %226 {offsets = [0, 96], sizes = [8, 32], strides = [1, 1]} : vector<8x128xf32> to vector<8x32xf32>
    %231 = vector.extract_strided_slice %227 {offsets = [0, 64], sizes = [8, 32], strides = [1, 1]} : vector<8x128xf32> to vector<8x32xf32>
    %232 = arith.mulf %229, %215 : vector<8x32xf32>
    %233 = arith.mulf %228, %231 : vector<8x32xf32>
    %234 = arith.addf %232, %233 : vector<8x32xf32>
    %235 = math.tanh %234 : vector<8x32xf32>
    %236 = arith.mulf %230, %235 : vector<8x32xf32>
    %c0_68 = arith.constant 0 : index
    %c96 = arith.constant 96 : index
    %237 = vector.load %arg13[%c0_68, %c96] : memref<24x256xf32, #tpu.memory_space<vmem>>, vector<8x32xf32>
    tpu.vector_store %arg13[%c0_68, %c96], %236 {strides = array<i32>} : memref<24x256xf32, #tpu.memory_space<vmem>>, vector<8x32xf32>,
    %c32_69 = arith.constant 32 : index
    %c0_70 = arith.constant 0 : index
    %238 = vector.load %arg12[%c32_69, %c0_70] : memref<192x128xf32, #tpu.memory_space<vmem>>, vector<8x128xf32>
    %cst_71 = arith.constant dense<0.000000e+00> : vector<8x128xf32>
    %239 = tpu.matmul %236, %15, %cst_71 {dimension_numbers = #tpu.dot_dimension_numbers<[1], [0], [0], [1], [0, 0, 1, 1], [], []>} : vector<8x32xf32>, vector<32x128xf32>, vector<8x128xf32> -> vector<8x128xf32>
    %240 = arith.addf %238, %239 : vector<8x128xf32>
    %241 = arith.negf %240 : vector<8x128xf32>
    %242 = math.exp %241 : vector<8x128xf32>
    %cst_72 = arith.constant 1.000000e+00 : f32
    %243 = vector.broadcast %cst_72 : f32 to vector<8x128xf32>
    %244 = arith.addf %243, %242 : vector<8x128xf32>
    %245 = arith.divf %243, %244 : vector<8x128xf32>
    %246 = math.tanh %240 : vector<8x128xf32>
    %247 = vector.extract_strided_slice %245 {offsets = [0, 0], sizes = [8, 32], strides = [1, 1]} : vector<8x128xf32> to vector<8x32xf32>
    %248 = vector.extract_strided_slice %245 {offsets = [0, 32], sizes = [8, 32], strides = [1, 1]} : vector<8x128xf32> to vector<8x32xf32>
    %249 = vector.extract_strided_slice %245 {offsets = [0, 96], sizes = [8, 32], strides = [1, 1]} : vector<8x128xf32> to vector<8x32xf32>
    %250 = vector.extract_strided_slice %246 {offsets = [0, 64], sizes = [8, 32], strides = [1, 1]} : vector<8x128xf32> to vector<8x32xf32>
    %251 = arith.mulf %248, %234 : vector<8x32xf32>
    %252 = arith.mulf %247, %250 : vector<8x32xf32>
    %253 = arith.addf %251, %252 : vector<8x32xf32>
    %254 = math.tanh %253 : vector<8x32xf32>
    %255 = arith.mulf %249, %254 : vector<8x32xf32>
    %c0_73 = arith.constant 0 : index
    %c128 = arith.constant 128 : index
    %256 = vector.load %arg13[%c0_73, %c128] : memref<24x256xf32, #tpu.memory_space<vmem>>, vector<8x32xf32>
    tpu.vector_store %arg13[%c0_73, %c128], %255 {strides = array<i32>} : memref<24x256xf32, #tpu.memory_space<vmem>>, vector<8x32xf32>,
    %c40_74 = arith.constant 40 : index
    %c0_75 = arith.constant 0 : index
    %257 = vector.load %arg12[%c40_74, %c0_75] : memref<192x128xf32, #tpu.memory_space<vmem>>, vector<8x128xf32>
    %cst_76 = arith.constant dense<0.000000e+00> : vector<8x128xf32>
    %258 = tpu.matmul %255, %15, %cst_76 {dimension_numbers = #tpu.dot_dimension_numbers<[1], [0], [0], [1], [0, 0, 1, 1], [], []>} : vector<8x32xf32>, vector<32x128xf32>, vector<8x128xf32> -> vector<8x128xf32>
    %259 = arith.addf %257, %258 : vector<8x128xf32>
    %260 = arith.negf %259 : vector<8x128xf32>
    %261 = math.exp %260 : vector<8x128xf32>
    %cst_77 = arith.constant 1.000000e+00 : f32
    %262 = vector.broadcast %cst_77 : f32 to vector<8x128xf32>
    %263 = arith.addf %262, %261 : vector<8x128xf32>
    %264 = arith.divf %262, %263 : vector<8x128xf32>
    %265 = math.tanh %259 : vector<8x128xf32>
    %266 = vector.extract_strided_slice %264 {offsets = [0, 0], sizes = [8, 32], strides = [1, 1]} : vector<8x128xf32> to vector<8x32xf32>
    %267 = vector.extract_strided_slice %264 {offsets = [0, 32], sizes = [8, 32], strides = [1, 1]} : vector<8x128xf32> to vector<8x32xf32>
    %268 = vector.extract_strided_slice %264 {offsets = [0, 96], sizes = [8, 32], strides = [1, 1]} : vector<8x128xf32> to vector<8x32xf32>
    %269 = vector.extract_strided_slice %265 {offsets = [0, 64], sizes = [8, 32], strides = [1, 1]} : vector<8x128xf32> to vector<8x32xf32>
    %270 = arith.mulf %267, %253 : vector<8x32xf32>
    %271 = arith.mulf %266, %269 : vector<8x32xf32>
    %272 = arith.addf %270, %271 : vector<8x32xf32>
    %273 = math.tanh %272 : vector<8x32xf32>
    %274 = arith.mulf %268, %273 : vector<8x32xf32>
    %c0_78 = arith.constant 0 : index
    %c160 = arith.constant 160 : index
    %275 = vector.load %arg13[%c0_78, %c160] : memref<24x256xf32, #tpu.memory_space<vmem>>, vector<8x32xf32>
    tpu.vector_store %arg13[%c0_78, %c160], %274 {strides = array<i32>} : memref<24x256xf32, #tpu.memory_space<vmem>>, vector<8x32xf32>,
    %c48_79 = arith.constant 48 : index
    %c0_80 = arith.constant 0 : index
    %276 = vector.load %arg12[%c48_79, %c0_80] : memref<192x128xf32, #tpu.memory_space<vmem>>, vector<8x128xf32>
    %cst_81 = arith.constant dense<0.000000e+00> : vector<8x128xf32>
    %277 = tpu.matmul %274, %15, %cst_81 {dimension_numbers = #tpu.dot_dimension_numbers<[1], [0], [0], [1], [0, 0, 1, 1], [], []>} : vector<8x32xf32>, vector<32x128xf32>, vector<8x128xf32> -> vector<8x128xf32>
    %278 = arith.addf %276, %277 : vector<8x128xf32>
    %279 = arith.negf %278 : vector<8x128xf32>
    %280 = math.exp %279 : vector<8x128xf32>
    %cst_82 = arith.constant 1.000000e+00 : f32
    %281 = vector.broadcast %cst_82 : f32 to vector<8x128xf32>
    %282 = arith.addf %281, %280 : vector<8x128xf32>
    %283 = arith.divf %281, %282 : vector<8x128xf32>
    %284 = math.tanh %278 : vector<8x128xf32>
    %285 = vector.extract_strided_slice %283 {offsets = [0, 0], sizes = [8, 32], strides = [1, 1]} : vector<8x128xf32> to vector<8x32xf32>
    %286 = vector.extract_strided_slice %283 {offsets = [0, 32], sizes = [8, 32], strides = [1, 1]} : vector<8x128xf32> to vector<8x32xf32>
    %287 = vector.extract_strided_slice %283 {offsets = [0, 96], sizes = [8, 32], strides = [1, 1]} : vector<8x128xf32> to vector<8x32xf32>
    %288 = vector.extract_strided_slice %284 {offsets = [0, 64], sizes = [8, 32], strides = [1, 1]} : vector<8x128xf32> to vector<8x32xf32>
    %289 = arith.mulf %286, %272 : vector<8x32xf32>
    %290 = arith.mulf %285, %288 : vector<8x32xf32>
    %291 = arith.addf %289, %290 : vector<8x32xf32>
    %292 = math.tanh %291 : vector<8x32xf32>
    %293 = arith.mulf %287, %292 : vector<8x32xf32>
    %c0_83 = arith.constant 0 : index
    %c192 = arith.constant 192 : index
    %294 = vector.load %arg13[%c0_83, %c192] : memref<24x256xf32, #tpu.memory_space<vmem>>, vector<8x32xf32>
    tpu.vector_store %arg13[%c0_83, %c192], %293 {strides = array<i32>} : memref<24x256xf32, #tpu.memory_space<vmem>>, vector<8x32xf32>,
    %c56_84 = arith.constant 56 : index
    %c0_85 = arith.constant 0 : index
    %295 = vector.load %arg12[%c56_84, %c0_85] : memref<192x128xf32, #tpu.memory_space<vmem>>, vector<8x128xf32>
    %cst_86 = arith.constant dense<0.000000e+00> : vector<8x128xf32>
    %296 = tpu.matmul %293, %15, %cst_86 {dimension_numbers = #tpu.dot_dimension_numbers<[1], [0], [0], [1], [0, 0, 1, 1], [], []>} : vector<8x32xf32>, vector<32x128xf32>, vector<8x128xf32> -> vector<8x128xf32>
    %297 = arith.addf %295, %296 : vector<8x128xf32>
    %298 = arith.negf %297 : vector<8x128xf32>
    %299 = math.exp %298 : vector<8x128xf32>
    %cst_87 = arith.constant 1.000000e+00 : f32
    %300 = vector.broadcast %cst_87 : f32 to vector<8x128xf32>
    %301 = arith.addf %300, %299 : vector<8x128xf32>
    %302 = arith.divf %300, %301 : vector<8x128xf32>
    %303 = math.tanh %297 : vector<8x128xf32>
    %304 = vector.extract_strided_slice %302 {offsets = [0, 0], sizes = [8, 32], strides = [1, 1]} : vector<8x128xf32> to vector<8x32xf32>
    %305 = vector.extract_strided_slice %302 {offsets = [0, 32], sizes = [8, 32], strides = [1, 1]} : vector<8x128xf32> to vector<8x32xf32>
    %306 = vector.extract_strided_slice %302 {offsets = [0, 96], sizes = [8, 32], strides = [1, 1]} : vector<8x128xf32> to vector<8x32xf32>
    %307 = vector.extract_strided_slice %303 {offsets = [0, 64], sizes = [8, 32], strides = [1, 1]} : vector<8x128xf32> to vector<8x32xf32>
    %308 = arith.mulf %305, %291 : vector<8x32xf32>
    %309 = arith.mulf %304, %307 : vector<8x32xf32>
    %310 = arith.addf %308, %309 : vector<8x32xf32>
    %311 = math.tanh %310 : vector<8x32xf32>
    %312 = arith.mulf %306, %311 : vector<8x32xf32>
    %c0_88 = arith.constant 0 : index
    %c224 = arith.constant 224 : index
    %313 = vector.load %arg13[%c0_88, %c224] : memref<24x256xf32, #tpu.memory_space<vmem>>, vector<8x32xf32>
    tpu.vector_store %arg13[%c0_88, %c224], %312 {strides = array<i32>} : memref<24x256xf32, #tpu.memory_space<vmem>>, vector<8x32xf32>,
    %c64_89 = arith.constant 64 : index
    %c0_90 = arith.constant 0 : index
    %314 = vector.load %arg12[%c64_89, %c0_90] : memref<192x128xf32, #tpu.memory_space<vmem>>, vector<8x128xf32>
    %cst_91 = arith.constant dense<0.000000e+00> : vector<8x128xf32>
    %315 = tpu.matmul %312, %15, %cst_91 {dimension_numbers = #tpu.dot_dimension_numbers<[1], [0], [0], [1], [0, 0, 1, 1], [], []>} : vector<8x32xf32>, vector<32x128xf32>, vector<8x128xf32> -> vector<8x128xf32>
    %316 = arith.addf %314, %315 : vector<8x128xf32>
    %317 = arith.negf %316 : vector<8x128xf32>
    %318 = math.exp %317 : vector<8x128xf32>
    %cst_92 = arith.constant 1.000000e+00 : f32
    %319 = vector.broadcast %cst_92 : f32 to vector<8x128xf32>
    %320 = arith.addf %319, %318 : vector<8x128xf32>
    %321 = arith.divf %319, %320 : vector<8x128xf32>
    %322 = math.tanh %316 : vector<8x128xf32>
    %323 = vector.extract_strided_slice %321 {offsets = [0, 0], sizes = [8, 32], strides = [1, 1]} : vector<8x128xf32> to vector<8x32xf32>
    %324 = vector.extract_strided_slice %321 {offsets = [0, 32], sizes = [8, 32], strides = [1, 1]} : vector<8x128xf32> to vector<8x32xf32>
    %325 = vector.extract_strided_slice %321 {offsets = [0, 96], sizes = [8, 32], strides = [1, 1]} : vector<8x128xf32> to vector<8x32xf32>
    %326 = vector.extract_strided_slice %322 {offsets = [0, 64], sizes = [8, 32], strides = [1, 1]} : vector<8x128xf32> to vector<8x32xf32>
    %327 = arith.mulf %324, %310 : vector<8x32xf32>
    %328 = arith.mulf %323, %326 : vector<8x32xf32>
    %329 = arith.addf %327, %328 : vector<8x32xf32>
    %330 = math.tanh %329 : vector<8x32xf32>
    %331 = arith.mulf %325, %330 : vector<8x32xf32>
    %c8_93 = arith.constant 8 : index
    %c0_94 = arith.constant 0 : index
    %332 = vector.load %arg13[%c8_93, %c0_94] : memref<24x256xf32, #tpu.memory_space<vmem>>, vector<8x32xf32>
    tpu.vector_store %arg13[%c8_93, %c0_94], %331 {strides = array<i32>} : memref<24x256xf32, #tpu.memory_space<vmem>>, vector<8x32xf32>,
    %c72 = arith.constant 72 : index
    %c0_95 = arith.constant 0 : index
    %333 = vector.load %arg12[%c72, %c0_95] : memref<192x128xf32, #tpu.memory_space<vmem>>, vector<8x128xf32>
    %cst_96 = arith.constant dense<0.000000e+00> : vector<8x128xf32>
    %334 = tpu.matmul %331, %15, %cst_96 {dimension_numbers = #tpu.dot_dimension_numbers<[1], [0], [0], [1], [0, 0, 1, 1], [], []>} : vector<8x32xf32>, vector<32x128xf32>, vector<8x128xf32> -> vector<8x128xf32>
    %335 = arith.addf %333, %334 : vector<8x128xf32>
    %336 = arith.negf %335 : vector<8x128xf32>
    %337 = math.exp %336 : vector<8x128xf32>
    %cst_97 = arith.constant 1.000000e+00 : f32
    %338 = vector.broadcast %cst_97 : f32 to vector<8x128xf32>
    %339 = arith.addf %338, %337 : vector<8x128xf32>
    %340 = arith.divf %338, %339 : vector<8x128xf32>
    %341 = math.tanh %335 : vector<8x128xf32>
    %342 = vector.extract_strided_slice %340 {offsets = [0, 0], sizes = [8, 32], strides = [1, 1]} : vector<8x128xf32> to vector<8x32xf32>
    %343 = vector.extract_strided_slice %340 {offsets = [0, 32], sizes = [8, 32], strides = [1, 1]} : vector<8x128xf32> to vector<8x32xf32>
    %344 = vector.extract_strided_slice %340 {offsets = [0, 96], sizes = [8, 32], strides = [1, 1]} : vector<8x128xf32> to vector<8x32xf32>
    %345 = vector.extract_strided_slice %341 {offsets = [0, 64], sizes = [8, 32], strides = [1, 1]} : vector<8x128xf32> to vector<8x32xf32>
    %346 = arith.mulf %343, %329 : vector<8x32xf32>
    %347 = arith.mulf %342, %345 : vector<8x32xf32>
    %348 = arith.addf %346, %347 : vector<8x32xf32>
    %349 = math.tanh %348 : vector<8x32xf32>
    %350 = arith.mulf %344, %349 : vector<8x32xf32>
    %c8_98 = arith.constant 8 : index
    %c32_99 = arith.constant 32 : index
    %351 = vector.load %arg13[%c8_98, %c32_99] : memref<24x256xf32, #tpu.memory_space<vmem>>, vector<8x32xf32>
    tpu.vector_store %arg13[%c8_98, %c32_99], %350 {strides = array<i32>} : memref<24x256xf32, #tpu.memory_space<vmem>>, vector<8x32xf32>,
    %c80 = arith.constant 80 : index
    %c0_100 = arith.constant 0 : index
    %352 = vector.load %arg12[%c80, %c0_100] : memref<192x128xf32, #tpu.memory_space<vmem>>, vector<8x128xf32>
    %cst_101 = arith.constant dense<0.000000e+00> : vector<8x128xf32>
    %353 = tpu.matmul %350, %15, %cst_101 {dimension_numbers = #tpu.dot_dimension_numbers<[1], [0], [0], [1], [0, 0, 1, 1], [], []>} : vector<8x32xf32>, vector<32x128xf32>, vector<8x128xf32> -> vector<8x128xf32>
    %354 = arith.addf %352, %353 : vector<8x128xf32>
    %355 = arith.negf %354 : vector<8x128xf32>
    %356 = math.exp %355 : vector<8x128xf32>
    %cst_102 = arith.constant 1.000000e+00 : f32
    %357 = vector.broadcast %cst_102 : f32 to vector<8x128xf32>
    %358 = arith.addf %357, %356 : vector<8x128xf32>
    %359 = arith.divf %357, %358 : vector<8x128xf32>
    %360 = math.tanh %354 : vector<8x128xf32>
    %361 = vector.extract_strided_slice %359 {offsets = [0, 0], sizes = [8, 32], strides = [1, 1]} : vector<8x128xf32> to vector<8x32xf32>
    %362 = vector.extract_strided_slice %359 {offsets = [0, 32], sizes = [8, 32], strides = [1, 1]} : vector<8x128xf32> to vector<8x32xf32>
    %363 = vector.extract_strided_slice %359 {offsets = [0, 96], sizes = [8, 32], strides = [1, 1]} : vector<8x128xf32> to vector<8x32xf32>
    %364 = vector.extract_strided_slice %360 {offsets = [0, 64], sizes = [8, 32], strides = [1, 1]} : vector<8x128xf32> to vector<8x32xf32>
    %365 = arith.mulf %362, %348 : vector<8x32xf32>
    %366 = arith.mulf %361, %364 : vector<8x32xf32>
    %367 = arith.addf %365, %366 : vector<8x32xf32>
    %368 = math.tanh %367 : vector<8x32xf32>
    %369 = arith.mulf %363, %368 : vector<8x32xf32>
    %c8_103 = arith.constant 8 : index
    %c64_104 = arith.constant 64 : index
    %370 = vector.load %arg13[%c8_103, %c64_104] : memref<24x256xf32, #tpu.memory_space<vmem>>, vector<8x32xf32>
    tpu.vector_store %arg13[%c8_103, %c64_104], %369 {strides = array<i32>} : memref<24x256xf32, #tpu.memory_space<vmem>>, vector<8x32xf32>,
    %c88 = arith.constant 88 : index
    %c0_105 = arith.constant 0 : index
    %371 = vector.load %arg12[%c88, %c0_105] : memref<192x128xf32, #tpu.memory_space<vmem>>, vector<8x128xf32>
    %cst_106 = arith.constant dense<0.000000e+00> : vector<8x128xf32>
    %372 = tpu.matmul %369, %15, %cst_106 {dimension_numbers = #tpu.dot_dimension_numbers<[1], [0], [0], [1], [0, 0, 1, 1], [], []>} : vector<8x32xf32>, vector<32x128xf32>, vector<8x128xf32> -> vector<8x128xf32>
    %373 = arith.addf %371, %372 : vector<8x128xf32>
    %374 = arith.negf %373 : vector<8x128xf32>
    %375 = math.exp %374 : vector<8x128xf32>
    %cst_107 = arith.constant 1.000000e+00 : f32
    %376 = vector.broadcast %cst_107 : f32 to vector<8x128xf32>
    %377 = arith.addf %376, %375 : vector<8x128xf32>
    %378 = arith.divf %376, %377 : vector<8x128xf32>
    %379 = math.tanh %373 : vector<8x128xf32>
    %380 = vector.extract_strided_slice %378 {offsets = [0, 0], sizes = [8, 32], strides = [1, 1]} : vector<8x128xf32> to vector<8x32xf32>
    %381 = vector.extract_strided_slice %378 {offsets = [0, 32], sizes = [8, 32], strides = [1, 1]} : vector<8x128xf32> to vector<8x32xf32>
    %382 = vector.extract_strided_slice %378 {offsets = [0, 96], sizes = [8, 32], strides = [1, 1]} : vector<8x128xf32> to vector<8x32xf32>
    %383 = vector.extract_strided_slice %379 {offsets = [0, 64], sizes = [8, 32], strides = [1, 1]} : vector<8x128xf32> to vector<8x32xf32>
    %384 = arith.mulf %381, %367 : vector<8x32xf32>
    %385 = arith.mulf %380, %383 : vector<8x32xf32>
    %386 = arith.addf %384, %385 : vector<8x32xf32>
    %387 = math.tanh %386 : vector<8x32xf32>
    %388 = arith.mulf %382, %387 : vector<8x32xf32>
    %c8_108 = arith.constant 8 : index
    %c96_109 = arith.constant 96 : index
    %389 = vector.load %arg13[%c8_108, %c96_109] : memref<24x256xf32, #tpu.memory_space<vmem>>, vector<8x32xf32>
    tpu.vector_store %arg13[%c8_108, %c96_109], %388 {strides = array<i32>} : memref<24x256xf32, #tpu.memory_space<vmem>>, vector<8x32xf32>,
    %c96_110 = arith.constant 96 : index
    %c0_111 = arith.constant 0 : index
    %390 = vector.load %arg12[%c96_110, %c0_111] : memref<192x128xf32, #tpu.memory_space<vmem>>, vector<8x128xf32>
    %cst_112 = arith.constant dense<0.000000e+00> : vector<8x128xf32>
    %391 = tpu.matmul %388, %15, %cst_112 {dimension_numbers = #tpu.dot_dimension_numbers<[1], [0], [0], [1], [0, 0, 1, 1], [], []>} : vector<8x32xf32>, vector<32x128xf32>, vector<8x128xf32> -> vector<8x128xf32>
    %392 = arith.addf %390, %391 : vector<8x128xf32>
    %393 = arith.negf %392 : vector<8x128xf32>
    %394 = math.exp %393 : vector<8x128xf32>
    %cst_113 = arith.constant 1.000000e+00 : f32
    %395 = vector.broadcast %cst_113 : f32 to vector<8x128xf32>
    %396 = arith.addf %395, %394 : vector<8x128xf32>
    %397 = arith.divf %395, %396 : vector<8x128xf32>
    %398 = math.tanh %392 : vector<8x128xf32>
    %399 = vector.extract_strided_slice %397 {offsets = [0, 0], sizes = [8, 32], strides = [1, 1]} : vector<8x128xf32> to vector<8x32xf32>
    %400 = vector.extract_strided_slice %397 {offsets = [0, 32], sizes = [8, 32], strides = [1, 1]} : vector<8x128xf32> to vector<8x32xf32>
    %401 = vector.extract_strided_slice %397 {offsets = [0, 96], sizes = [8, 32], strides = [1, 1]} : vector<8x128xf32> to vector<8x32xf32>
    %402 = vector.extract_strided_slice %398 {offsets = [0, 64], sizes = [8, 32], strides = [1, 1]} : vector<8x128xf32> to vector<8x32xf32>
    %403 = arith.mulf %400, %386 : vector<8x32xf32>
    %404 = arith.mulf %399, %402 : vector<8x32xf32>
    %405 = arith.addf %403, %404 : vector<8x32xf32>
    %406 = math.tanh %405 : vector<8x32xf32>
    %407 = arith.mulf %401, %406 : vector<8x32xf32>
    %c8_114 = arith.constant 8 : index
    %c128_115 = arith.constant 128 : index
    %408 = vector.load %arg13[%c8_114, %c128_115] : memref<24x256xf32, #tpu.memory_space<vmem>>, vector<8x32xf32>
    tpu.vector_store %arg13[%c8_114, %c128_115], %407 {strides = array<i32>} : memref<24x256xf32, #tpu.memory_space<vmem>>, vector<8x32xf32>,
    %c104 = arith.constant 104 : index
    %c0_116 = arith.constant 0 : index
    %409 = vector.load %arg12[%c104, %c0_116] : memref<192x128xf32, #tpu.memory_space<vmem>>, vector<8x128xf32>
    %cst_117 = arith.constant dense<0.000000e+00> : vector<8x128xf32>
    %410 = tpu.matmul %407, %15, %cst_117 {dimension_numbers = #tpu.dot_dimension_numbers<[1], [0], [0], [1], [0, 0, 1, 1], [], []>} : vector<8x32xf32>, vector<32x128xf32>, vector<8x128xf32> -> vector<8x128xf32>
    %411 = arith.addf %409, %410 : vector<8x128xf32>
    %412 = arith.negf %411 : vector<8x128xf32>
    %413 = math.exp %412 : vector<8x128xf32>
    %cst_118 = arith.constant 1.000000e+00 : f32
    %414 = vector.broadcast %cst_118 : f32 to vector<8x128xf32>
    %415 = arith.addf %414, %413 : vector<8x128xf32>
    %416 = arith.divf %414, %415 : vector<8x128xf32>
    %417 = math.tanh %411 : vector<8x128xf32>
    %418 = vector.extract_strided_slice %416 {offsets = [0, 0], sizes = [8, 32], strides = [1, 1]} : vector<8x128xf32> to vector<8x32xf32>
    %419 = vector.extract_strided_slice %416 {offsets = [0, 32], sizes = [8, 32], strides = [1, 1]} : vector<8x128xf32> to vector<8x32xf32>
    %420 = vector.extract_strided_slice %416 {offsets = [0, 96], sizes = [8, 32], strides = [1, 1]} : vector<8x128xf32> to vector<8x32xf32>
    %421 = vector.extract_strided_slice %417 {offsets = [0, 64], sizes = [8, 32], strides = [1, 1]} : vector<8x128xf32> to vector<8x32xf32>
    %422 = arith.mulf %419, %405 : vector<8x32xf32>
    %423 = arith.mulf %418, %421 : vector<8x32xf32>
    %424 = arith.addf %422, %423 : vector<8x32xf32>
    %425 = math.tanh %424 : vector<8x32xf32>
    %426 = arith.mulf %420, %425 : vector<8x32xf32>
    %c8_119 = arith.constant 8 : index
    %c160_120 = arith.constant 160 : index
    %427 = vector.load %arg13[%c8_119, %c160_120] : memref<24x256xf32, #tpu.memory_space<vmem>>, vector<8x32xf32>
    tpu.vector_store %arg13[%c8_119, %c160_120], %426 {strides = array<i32>} : memref<24x256xf32, #tpu.memory_space<vmem>>, vector<8x32xf32>,
    %c112 = arith.constant 112 : index
    %c0_121 = arith.constant 0 : index
    %428 = vector.load %arg12[%c112, %c0_121] : memref<192x128xf32, #tpu.memory_space<vmem>>, vector<8x128xf32>
    %cst_122 = arith.constant dense<0.000000e+00> : vector<8x128xf32>
    %429 = tpu.matmul %426, %15, %cst_122 {dimension_numbers = #tpu.dot_dimension_numbers<[1], [0], [0], [1], [0, 0, 1, 1], [], []>} : vector<8x32xf32>, vector<32x128xf32>, vector<8x128xf32> -> vector<8x128xf32>
    %430 = arith.addf %428, %429 : vector<8x128xf32>
    %431 = arith.negf %430 : vector<8x128xf32>
    %432 = math.exp %431 : vector<8x128xf32>
    %cst_123 = arith.constant 1.000000e+00 : f32
    %433 = vector.broadcast %cst_123 : f32 to vector<8x128xf32>
    %434 = arith.addf %433, %432 : vector<8x128xf32>
    %435 = arith.divf %433, %434 : vector<8x128xf32>
    %436 = math.tanh %430 : vector<8x128xf32>
    %437 = vector.extract_strided_slice %435 {offsets = [0, 0], sizes = [8, 32], strides = [1, 1]} : vector<8x128xf32> to vector<8x32xf32>
    %438 = vector.extract_strided_slice %435 {offsets = [0, 32], sizes = [8, 32], strides = [1, 1]} : vector<8x128xf32> to vector<8x32xf32>
    %439 = vector.extract_strided_slice %435 {offsets = [0, 96], sizes = [8, 32], strides = [1, 1]} : vector<8x128xf32> to vector<8x32xf32>
    %440 = vector.extract_strided_slice %436 {offsets = [0, 64], sizes = [8, 32], strides = [1, 1]} : vector<8x128xf32> to vector<8x32xf32>
    %441 = arith.mulf %438, %424 : vector<8x32xf32>
    %442 = arith.mulf %437, %440 : vector<8x32xf32>
    %443 = arith.addf %441, %442 : vector<8x32xf32>
    %444 = math.tanh %443 : vector<8x32xf32>
    %445 = arith.mulf %439, %444 : vector<8x32xf32>
    %c8_124 = arith.constant 8 : index
    %c192_125 = arith.constant 192 : index
    %446 = vector.load %arg13[%c8_124, %c192_125] : memref<24x256xf32, #tpu.memory_space<vmem>>, vector<8x32xf32>
    tpu.vector_store %arg13[%c8_124, %c192_125], %445 {strides = array<i32>} : memref<24x256xf32, #tpu.memory_space<vmem>>, vector<8x32xf32>,
    %c120 = arith.constant 120 : index
    %c0_126 = arith.constant 0 : index
    %447 = vector.load %arg12[%c120, %c0_126] : memref<192x128xf32, #tpu.memory_space<vmem>>, vector<8x128xf32>
    %cst_127 = arith.constant dense<0.000000e+00> : vector<8x128xf32>
    %448 = tpu.matmul %445, %15, %cst_127 {dimension_numbers = #tpu.dot_dimension_numbers<[1], [0], [0], [1], [0, 0, 1, 1], [], []>} : vector<8x32xf32>, vector<32x128xf32>, vector<8x128xf32> -> vector<8x128xf32>
    %449 = arith.addf %447, %448 : vector<8x128xf32>
    %450 = arith.negf %449 : vector<8x128xf32>
    %451 = math.exp %450 : vector<8x128xf32>
    %cst_128 = arith.constant 1.000000e+00 : f32
    %452 = vector.broadcast %cst_128 : f32 to vector<8x128xf32>
    %453 = arith.addf %452, %451 : vector<8x128xf32>
    %454 = arith.divf %452, %453 : vector<8x128xf32>
    %455 = math.tanh %449 : vector<8x128xf32>
    %456 = vector.extract_strided_slice %454 {offsets = [0, 0], sizes = [8, 32], strides = [1, 1]} : vector<8x128xf32> to vector<8x32xf32>
    %457 = vector.extract_strided_slice %454 {offsets = [0, 32], sizes = [8, 32], strides = [1, 1]} : vector<8x128xf32> to vector<8x32xf32>
    %458 = vector.extract_strided_slice %454 {offsets = [0, 96], sizes = [8, 32], strides = [1, 1]} : vector<8x128xf32> to vector<8x32xf32>
    %459 = vector.extract_strided_slice %455 {offsets = [0, 64], sizes = [8, 32], strides = [1, 1]} : vector<8x128xf32> to vector<8x32xf32>
    %460 = arith.mulf %457, %443 : vector<8x32xf32>
    %461 = arith.mulf %456, %459 : vector<8x32xf32>
    %462 = arith.addf %460, %461 : vector<8x32xf32>
    %463 = math.tanh %462 : vector<8x32xf32>
    %464 = arith.mulf %458, %463 : vector<8x32xf32>
    %c8_129 = arith.constant 8 : index
    %c224_130 = arith.constant 224 : index
    %465 = vector.load %arg13[%c8_129, %c224_130] : memref<24x256xf32, #tpu.memory_space<vmem>>, vector<8x32xf32>
    tpu.vector_store %arg13[%c8_129, %c224_130], %464 {strides = array<i32>} : memref<24x256xf32, #tpu.memory_space<vmem>>, vector<8x32xf32>,
    %c128_131 = arith.constant 128 : index
    %c0_132 = arith.constant 0 : index
    %466 = vector.load %arg12[%c128_131, %c0_132] : memref<192x128xf32, #tpu.memory_space<vmem>>, vector<8x128xf32>
    %cst_133 = arith.constant dense<0.000000e+00> : vector<8x128xf32>
    %467 = tpu.matmul %464, %15, %cst_133 {dimension_numbers = #tpu.dot_dimension_numbers<[1], [0], [0], [1], [0, 0, 1, 1], [], []>} : vector<8x32xf32>, vector<32x128xf32>, vector<8x128xf32> -> vector<8x128xf32>
    %468 = arith.addf %466, %467 : vector<8x128xf32>
    %469 = arith.negf %468 : vector<8x128xf32>
    %470 = math.exp %469 : vector<8x128xf32>
    %cst_134 = arith.constant 1.000000e+00 : f32
    %471 = vector.broadcast %cst_134 : f32 to vector<8x128xf32>
    %472 = arith.addf %471, %470 : vector<8x128xf32>
    %473 = arith.divf %471, %472 : vector<8x128xf32>
    %474 = math.tanh %468 : vector<8x128xf32>
    %475 = vector.extract_strided_slice %473 {offsets = [0, 0], sizes = [8, 32], strides = [1, 1]} : vector<8x128xf32> to vector<8x32xf32>
    %476 = vector.extract_strided_slice %473 {offsets = [0, 32], sizes = [8, 32], strides = [1, 1]} : vector<8x128xf32> to vector<8x32xf32>
    %477 = vector.extract_strided_slice %473 {offsets = [0, 96], sizes = [8, 32], strides = [1, 1]} : vector<8x128xf32> to vector<8x32xf32>
    %478 = vector.extract_strided_slice %474 {offsets = [0, 64], sizes = [8, 32], strides = [1, 1]} : vector<8x128xf32> to vector<8x32xf32>
    %479 = arith.mulf %476, %462 : vector<8x32xf32>
    %480 = arith.mulf %475, %478 : vector<8x32xf32>
    %481 = arith.addf %479, %480 : vector<8x32xf32>
    %482 = math.tanh %481 : vector<8x32xf32>
    %483 = arith.mulf %477, %482 : vector<8x32xf32>
    %c16_135 = arith.constant 16 : index
    %c0_136 = arith.constant 0 : index
    %484 = vector.load %arg13[%c16_135, %c0_136] : memref<24x256xf32, #tpu.memory_space<vmem>>, vector<8x32xf32>
    tpu.vector_store %arg13[%c16_135, %c0_136], %483 {strides = array<i32>} : memref<24x256xf32, #tpu.memory_space<vmem>>, vector<8x32xf32>,
    %c136 = arith.constant 136 : index
    %c0_137 = arith.constant 0 : index
    %485 = vector.load %arg12[%c136, %c0_137] : memref<192x128xf32, #tpu.memory_space<vmem>>, vector<8x128xf32>
    %cst_138 = arith.constant dense<0.000000e+00> : vector<8x128xf32>
    %486 = tpu.matmul %483, %15, %cst_138 {dimension_numbers = #tpu.dot_dimension_numbers<[1], [0], [0], [1], [0, 0, 1, 1], [], []>} : vector<8x32xf32>, vector<32x128xf32>, vector<8x128xf32> -> vector<8x128xf32>
    %487 = arith.addf %485, %486 : vector<8x128xf32>
    %488 = arith.negf %487 : vector<8x128xf32>
    %489 = math.exp %488 : vector<8x128xf32>
    %cst_139 = arith.constant 1.000000e+00 : f32
    %490 = vector.broadcast %cst_139 : f32 to vector<8x128xf32>
    %491 = arith.addf %490, %489 : vector<8x128xf32>
    %492 = arith.divf %490, %491 : vector<8x128xf32>
    %493 = math.tanh %487 : vector<8x128xf32>
    %494 = vector.extract_strided_slice %492 {offsets = [0, 0], sizes = [8, 32], strides = [1, 1]} : vector<8x128xf32> to vector<8x32xf32>
    %495 = vector.extract_strided_slice %492 {offsets = [0, 32], sizes = [8, 32], strides = [1, 1]} : vector<8x128xf32> to vector<8x32xf32>
    %496 = vector.extract_strided_slice %492 {offsets = [0, 96], sizes = [8, 32], strides = [1, 1]} : vector<8x128xf32> to vector<8x32xf32>
    %497 = vector.extract_strided_slice %493 {offsets = [0, 64], sizes = [8, 32], strides = [1, 1]} : vector<8x128xf32> to vector<8x32xf32>
    %498 = arith.mulf %495, %481 : vector<8x32xf32>
    %499 = arith.mulf %494, %497 : vector<8x32xf32>
    %500 = arith.addf %498, %499 : vector<8x32xf32>
    %501 = math.tanh %500 : vector<8x32xf32>
    %502 = arith.mulf %496, %501 : vector<8x32xf32>
    %c16_140 = arith.constant 16 : index
    %c32_141 = arith.constant 32 : index
    %503 = vector.load %arg13[%c16_140, %c32_141] : memref<24x256xf32, #tpu.memory_space<vmem>>, vector<8x32xf32>
    tpu.vector_store %arg13[%c16_140, %c32_141], %502 {strides = array<i32>} : memref<24x256xf32, #tpu.memory_space<vmem>>, vector<8x32xf32>,
    %c144 = arith.constant 144 : index
    %c0_142 = arith.constant 0 : index
    %504 = vector.load %arg12[%c144, %c0_142] : memref<192x128xf32, #tpu.memory_space<vmem>>, vector<8x128xf32>
    %cst_143 = arith.constant dense<0.000000e+00> : vector<8x128xf32>
    %505 = tpu.matmul %502, %15, %cst_143 {dimension_numbers = #tpu.dot_dimension_numbers<[1], [0], [0], [1], [0, 0, 1, 1], [], []>} : vector<8x32xf32>, vector<32x128xf32>, vector<8x128xf32> -> vector<8x128xf32>
    %506 = arith.addf %504, %505 : vector<8x128xf32>
    %507 = arith.negf %506 : vector<8x128xf32>
    %508 = math.exp %507 : vector<8x128xf32>
    %cst_144 = arith.constant 1.000000e+00 : f32
    %509 = vector.broadcast %cst_144 : f32 to vector<8x128xf32>
    %510 = arith.addf %509, %508 : vector<8x128xf32>
    %511 = arith.divf %509, %510 : vector<8x128xf32>
    %512 = math.tanh %506 : vector<8x128xf32>
    %513 = vector.extract_strided_slice %511 {offsets = [0, 0], sizes = [8, 32], strides = [1, 1]} : vector<8x128xf32> to vector<8x32xf32>
    %514 = vector.extract_strided_slice %511 {offsets = [0, 32], sizes = [8, 32], strides = [1, 1]} : vector<8x128xf32> to vector<8x32xf32>
    %515 = vector.extract_strided_slice %511 {offsets = [0, 96], sizes = [8, 32], strides = [1, 1]} : vector<8x128xf32> to vector<8x32xf32>
    %516 = vector.extract_strided_slice %512 {offsets = [0, 64], sizes = [8, 32], strides = [1, 1]} : vector<8x128xf32> to vector<8x32xf32>
    %517 = arith.mulf %514, %500 : vector<8x32xf32>
    %518 = arith.mulf %513, %516 : vector<8x32xf32>
    %519 = arith.addf %517, %518 : vector<8x32xf32>
    %520 = math.tanh %519 : vector<8x32xf32>
    %521 = arith.mulf %515, %520 : vector<8x32xf32>
    %c16_145 = arith.constant 16 : index
    %c64_146 = arith.constant 64 : index
    %522 = vector.load %arg13[%c16_145, %c64_146] : memref<24x256xf32, #tpu.memory_space<vmem>>, vector<8x32xf32>
    tpu.vector_store %arg13[%c16_145, %c64_146], %521 {strides = array<i32>} : memref<24x256xf32, #tpu.memory_space<vmem>>, vector<8x32xf32>,
    %c152 = arith.constant 152 : index
    %c0_147 = arith.constant 0 : index
    %523 = vector.load %arg12[%c152, %c0_147] : memref<192x128xf32, #tpu.memory_space<vmem>>, vector<8x128xf32>
    %cst_148 = arith.constant dense<0.000000e+00> : vector<8x128xf32>
    %524 = tpu.matmul %521, %15, %cst_148 {dimension_numbers = #tpu.dot_dimension_numbers<[1], [0], [0], [1], [0, 0, 1, 1], [], []>} : vector<8x32xf32>, vector<32x128xf32>, vector<8x128xf32> -> vector<8x128xf32>
    %525 = arith.addf %523, %524 : vector<8x128xf32>
    %526 = arith.negf %525 : vector<8x128xf32>
    %527 = math.exp %526 : vector<8x128xf32>
    %cst_149 = arith.constant 1.000000e+00 : f32
    %528 = vector.broadcast %cst_149 : f32 to vector<8x128xf32>
    %529 = arith.addf %528, %527 : vector<8x128xf32>
    %530 = arith.divf %528, %529 : vector<8x128xf32>
    %531 = math.tanh %525 : vector<8x128xf32>
    %532 = vector.extract_strided_slice %530 {offsets = [0, 0], sizes = [8, 32], strides = [1, 1]} : vector<8x128xf32> to vector<8x32xf32>
    %533 = vector.extract_strided_slice %530 {offsets = [0, 32], sizes = [8, 32], strides = [1, 1]} : vector<8x128xf32> to vector<8x32xf32>
    %534 = vector.extract_strided_slice %530 {offsets = [0, 96], sizes = [8, 32], strides = [1, 1]} : vector<8x128xf32> to vector<8x32xf32>
    %535 = vector.extract_strided_slice %531 {offsets = [0, 64], sizes = [8, 32], strides = [1, 1]} : vector<8x128xf32> to vector<8x32xf32>
    %536 = arith.mulf %533, %519 : vector<8x32xf32>
    %537 = arith.mulf %532, %535 : vector<8x32xf32>
    %538 = arith.addf %536, %537 : vector<8x32xf32>
    %539 = math.tanh %538 : vector<8x32xf32>
    %540 = arith.mulf %534, %539 : vector<8x32xf32>
    %c16_150 = arith.constant 16 : index
    %c96_151 = arith.constant 96 : index
    %541 = vector.load %arg13[%c16_150, %c96_151] : memref<24x256xf32, #tpu.memory_space<vmem>>, vector<8x32xf32>
    tpu.vector_store %arg13[%c16_150, %c96_151], %540 {strides = array<i32>} : memref<24x256xf32, #tpu.memory_space<vmem>>, vector<8x32xf32>,
    %c160_152 = arith.constant 160 : index
    %c0_153 = arith.constant 0 : index
    %542 = vector.load %arg12[%c160_152, %c0_153] : memref<192x128xf32, #tpu.memory_space<vmem>>, vector<8x128xf32>
    %cst_154 = arith.constant dense<0.000000e+00> : vector<8x128xf32>
    %543 = tpu.matmul %540, %15, %cst_154 {dimension_numbers = #tpu.dot_dimension_numbers<[1], [0], [0], [1], [0, 0, 1, 1], [], []>} : vector<8x32xf32>, vector<32x128xf32>, vector<8x128xf32> -> vector<8x128xf32>
    %544 = arith.addf %542, %543 : vector<8x128xf32>
    %545 = arith.negf %544 : vector<8x128xf32>
    %546 = math.exp %545 : vector<8x128xf32>
    %cst_155 = arith.constant 1.000000e+00 : f32
    %547 = vector.broadcast %cst_155 : f32 to vector<8x128xf32>
    %548 = arith.addf %547, %546 : vector<8x128xf32>
    %549 = arith.divf %547, %548 : vector<8x128xf32>
    %550 = math.tanh %544 : vector<8x128xf32>
    %551 = vector.extract_strided_slice %549 {offsets = [0, 0], sizes = [8, 32], strides = [1, 1]} : vector<8x128xf32> to vector<8x32xf32>
    %552 = vector.extract_strided_slice %549 {offsets = [0, 32], sizes = [8, 32], strides = [1, 1]} : vector<8x128xf32> to vector<8x32xf32>
    %553 = vector.extract_strided_slice %549 {offsets = [0, 96], sizes = [8, 32], strides = [1, 1]} : vector<8x128xf32> to vector<8x32xf32>
    %554 = vector.extract_strided_slice %550 {offsets = [0, 64], sizes = [8, 32], strides = [1, 1]} : vector<8x128xf32> to vector<8x32xf32>
    %555 = arith.mulf %552, %538 : vector<8x32xf32>
    %556 = arith.mulf %551, %554 : vector<8x32xf32>
    %557 = arith.addf %555, %556 : vector<8x32xf32>
    %558 = math.tanh %557 : vector<8x32xf32>
    %559 = arith.mulf %553, %558 : vector<8x32xf32>
    %c16_156 = arith.constant 16 : index
    %c128_157 = arith.constant 128 : index
    %560 = vector.load %arg13[%c16_156, %c128_157] : memref<24x256xf32, #tpu.memory_space<vmem>>, vector<8x32xf32>
    tpu.vector_store %arg13[%c16_156, %c128_157], %559 {strides = array<i32>} : memref<24x256xf32, #tpu.memory_space<vmem>>, vector<8x32xf32>,
    %c168 = arith.constant 168 : index
    %c0_158 = arith.constant 0 : index
    %561 = vector.load %arg12[%c168, %c0_158] : memref<192x128xf32, #tpu.memory_space<vmem>>, vector<8x128xf32>
    %cst_159 = arith.constant dense<0.000000e+00> : vector<8x128xf32>
    %562 = tpu.matmul %559, %15, %cst_159 {dimension_numbers = #tpu.dot_dimension_numbers<[1], [0], [0], [1], [0, 0, 1, 1], [], []>} : vector<8x32xf32>, vector<32x128xf32>, vector<8x128xf32> -> vector<8x128xf32>
    %563 = arith.addf %561, %562 : vector<8x128xf32>
    %564 = arith.negf %563 : vector<8x128xf32>
    %565 = math.exp %564 : vector<8x128xf32>
    %cst_160 = arith.constant 1.000000e+00 : f32
    %566 = vector.broadcast %cst_160 : f32 to vector<8x128xf32>
    %567 = arith.addf %566, %565 : vector<8x128xf32>
    %568 = arith.divf %566, %567 : vector<8x128xf32>
    %569 = math.tanh %563 : vector<8x128xf32>
    %570 = vector.extract_strided_slice %568 {offsets = [0, 0], sizes = [8, 32], strides = [1, 1]} : vector<8x128xf32> to vector<8x32xf32>
    %571 = vector.extract_strided_slice %568 {offsets = [0, 32], sizes = [8, 32], strides = [1, 1]} : vector<8x128xf32> to vector<8x32xf32>
    %572 = vector.extract_strided_slice %568 {offsets = [0, 96], sizes = [8, 32], strides = [1, 1]} : vector<8x128xf32> to vector<8x32xf32>
    %573 = vector.extract_strided_slice %569 {offsets = [0, 64], sizes = [8, 32], strides = [1, 1]} : vector<8x128xf32> to vector<8x32xf32>
    %574 = arith.mulf %571, %557 : vector<8x32xf32>
    %575 = arith.mulf %570, %573 : vector<8x32xf32>
    %576 = arith.addf %574, %575 : vector<8x32xf32>
    %577 = math.tanh %576 : vector<8x32xf32>
    %578 = arith.mulf %572, %577 : vector<8x32xf32>
    %c16_161 = arith.constant 16 : index
    %c160_162 = arith.constant 160 : index
    %579 = vector.load %arg13[%c16_161, %c160_162] : memref<24x256xf32, #tpu.memory_space<vmem>>, vector<8x32xf32>
    tpu.vector_store %arg13[%c16_161, %c160_162], %578 {strides = array<i32>} : memref<24x256xf32, #tpu.memory_space<vmem>>, vector<8x32xf32>,
    %c176 = arith.constant 176 : index
    %c0_163 = arith.constant 0 : index
    %580 = vector.load %arg12[%c176, %c0_163] : memref<192x128xf32, #tpu.memory_space<vmem>>, vector<8x128xf32>
    %cst_164 = arith.constant dense<0.000000e+00> : vector<8x128xf32>
    %581 = tpu.matmul %578, %15, %cst_164 {dimension_numbers = #tpu.dot_dimension_numbers<[1], [0], [0], [1], [0, 0, 1, 1], [], []>} : vector<8x32xf32>, vector<32x128xf32>, vector<8x128xf32> -> vector<8x128xf32>
    %582 = arith.addf %580, %581 : vector<8x128xf32>
    %583 = arith.negf %582 : vector<8x128xf32>
    %584 = math.exp %583 : vector<8x128xf32>
    %cst_165 = arith.constant 1.000000e+00 : f32
    %585 = vector.broadcast %cst_165 : f32 to vector<8x128xf32>
    %586 = arith.addf %585, %584 : vector<8x128xf32>
    %587 = arith.divf %585, %586 : vector<8x128xf32>
    %588 = math.tanh %582 : vector<8x128xf32>
    %589 = vector.extract_strided_slice %587 {offsets = [0, 0], sizes = [8, 32], strides = [1, 1]} : vector<8x128xf32> to vector<8x32xf32>
    %590 = vector.extract_strided_slice %587 {offsets = [0, 32], sizes = [8, 32], strides = [1, 1]} : vector<8x128xf32> to vector<8x32xf32>
    %591 = vector.extract_strided_slice %587 {offsets = [0, 96], sizes = [8, 32], strides = [1, 1]} : vector<8x128xf32> to vector<8x32xf32>
    %592 = vector.extract_strided_slice %588 {offsets = [0, 64], sizes = [8, 32], strides = [1, 1]} : vector<8x128xf32> to vector<8x32xf32>
    %593 = arith.mulf %590, %576 : vector<8x32xf32>
    %594 = arith.mulf %589, %592 : vector<8x32xf32>
    %595 = arith.addf %593, %594 : vector<8x32xf32>
    %596 = math.tanh %595 : vector<8x32xf32>
    %597 = arith.mulf %591, %596 : vector<8x32xf32>
    %c16_166 = arith.constant 16 : index
    %c192_167 = arith.constant 192 : index
    %598 = vector.load %arg13[%c16_166, %c192_167] : memref<24x256xf32, #tpu.memory_space<vmem>>, vector<8x32xf32>
    tpu.vector_store %arg13[%c16_166, %c192_167], %597 {strides = array<i32>} : memref<24x256xf32, #tpu.memory_space<vmem>>, vector<8x32xf32>,
    %c184 = arith.constant 184 : index
    %c0_168 = arith.constant 0 : index
    %599 = vector.load %arg12[%c184, %c0_168] : memref<192x128xf32, #tpu.memory_space<vmem>>, vector<8x128xf32>
    %cst_169 = arith.constant dense<0.000000e+00> : vector<8x128xf32>
    %600 = tpu.matmul %597, %15, %cst_169 {dimension_numbers = #tpu.dot_dimension_numbers<[1], [0], [0], [1], [0, 0, 1, 1], [], []>} : vector<8x32xf32>, vector<32x128xf32>, vector<8x128xf32> -> vector<8x128xf32>
    %601 = arith.addf %599, %600 : vector<8x128xf32>
    %602 = arith.negf %601 : vector<8x128xf32>
    %603 = math.exp %602 : vector<8x128xf32>
    %cst_170 = arith.constant 1.000000e+00 : f32
    %604 = vector.broadcast %cst_170 : f32 to vector<8x128xf32>
    %605 = arith.addf %604, %603 : vector<8x128xf32>
    %606 = arith.divf %604, %605 : vector<8x128xf32>
    %607 = math.tanh %601 : vector<8x128xf32>
    %608 = vector.extract_strided_slice %606 {offsets = [0, 0], sizes = [8, 32], strides = [1, 1]} : vector<8x128xf32> to vector<8x32xf32>
    %609 = vector.extract_strided_slice %606 {offsets = [0, 32], sizes = [8, 32], strides = [1, 1]} : vector<8x128xf32> to vector<8x32xf32>
    %610 = vector.extract_strided_slice %606 {offsets = [0, 96], sizes = [8, 32], strides = [1, 1]} : vector<8x128xf32> to vector<8x32xf32>
    %611 = vector.extract_strided_slice %607 {offsets = [0, 64], sizes = [8, 32], strides = [1, 1]} : vector<8x128xf32> to vector<8x32xf32>
    %612 = arith.mulf %609, %595 : vector<8x32xf32>
    %613 = arith.mulf %608, %611 : vector<8x32xf32>
    %614 = arith.addf %612, %613 : vector<8x32xf32>
    %615 = math.tanh %614 : vector<8x32xf32>
    %616 = arith.mulf %610, %615 : vector<8x32xf32>
    %c16_171 = arith.constant 16 : index
    %c224_172 = arith.constant 224 : index
    %617 = vector.load %arg13[%c16_171, %c224_172] : memref<24x256xf32, #tpu.memory_space<vmem>>, vector<8x32xf32>
    tpu.vector_store %arg13[%c16_171, %c224_172], %616 {strides = array<i32>} : memref<24x256xf32, #tpu.memory_space<vmem>>, vector<8x32xf32>,
    %c0_173 = arith.constant 0 : index
    %c0_174 = arith.constant 0 : index
    %618 = vector.load %arg13[%c0_173, %c0_174] : memref<24x256xf32, #tpu.memory_space<vmem>>, vector<24x256xf32>
    %c0_175 = arith.constant 0 : index
    %c0_176 = arith.constant 0 : index
    %619 = vector.load %arg8[%c0_175, %c0_176] : memref<256x8xf32, #tpu.memory_space<vmem>>, vector<256x8xf32>
    %cst_177 = arith.constant dense<0.000000e+00> : vector<24x8xf32>
    %620 = tpu.matmul %618, %619, %cst_177 {dimension_numbers = #tpu.dot_dimension_numbers<[1], [0], [0], [1], [0, 0, 1, 1], [], []>} : vector<24x256xf32>, vector<256x8xf32>, vector<24x8xf32> -> vector<24x8xf32>
    %c0_178 = arith.constant 0 : index
    %c0_179 = arith.constant 0 : index
    %621 = vector.load %arg9[%c0_178, %c0_179] : memref<1x8xf32, #tpu.memory_space<vmem>>, vector<1x8xf32>
    %622 = vector.broadcast %621 : vector<1x8xf32> to vector<24x8xf32>
    %623 = arith.addf %620, %622 : vector<24x8xf32>
    %c0_180 = arith.constant 0 : index
    %c0_181 = arith.constant 0 : index
    %624 = vector.load %arg10[%c0_180, %c0_181] : memref<24x8xf32, #tpu.memory_space<vmem>>, vector<24x8xf32>
    tpu.vector_store %arg10[%c0_180, %c0_181], %623 {strides = array<i32>} : memref<24x8xf32, #tpu.memory_space<vmem>>, vector<24x8xf32>,
    return
  }
}

</mosaic_0001>

<bundles_post_ra>
// kernel: encoder_decoder_forward.1
= control target key start
LH: loop header
LB: loop body
LE: loop exit
PB: predicated region body
PF: predicated region fallthrough
CT: control target
= control target key end

     0   :  { %vm52_vm0 = vcmask 130048   ;;  %v4953_v3 = vmov 0.0   ;;  %vm4954_vm1 = vmmov 0   ;;  %vm513_vm2 = vcmask 261120   ;;  %s6044_s2 = inlined_call_operand.vmem [shape: f32[16,128], index: 2, kind: input, shape index: {}]   ;;  %s6045_s0 = inlined_call_operand.vmem [shape: f32[64,16], index: 0, kind: input, shape index: {}]   ;;  %s6046_s5 = inlined_call_operand.vmem [shape: f32[16,128], index: 5, kind: input, shape index: {}]   ;;  %s6047_s3 = inlined_call_operand.vmem [shape: f32[32,128], index: 3, kind: input, shape index: {}]   ;;  %s6048_s1 = inlined_call_operand.vmem [shape: f32[192,16], index: 1, kind: input, shape index: {}]   ;;  %s6049_s4 = inlined_call_operand.vmem [shape: f32[1,128], index: 4, kind: input, shape index: {}]   ;;  %s6050_s7 = inlined_call_operand.vmem [shape: f32[1,128], index: 7, kind: input, shape index: {}]   ;;  %s6051_s6 = inlined_call_operand.vmem [shape: f32[32,128], index: 6, kind: input, shape index: {}]   ;;  %s6052_s8 = inlined_call_operand.vmem [shape: f32[256,8], index: 8, kind: input, shape index: {}]   ;;  %s6053_s9 = inlined_call_operand.vmem [shape: f32[1,8], index: 9, kind: input, shape index: {}]   ;;  %s6054_s10 = inlined_call_operand.vmem [shape: f32[24,8], index: 10, kind: output, shape index: {}]  }
   0x1   :  { %v44_v0 = vld [vmem:[%s6044_s2 + $0x8] sm:$0xff]  ;;  %v43_v1 = vld [vmem:[%s6044_s2] sm:$0xff]  ;;  %4347 = vmatprep.subr.mxu0 %v4953_v3  ;;  %4355 = vmatprep.mubr.msk.f32.mxu0 %vm4954_vm1, %v4953_v3  ;;  %v37_v6 = vld [vmem:[%s6045_s0 + $0x10] sm:$0xff]  ;;  %vm1527_vm3 = vcmask 523520   ;;  %vm1633_vm4 = vcmask 785920   ;;  %vm1735_vm5 = vcmask 1048320  }
   0x2   :  { %v35_v2 = vld [vmem:[%s6045_s0] sm:$0xff]  ;;  %4280 = vmatprep.subr.mxu1 %v44_v0  ;;  %v36_v4 = vld [vmem:[%s6045_s0 + $0x8] sm:$0xff]  ;;  %v38_v8 = vld [vmem:[%s6045_s0 + $0x18] sm:$0xff]  ;;  %vm3937_vm6 = vcmask 64512  }
   0x3   :  { %4284 = vmatprep.mubr.msk.f32.mxu1 %vm52_vm0, %v35_v2  ;;  %4281 = vmatpush3.msra.mxu1 %v44_v0  ;;  %v215_v5 = vld [vmem:[%s6046_s5 + $0x8] sm:$0xff]  ;;  %v214_v7 = vld [vmem:[%s6046_s5] sm:$0xff]  ;;  %v5046_v9 = vld [vmem:[%s6047_s3 + $0x18] sm:$0xff] }
   0x4   :  { %4282 = vmatprep.subr.mxu1 %v43_v1  ;;  %v39_v10 = vld [vmem:[%s6045_s0 + $0x20] sm:$0xff]  ;;  %4348 = vmatpush3.msra.mxu0 %v5046_v9  ;;  %v5058_v11 = vld [vmem:[%s6047_s3 + $0x10] sm:$0xff]  ;;  %v40_v12 = vld [vmem:[%s6045_s0 + $0x28] sm:$0xff] }
   0x5   :  { %4283 = vmatpush3.msra.mxu1 %v43_v1  ;;  %4349 = vmatprep.subr.mxu0 %v4953_v3  ;;  %v41_v13 = vld [vmem:[%s6045_s0 + $0x30] sm:$0xff]  ;;  %v5071_v14 = vld [vmem:[%s6047_s3 + $0x8] sm:$0xff]  ;;  %v5079_v15 = vld [vmem:[%s6047_s3] sm:$0xff]  ;;  %s4956_s3 = smov 32  }
   0x6   :  { %4285 = vmatmul.mubr.msk.f32.vlgmr.msra.gmra.mxu1 %vm52_vm0, %v36_v4  ;;  %4296 = vmatprep.subr.mxu1 %v215_v5  ;;  %v42_v16 = vld [vmem:[%s6045_s0 + $0x38] sm:$0xff]  ;;  %v190_v17 = vld [vmem:[%s6048_s1] sm:$0xff]  ;;  %v191_v18 = vld [vmem:[%s6048_s1 + $0x8] sm:$0xff] }
   0x7   :  { %4297 = vmatpush3.msra.mxu1 %v215_v5  ;;  %4287 = vmatprep.mubr.msk.f32.mxu1 %vm52_vm0, %v37_v6  ;;  %v192_v19 = vld [vmem:[%s6048_s1 + $0x10] sm:$0xff]  ;;  %v193_v20 = vld [vmem:[%s6048_s1 + $0x18] sm:$0xff]  ;;  %v194_v21 = vld [vmem:[%s6048_s1 + $0x20] sm:$0xff] }
   0x8   :  { %4298 = vmatprep.subr.mxu1 %v214_v7  ;;  %4350 = vmatpush3.msra.mxu0 %v5058_v11  ;;  %v195_v22 = vld [vmem:[%s6048_s1 + $0x28] sm:$0xff]  ;;  %v196_v23 = vld [vmem:[%s6048_s1 + $0x30] sm:$0xff]  ;;  %v197_v24 = vld [vmem:[%s6048_s1 + $0x38] sm:$0xff] }
   0x9   :  { %4299 = vmatpush3.msra.mxu1 %v214_v7  ;;  %4351 = vmatprep.subr.mxu0 %v4953_v3  ;;  %v198_v25 = vld [vmem:[%s6048_s1 + $0x40] sm:$0xff]  ;;  %v199_v26 = vld [vmem:[%s6048_s1 + $0x48] sm:$0xff]  ;;  %v200_v27 = vld [vmem:[%s6048_s1 + $0x50] sm:$0xff] }
   0xa   :  { %4288 = vmatmul.mubr.msk.f32.gmra.mxu1 %vm52_vm0, %v38_v8  ;;  %4336 = vmatprep.subr.mxu1 %v4953_v3  ;;  %v201_v28 = vld [vmem:[%s6048_s1 + $0x58] sm:$0xff]  ;;  %v202_v29 = vld [vmem:[%s6048_s1 + $0x60] sm:$0xff]  ;;  %v203_v30 = vld [vmem:[%s6048_s1 + $0x68] sm:$0xff] }
   0xb   :  { %4290 = vmatprep.mubr.msk.f32.mxu1 %vm52_vm0, %v39_v10  ;;  %4352 = vmatpush3.msra.mxu0 %v5071_v14  ;;  %v204_v31 = vld [vmem:[%s6048_s1 + $0x70] sm:$0xff]  ;;  %v205_v32 = vld [vmem:[%s6048_s1 + $0x78] sm:$0xff]  ;;  %v206_v33 = vld [vmem:[%s6048_s1 + $0x80] sm:$0xff] }
   0xc   :  { %4353 = vmatprep.subr.mxu0 %v4953_v3  ;;  %v207_v34 = vld [vmem:[%s6048_s1 + $0x88] sm:$0xff]  ;;  %v208_v35 = vld [vmem:[%s6048_s1 + $0x90] sm:$0xff]  ;;  %v209_v36 = vld [vmem:[%s6048_s1 + $0x98] sm:$0xff] }
   0xd   :  { %4354 = vmatpush3.msra.mxu0 %v5079_v15  ;;  %v210_v37 = vld [vmem:[%s6048_s1 + $0xa0] sm:$0xff]  ;;  %v211_v38 = vld [vmem:[%s6048_s1 + $0xa8] sm:$0xff]  ;;  %v212_v39 = vld [vmem:[%s6048_s1 + $0xb0] sm:$0xff] }
   0xe   :  { %4291 = vmatmul.mubr.msk.f32.gmra.mxu1 %vm52_vm0, %v40_v12  ;;  %4358 = vmatprep.subr.mxu0 %v4953_v3  ;;  %v213_v40 = vld [vmem:[%s6048_s1 + $0xb8] sm:$0xff]  ;;  %v5209_v41 = vld [vmem:[%s6049_s4] ss:$0 sm:$0xff] }
   0xf   :  { %4293 = vmatprep.mubr.msk.f32.mxu1 %vm52_vm0, %v41_v13  ;;  %v5232_v56 = vld [vmem:[%s6050_s7] ss:$0 sm:$0xff]  ;;  %s4955_s7 = smov 64  }
  0x12   :  { %4294 = vmatmul.mubr.msk.f32.gmra.mxu1 %vm52_vm0, %v42_v16 }
  0x13   :  { %4300 = vmatprep.mubr.msk.f32.mxu1 %vm52_vm0, %v190_v17 }
  0x16   :  { %4301 = vmatmul.mubr.msk.f32.vlgmr.msra.gmra.mxu1 %vm52_vm0, %v191_v18 }
  0x17   :  { %4337 = vmatpush3.msra.mxu1 %v5046_v9  ;;  %4303 = vmatprep.mubr.msk.f32.mxu1 %vm52_vm0, %v192_v19 }
  0x18   :  { %4338 = vmatprep.subr.mxu1 %v4953_v3 }
  0x19   :  { %4339 = vmatpush3.msra.mxu1 %v5058_v11 }
  0x1a   :  { %4304 = vmatmul.mubr.msk.f32.gmra.mxu1 %vm52_vm0, %v193_v20  ;;  %4340 = vmatprep.subr.mxu1 %v4953_v3 }
  0x1b   :  { %4306 = vmatprep.mubr.msk.f32.mxu1 %vm52_vm0, %v194_v21  ;;  %4341 = vmatpush3.msra.mxu1 %v5071_v14 }
  0x1c   :  { %4342 = vmatprep.subr.mxu1 %v4953_v3 }
  0x1d   :  { %4343 = vmatpush3.msra.mxu1 %v5079_v15 }
  0x1e   :  { %4307 = vmatmul.mubr.msk.f32.gmra.mxu1 %vm52_vm0, %v195_v22  ;;  %4391 = vmatprep.subr.mxu1 %v4953_v3 }
  0x1f   :  { %4309 = vmatprep.mubr.msk.f32.mxu1 %vm52_vm0, %v196_v23 }
  0x22   :  { %4310 = vmatmul.mubr.msk.f32.gmra.mxu1 %vm52_vm0, %v197_v24 }
  0x23   :  { %4312 = vmatprep.mubr.msk.f32.mxu1 %vm52_vm0, %v198_v25 }
  0x26   :  { %4313 = vmatmul.mubr.msk.f32.gmra.mxu1 %vm52_vm0, %v199_v26 }
  0x27   :  { %4315 = vmatprep.mubr.msk.f32.mxu1 %vm52_vm0, %v200_v27 }
  0x2a   :  { %4316 = vmatmul.mubr.msk.f32.gmra.mxu1 %vm52_vm0, %v201_v28 }
  0x2b   :  { %4318 = vmatprep.mubr.msk.f32.mxu1 %vm52_vm0, %v202_v29 }
  0x2e   :  { %4319 = vmatmul.mubr.msk.f32.gmra.mxu1 %vm52_vm0, %v203_v30 }
  0x2f   :  { %4321 = vmatprep.mubr.msk.f32.mxu1 %vm52_vm0, %v204_v31 }
  0x32   :  { %4322 = vmatmul.mubr.msk.f32.gmra.mxu1 %vm52_vm0, %v205_v32 }
  0x33   :  { %4324 = vmatprep.mubr.msk.f32.mxu1 %vm52_vm0, %v206_v33 }
  0x36   :  { %4325 = vmatmul.mubr.msk.f32.gmra.mxu1 %vm52_vm0, %v207_v34 }
  0x37   :  { %4327 = vmatprep.mubr.msk.f32.mxu1 %vm52_vm0, %v208_v35 }
  0x3a   :  { %4328 = vmatmul.mubr.msk.f32.gmra.mxu1 %vm52_vm0, %v209_v36 }
  0x3b   :  { %4330 = vmatprep.mubr.msk.f32.mxu1 %vm52_vm0, %v210_v37 }
  0x3e   :  { %4331 = vmatmul.mubr.msk.f32.gmra.mxu1 %vm52_vm0, %v211_v38 }
  0x3f   :  { %4333 = vmatprep.mubr.msk.f32.mxu1 %vm52_vm0, %v212_v39 }
  0x42   :  { %4334 = vmatmul.mubr.msk.f32.gmra.mxu1 %vm52_vm0, %v213_v40 }
  0x43   :  { %4344 = vmatprep.mubr.msk.f32.mxu1 %vm4954_vm1, %v4953_v3 }
  0x46   :  { %4345 = vmatmul.mubr.f32.vlgmr.msra.gmra.mxu1 %v4953_v3 }
  0x47   :  { %4392 = vmatpush3.msra.mxu1 %v5046_v9  ;;  %4399 = vmatprep.mubr.msk.f32.mxu1 %vm4954_vm1, %v4953_v3 }
  0x48   :  { %4393 = vmatprep.subr.mxu1 %v4953_v3 }
  0x49   :  { %4394 = vmatpush3.msra.mxu1 %v5058_v11 }
  0x4a   :  { %4395 = vmatprep.subr.mxu1 %v4953_v3 }
  0x4b   :  { %4396 = vmatpush3.msra.mxu1 %v5071_v14 }
  0x4c   :  { %4397 = vmatprep.subr.mxu1 %v4953_v3 }
  0x4d   :  { %4398 = vmatpush3.msra.mxu1 %v5079_v15 }
  0x4e   :  { %4413 = vmatprep.subr.mxu1 %v4953_v3 }
  0xc6   :  { %v4286_v42 = vpop.f32.mrf.mxu1 }
  0xc7   :  { %v5212_v43 = vadd.f32 %v4286_v42, %v5209_v41 }
  0xc8   :  { %v143_v44 = vpop.f32.mrf.mxu1 }
  0xca   :  { %v4289_v45 = vpop.f32.mrf.mxu1 }
  0xcb   :  { %v5215_v46 = vadd.f32 %v4289_v45, %v5209_v41 }
  0xcc   :  { %v153_v47 = vpop.f32.mrf.mxu1 }
  0xcd   :  { %v5218_v48 = vadd.f32 %v5209_v41, %v153_v47 }
  0xce   :  { %v4292_v49 = vpop.f32.mrf.mxu1 }
  0xcf   :  { %v5221_v50 = vadd.f32 %v4292_v49, %v5209_v41 }
  0xd0   :  { %v163_v51 = vpop.f32.mrf.mxu1 }
  0xd1   :  { %v5224_v52 = vadd.f32 %v5209_v41, %v163_v51  ;;  %v144_v51 = vadd.f32 %v5209_v41, %v143_v44 }
  0xd2   :  { %v4295_v53 = vpop.f32.mrf.mxu1 }
  0xd3   :  { %v5227_v54 = vadd.f32 %v4295_v53, %v5209_v41 }
  0xd4   :  { %v173_v55 = vpop.f32.mrf.mxu1 }
  0xd5   :  { %v5235_v57 = vadd.f32 %v5209_v41, %v173_v55 }
  0xd6   :  { %v4302_v58 = vpop.f32.mrf.mxu1 }
  0xd7   :  { %v5238_v59 = vadd.f32 %v4302_v58, %v5232_v56 }
  0xd8   :  { %v5240_v60 = vpop.f32.mrf.mxu1 }
  0xda   :  { %v4305_v61 = vpop.f32.mrf.mxu1 }
  0xdb   :  { %v5243_v62 = vadd.f32 %v4305_v61, %v5232_v56 }
  0xdc   :  { %v371_v63 = vpop.f32.mrf.mxu1 }
  0xdd   :  { %v5246_v0 = vadd.f32 %v5232_v56, %v371_v63 }
  0xde   :  { %v4308_v1 = vpop.f32.mrf.mxu1 }
  0xdf   :  { %v5249_v2 = vadd.f32 %v4308_v1, %v5232_v56 }
  0xe0   :  { %v381_v4 = vpop.f32.mrf.mxu1 }
  0xe1   :  { %v5252_v5 = vadd.f32 %v5232_v56, %v381_v4 }
  0xe2   :  { %v4311_v6 = vpop.f32.mrf.mxu1 }
  0xe3   :  { %v5255_v7 = vadd.f32 %v4311_v6, %v5232_v56 }
  0xe4   :  { %v391_v8 = vpop.f32.mrf.mxu1 }
  0xe5   :  { %v5258_v10 = vadd.f32 %v5232_v56, %v391_v8 }
  0xe6   :  { %v4314_v12 = vpop.f32.mrf.mxu1 }
  0xe7   :  { %v5261_v13 = vadd.f32 %v4314_v12, %v5232_v56 }
  0xe8   :  { %v401_v16 = vpop.f32.mrf.mxu1 }
  0xe9   :  { %v5264_v17 = vadd.f32 %v5232_v56, %v401_v16 }
  0xea   :  { %v4317_v18 = vpop.f32.mrf.mxu1 }
  0xeb   :  { %v5267_v19 = vadd.f32 %v4317_v18, %v5232_v56 }
  0xec   :  { %v411_v20 = vpop.f32.mrf.mxu1 }
  0xed   :  { %v5270_v21 = vadd.f32 %v5232_v56, %v411_v20 }
  0xee   :  { %v4320_v22 = vpop.f32.mrf.mxu1 }
  0xef   :  { %v5273_v23 = vadd.f32 %v4320_v22, %v5232_v56 }
  0xf0   :  { %v421_v24 = vpop.f32.mrf.mxu1 }
  0xf1   :  { %v5276_v25 = vadd.f32 %v5232_v56, %v421_v24 }
  0xf2   :  { %v4323_v26 = vpop.f32.mrf.mxu1 }
  0xf3   :  { %v5279_v27 = vadd.f32 %v4323_v26, %v5232_v56 }
  0xf4   :  { %v431_v28 = vpop.f32.mrf.mxu1 }
  0xf5   :  { %v5282_v29 = vadd.f32 %v5232_v56, %v431_v28 }
  0xf6   :  { %v4326_v30 = vpop.f32.mrf.mxu1 }
  0xf7   :  { %v5285_v31 = vadd.f32 %v4326_v30, %v5232_v56 }
  0xf8   :  { %v441_v32 = vpop.f32.mrf.mxu1 }
  0xf9   :  { %v5288_v33 = vadd.f32 %v5232_v56, %v441_v32 }
  0xfa   :  { %v4329_v34 = vpop.f32.mrf.mxu1 }
  0xfb   :  { %v5291_v35 = vadd.f32 %v4329_v34, %v5232_v56 }
  0xfc   :  { %v451_v36 = vpop.f32.mrf.mxu1 }
  0xfd   :  { %v5294_v37 = vadd.f32 %v5232_v56, %v451_v36 }
  0xfe   :  { %v4332_v38 = vpop.f32.mrf.mxu1 }
  0xff   :  { %v5297_v39 = vadd.f32 %v4332_v38, %v5232_v56 }
 0x100   :  { %v461_v40 = vpop.f32.mrf.mxu1 }
 0x101   :  { %v5300_v42 = vadd.f32 %v5232_v56, %v461_v40 }
 0x102   :  { %v4335_v45 = vpop.f32.mrf.mxu1 }
 0x103   :  { %v5303_v47 = vadd.f32 %v4335_v45, %v5232_v56 }
 0x104   :  { %v471_v49 = vpop.f32.mrf.mxu1 }
 0x105   :  { %v5307_v53 = vadd.f32 %v5232_v56, %v471_v49 }
 0x106   :  { %v583_v55 = vpop.f32.mrf.mxu1 }
 0x107   :  { %v587_v58 = vadd.f32 %v583_v55, %v144_v51 }
 0x108   :  { %v4346_v61 = vpop.f32.mrf.mxu1 }
 0x109   :  { %4693 = vtanh.f32 %v587_v58  ;;  %v3979_v1 = vmul.f32 -1.442695, %v587_v58 }
 0x10b   :  { %4695 = vpow2.f32 %v3979_v1 }
 0x116   :  { %v4694_v63 = vpop.eup %4693 }
 0x117   :  { %597 = vrot.lane.b32.xlu0 %v4694_v63, %s4955_s7 }
 0x118   :  { %v4696_v4 = vpop.eup %4695 }
 0x119   :  { %v591_v6 = vadd.f32 1.0, %v4696_v4 }
 0x11b   :  { %4697 = vrcp.f32 %v591_v6 }
 0x128   :  { %v4698_v8 = vpop.eup %4697 }
 0x129   :  { %v595_v41 = vmul.f32 0.0, %v4698_v8 }
 0x189   :  { %v598_v12 = vpop.permute.xlu0 %597 }
 0x18a   :  { %v600_v16 = vmul.f32 %v4698_v8, %v598_v12 }
 0x18c   :  { %602 = vrot.lane.b32.xlu0 %v600_v16, %s4956_s3 }
 0x1fe   :  { %v603_v44 = vpop.permute.xlu0 %602 }
 0x1ff   :  { %v605_v18 = vadd.f32 %v603_v44, %v595_v41 }
 0x201   :  { %4699 = vtanh.f32 %v605_v18 }
 0x20e   :  { %v4700_v20 = vpop.eup %4699 }
 0x20f   :  { %608 = vrot.lane.b32.xlu1 %v4700_v20, %s4955_s7 }
 0x281   :  { %v609_v22 = vpop.permute.xlu1 %608 }
 0x282   :  { %v611_v24 = vmul.f32 %v4698_v8, %v609_v22 }
 0x284   :  { %614 = vrot.lane.b32.xlu1 %v611_v24, %s4956_s3 }
 0x2f6   :  { %v615_v26 = vpop.permute.xlu1 %614 }
 0x2f7   :  { %4356 = vmatmul.mubr.msk.f32.vlgmr.msra.gmra.mxu0 %vm513_vm2, %v615_v26 }
 0x2f8   :  { %4359 = vmatpush3.msra.mxu0 %v5046_v9  ;;  %4366 = vmatprep.mubr.msk.f32.mxu0 %vm4954_vm1, %v4953_v3 }
 0x2f9   :  { %4360 = vmatprep.subr.mxu0 %v4953_v3 }
 0x2fa   :  { %4361 = vmatpush3.msra.mxu0 %v5058_v11 }
 0x2fb   :  { %4362 = vmatprep.subr.mxu0 %v4953_v3 }
 0x2fc   :  { %4363 = vmatpush3.msra.mxu0 %v5071_v14 }
 0x2fd   :  { %4364 = vmatprep.subr.mxu0 %v4953_v3 }
 0x2fe   :  { %4365 = vmatpush3.msra.mxu0 %v5079_v15 }
 0x2ff   :  { %4369 = vmatprep.subr.mxu0 %v4953_v3 }
 0x3b7   :  { %v684_v28 = vpop.f32.mrf.mxu0 }
 0x3b8   :  { %v688_v30 = vadd.f32 %v684_v28, %v5212_v43 }
 0x3b9   :  { %v4357_v32 = vpop.f32.mrf.mxu0 }
 0x3ba   :  { %4701 = vtanh.f32 %v688_v30  ;;  %v3981_v36 = vmul.f32 -1.442695, %v688_v30 }
 0x3bc   :  { %4703 = vpow2.f32 %v3981_v36 }
 0x3c7   :  { %v4702_v34 = vpop.eup %4701 }
 0x3c8   :  { %698 = vrot.lane.b32.xlu0 %v4702_v34, %s4955_s7 }
 0x3c9   :  { %v4704_v38 = vpop.eup %4703 }
 0x3ca   :  { %v692_v40 = vadd.f32 1.0, %v4704_v38 }
 0x3cc   :  { %4705 = vrcp.f32 %v692_v40 }
 0x3d9   :  { %v4706_v45 = vpop.eup %4705 }
 0x3da   :  { %v696_v55 = vmul.f32 %v4706_v45, %v605_v18 }
 0x43a   :  { %v699_v49 = vpop.permute.xlu0 %698 }
 0x43b   :  { %v701_v51 = vmul.f32 %v4706_v45, %v699_v49 }
 0x43d   :  { %703 = vrot.lane.b32.xlu1 %v701_v51, %s4956_s3 }
 0x4af   :  { %v704_v58 = vpop.permute.xlu1 %703 }
 0x4b0   :  { %v706_v61 = vadd.f32 %v704_v58, %v696_v55 }
 0x4b2   :  { %4707 = vtanh.f32 %v706_v61 }
 0x4bf   :  { %v4708_v43 = vpop.eup %4707 }
 0x4c0   :  { %709 = vrot.lane.b32.xlu0 %v4708_v43, %s4955_s7 }
 0x532   :  { %v710_v63 = vpop.permute.xlu0 %709 }
 0x533   :  { %v712_v1 = vmul.f32 %v4706_v45, %v710_v63 }
 0x535   :  { %715 = vrot.lane.b32.xlu1 %v712_v1, %s4956_s3 }
 0x5a7   :  { %v716_v4 = vpop.permute.xlu1 %715 }
 0x5a8   :  { %4367 = vmatmul.mubr.msk.f32.vlgmr.msra.gmra.mxu0 %vm513_vm2, %v716_v4 }
 0x5a9   :  { %4370 = vmatpush3.msra.mxu0 %v5046_v9  ;;  %4377 = vmatprep.mubr.msk.f32.mxu0 %vm4954_vm1, %v4953_v3 }
 0x5aa   :  { %4371 = vmatprep.subr.mxu0 %v4953_v3 }
 0x5ab   :  { %4372 = vmatpush3.msra.mxu0 %v5058_v11 }
 0x5ac   :  { %4373 = vmatprep.subr.mxu0 %v4953_v3 }
 0x5ad   :  { %4374 = vmatpush3.msra.mxu0 %v5071_v14 }
 0x5ae   :  { %4375 = vmatprep.subr.mxu0 %v4953_v3 }
 0x5af   :  { %4376 = vmatpush3.msra.mxu0 %v5079_v15 }
 0x5b0   :  { %4380 = vmatprep.subr.mxu0 %v4953_v3 }
 0x668   :  { %v785_v6 = vpop.f32.mrf.mxu0 }
 0x669   :  { %v789_v8 = vadd.f32 %v785_v6, %v5218_v48 }
 0x66a   :  { %v4368_v12 = vpop.f32.mrf.mxu0 }
 0x66b   :  { %4709 = vtanh.f32 %v789_v8  ;;  %v3983_v41 = vmul.f32 -1.442695, %v789_v8 }
 0x66d   :  { %4711 = vpow2.f32 %v3983_v41 }
 0x678   :  { %v4710_v16 = vpop.eup %4709 }
 0x679   :  { %799 = vrot.lane.b32.xlu0 %v4710_v16, %s4955_s7 }
 0x67a   :  { %v4712_v44 = vpop.eup %4711 }
 0x67b   :  { %v793_v18 = vadd.f32 1.0, %v4712_v44 }
 0x67d   :  { %4713 = vrcp.f32 %v793_v18 }
 0x68a   :  { %v4714_v20 = vpop.eup %4713 }
 0x68b   :  { %v797_v26 = vmul.f32 %v4714_v20, %v706_v61 }
 0x6eb   :  { %v800_v22 = vpop.permute.xlu0 %799 }
 0x6ec   :  { %v802_v24 = vmul.f32 %v4714_v20, %v800_v22 }
 0x6ee   :  { %804 = vrot.lane.b32.xlu1 %v802_v24, %s4956_s3 }
 0x760   :  { %v805_v28 = vpop.permute.xlu1 %804 }
 0x761   :  { %v807_v30 = vadd.f32 %v805_v28, %v797_v26 }
 0x763   :  { %4715 = vtanh.f32 %v807_v30 }
 0x770   :  { %v4716_v48 = vpop.eup %4715 }
 0x771   :  { %810 = vrot.lane.b32.xlu0 %v4716_v48, %s4955_s7 }
 0x7e3   :  { %v811_v32 = vpop.permute.xlu0 %810 }
 0x7e4   :  { %v813_v34 = vmul.f32 %v4714_v20, %v811_v32 }
 0x7e6   :  { %816 = vrot.lane.b32.xlu1 %v813_v34, %s4956_s3 }
 0x858   :  { %v817_v36 = vpop.permute.xlu1 %816 }
 0x859   :  { %4378 = vmatmul.mubr.msk.f32.vlgmr.msra.gmra.mxu0 %vm513_vm2, %v817_v36 }
 0x85a   :  { %4381 = vmatpush3.msra.mxu0 %v5046_v9  ;;  %4388 = vmatprep.mubr.msk.f32.mxu0 %vm4954_vm1, %v4953_v3 }
 0x85b   :  { %4382 = vmatprep.subr.mxu0 %v4953_v3 }
 0x85c   :  { %4383 = vmatpush3.msra.mxu0 %v5058_v11 }
 0x85d   :  { %4384 = vmatprep.subr.mxu0 %v4953_v3 }
 0x85e   :  { %4385 = vmatpush3.msra.mxu0 %v5071_v14 }
 0x85f   :  { %4386 = vmatprep.subr.mxu0 %v4953_v3 }
 0x860   :  { %4387 = vmatpush3.msra.mxu0 %v5079_v15 }
 0x861   :  { %4402 = vmatprep.subr.mxu0 %v4953_v3 }
 0x919   :  { %v886_v38 = vpop.f32.mrf.mxu0 }
 0x91a   :  { %v890_v40 = vadd.f32 %v886_v38, %v5215_v46 }
 0x91b   :  { %v4379_v45 = vpop.f32.mrf.mxu0 }
 0x91c   :  { %4717 = vtanh.f32 %v890_v40  ;;  %v3985_v51 = vmul.f32 -1.442695, %v890_v40 }
 0x91e   :  { %4719 = vpow2.f32 %v3985_v51 }
 0x929   :  { %v4718_v49 = vpop.eup %4717 }
 0x92a   :  { %900 = vrot.lane.b32.xlu0 %v4718_v49, %s4955_s7 }
 0x92b   :  { %v4720_v55 = vpop.eup %4719 }
 0x92c   :  { %v894_v58 = vadd.f32 1.0, %v4720_v55 }
 0x92e   :  { %4721 = vrcp.f32 %v894_v58 }
 0x93b   :  { %v4722_v61 = vpop.eup %4721 }
 0x93c   :  { %v898_v1 = vmul.f32 %v4722_v61, %v807_v30 }
 0x99c   :  { %v901_v43 = vpop.permute.xlu0 %900 }
 0x99d   :  { %v903_v63 = vmul.f32 %v4722_v61, %v901_v43 }
 0x99f   :  { %905 = vrot.lane.b32.xlu1 %v903_v63, %s4956_s3 }
 0xa11   :  { %v906_v4 = vpop.permute.xlu1 %905 }
 0xa12   :  { %v908_v6 = vadd.f32 %v906_v4, %v898_v1 }
 0xa14   :  { %4723 = vtanh.f32 %v908_v6 }
 0xa21   :  { %v4724_v46 = vpop.eup %4723 }
 0xa22   :  { %911 = vrot.lane.b32.xlu0 %v4724_v46, %s4955_s7 }
 0xa94   :  { %v912_v8 = vpop.permute.xlu0 %911 }
 0xa95   :  { %v914_v12 = vmul.f32 %v4722_v61, %v912_v8 }
 0xa97   :  { %917 = vrot.lane.b32.xlu1 %v914_v12, %s4956_s3 }
 0xb09   :  { %v918_v16 = vpop.permute.xlu1 %917 }
 0xb0a   :  { %4389 = vmatmul.mubr.msk.f32.vlgmr.msra.gmra.mxu0 %vm513_vm2, %v918_v16 }
 0xb0b   :  { %4403 = vmatpush3.msra.mxu0 %v5046_v9  ;;  %4410 = vmatprep.mubr.msk.f32.mxu0 %vm4954_vm1, %v4953_v3 }
 0xb0c   :  { %4404 = vmatprep.subr.mxu0 %v4953_v3 }
 0xb0d   :  { %4405 = vmatpush3.msra.mxu0 %v5058_v11 }
 0xb0e   :  { %4406 = vmatprep.subr.mxu0 %v4953_v3 }
 0xb0f   :  { %4407 = vmatpush3.msra.mxu0 %v5071_v14 }
 0xb10   :  { %4408 = vmatprep.subr.mxu0 %v4953_v3 }
 0xb11   :  { %4409 = vmatpush3.msra.mxu0 %v5079_v15 }
 0xb12   :  { %4424 = vmatprep.subr.mxu0 %v4953_v3 }
 0xbca   :  { %v987_v41 = vpop.f32.mrf.mxu0 }
 0xbcb   :  { %v991_v44 = vadd.f32 %v987_v41, %v5224_v52 }
 0xbcc   :  { %v4390_v18 = vpop.f32.mrf.mxu0 }
 0xbcd   :  { %4725 = vtanh.f32 %v991_v44  ;;  %v3987_v22 = vmul.f32 -1.442695, %v991_v44 }
 0xbcf   :  { %4727 = vpow2.f32 %v3987_v22 }
 0xbda   :  { %v4726_v20 = vpop.eup %4725 }
 0xbdb   :  { %1001 = vrot.lane.b32.xlu0 %v4726_v20, %s4955_s7 }
 0xbdc   :  { %v4728_v24 = vpop.eup %4727 }
 0xbdd   :  { %v995_v26 = vadd.f32 1.0, %v4728_v24 }
 0xbdf   :  { %4729 = vrcp.f32 %v995_v26 }
 0xbec   :  { %v4730_v28 = vpop.eup %4729 }
 0xbed   :  { %v999_v32 = vmul.f32 %v4730_v28, %v908_v6 }
 0xc4d   :  { %v1002_v30 = vpop.permute.xlu0 %1001 }
 0xc4e   :  { %v1004_v48 = vmul.f32 %v4730_v28, %v1002_v30 }
 0xc50   :  { %1006 = vrot.lane.b32.xlu1 %v1004_v48, %s4956_s3 }
 0xcc2   :  { %v1007_v34 = vpop.permute.xlu1 %1006 }
 0xcc3   :  { %v1009_v36 = vadd.f32 %v1007_v34, %v999_v32 }
 0xcc5   :  { %4731 = vtanh.f32 %v1009_v36 }
 0xcd2   :  { %v4732_v52 = vpop.eup %4731 }
 0xcd3   :  { %1012 = vrot.lane.b32.xlu0 %v4732_v52, %s4955_s7 }
 0xd45   :  { %v1013_v38 = vpop.permute.xlu0 %1012 }
 0xd46   :  { %v1015_v40 = vmul.f32 %v4730_v28, %v1013_v38 }
 0xd48   :  { %1018 = vrot.lane.b32.xlu1 %v1015_v40, %s4956_s3 }
 0xdba   :  { %v1019_v45 = vpop.permute.xlu1 %1018 }
 0xdbb   :  { %4400 = vmatmul.mubr.msk.f32.vlgmr.msra.gmra.mxu1 %vm513_vm2, %v1019_v45 }
 0xdbc   :  { %4414 = vmatpush3.msra.mxu1 %v5046_v9  ;;  %4421 = vmatprep.mubr.msk.f32.mxu1 %vm4954_vm1, %v4953_v3 }
 0xdbd   :  { %4415 = vmatprep.subr.mxu1 %v4953_v3 }
 0xdbe   :  { %4416 = vmatpush3.msra.mxu1 %v5058_v11 }
 0xdbf   :  { %4417 = vmatprep.subr.mxu1 %v4953_v3 }
 0xdc0   :  { %4418 = vmatpush3.msra.mxu1 %v5071_v14 }
 0xdc1   :  { %4419 = vmatprep.subr.mxu1 %v4953_v3 }
 0xdc2   :  { %4420 = vmatpush3.msra.mxu1 %v5079_v15 }
 0xdc3   :  { %4435 = vmatprep.subr.mxu1 %v4953_v3 }
 0xe7b   :  { %v1088_v49 = vpop.f32.mrf.mxu1 }
 0xe7c   :  { %v1092_v9 = vadd.f32 %v1088_v49, %v5221_v50 }
 0xe7d   :  { %v4401_v51 = vpop.f32.mrf.mxu1 }
 0xe7e   :  { %4733 = vtanh.f32 %v1092_v9  ;;  %v3989_v58 = vmul.f32 -1.442695, %v1092_v9 }
 0xe80   :  { %4735 = vpow2.f32 %v3989_v58 }
 0xe8b   :  { %v4734_v55 = vpop.eup %4733 }
 0xe8c   :  { %1102 = vrot.lane.b32.xlu0 %v4734_v55, %s4955_s7 }
 0xe8d   :  { %v4736_v11 = vpop.eup %4735 }
 0xe8e   :  { %v1096_v61 = vadd.f32 1.0, %v4736_v11 }
 0xe90   :  { %4737 = vrcp.f32 %v1096_v61 }
 0xe9d   :  { %v4738_v14 = vpop.eup %4737 }
 0xe9e   :  { %v1100_v15 = vmul.f32 %v4738_v14, %v1009_v36 }
 0xefe   :  { %v1103_v43 = vpop.permute.xlu0 %1102 }
 0xeff   :  { %v1105_v63 = vmul.f32 %v4738_v14, %v1103_v43 }
 0xf01   :  { %1107 = vrot.lane.b32.xlu1 %v1105_v63, %s4956_s3 }
 0xf73   :  { %v1108_v1 = vpop.permute.xlu1 %1107 }
 0xf74   :  { %v1110_v4 = vadd.f32 %v1108_v1, %v1100_v15  ;;  %v5415_v15 = vld [vmem:[%s6051_s6 + $0x10] sm:$0xff]  ;;  %v5423_v1 = vld [vmem:[%s6051_s6 + $0x8] sm:$0xff] }
 0xf76   :  { %4739 = vtanh.f32 %v1110_v4 }
 0xf83   :  { %v4740_v50 = vpop.eup %4739 }
 0xf84   :  { %1113 = vrot.lane.b32.xlu0 %v4740_v50, %s4955_s7 }
 0xff6   :  { %v1114_v6 = vpop.permute.xlu0 %1113 }
 0xff7   :  { %v1116_v46 = vmul.f32 %v4738_v14, %v1114_v6 }
 0xff9   :  { %1119 = vrot.lane.b32.xlu1 %v1116_v46, %s4956_s3 }
0x106b   :  { %v1120_v8 = vpop.permute.xlu1 %1119 }
0x106c   :  { %4411 = vmatmul.mubr.msk.f32.vlgmr.msra.gmra.mxu0 %vm513_vm2, %v1120_v8 }
0x106d   :  { %4432 = vmatprep.mubr.msk.f32.mxu0 %vm4954_vm1, %v4953_v3 }
0x112c   :  { %v1189_v12 = vpop.f32.mrf.mxu0 }
0x112d   :  { %v1193_v16 = vadd.f32 %v1189_v12, %v5235_v57  ;;  %v362_v12 = vadd.f32 %v5232_v56, %v5240_v60 }
0x112e   :  { %v4412_v41 = vpop.f32.mrf.mxu0 }
0x112f   :  { %4741 = vtanh.f32 %v1193_v16  ;;  %v3991_v18 = vmul.f32 -1.442695, %v1193_v16 }
0x1131   :  { %4743 = vpow2.f32 %v3991_v18 }
0x113c   :  { %v4742_v44 = vpop.eup %4741 }
0x113d   :  { %1203 = vrot.lane.b32.xlu0 %v4742_v44, %s4955_s7 }
0x113e   :  { %v4744_v20 = vpop.eup %4743 }
0x113f   :  { %v1197_v22 = vadd.f32 1.0, %v4744_v20 }
0x1141   :  { %4745 = vrcp.f32 %v1197_v22 }
0x114e   :  { %v4746_v24 = vpop.eup %4745 }
0x114f   :  { %v1201_v30 = vmul.f32 %v4746_v24, %v1110_v4  ;;  %v5432_v4 = vld [vmem:[%s6051_s6] sm:$0xff] }
0x11af   :  { %v1204_v26 = vpop.permute.xlu0 %1203 }
0x11b0   :  { %v1206_v28 = vmul.f32 %v4746_v24, %v1204_v26 }
0x11b2   :  { %1208 = vrot.lane.b32.xlu1 %v1206_v28, %s4956_s3 }
0x1224   :  { %v1209_v48 = vpop.permute.xlu1 %1208 }
0x1225   :  { %v1211_v32 = vadd.f32 %v1209_v48, %v1201_v30 }
0x1227   :  { %4747 = vtanh.f32 %v1211_v32 }
0x1234   :  { %v4748_v57 = vpop.eup %4747 }
0x1235   :  { %1214 = vrot.lane.b32.xlu0 %v4748_v57, %s4955_s7 }
0x12a7   :  { %v1215_v34 = vpop.permute.xlu0 %1214 }
0x12a8   :  { %v1217_v36 = vmul.f32 %v4746_v24, %v1215_v34 }
0x12aa   :  { %1220 = vrot.lane.b32.xlu1 %v1217_v36, %s4956_s3 }
0x131c   :  { %v1221_v52 = vpop.permute.xlu1 %1220 }
0x131d   :  { %4422 = vmatmul.mubr.msk.f32.vlgmr.msra.gmra.mxu1 %vm513_vm2, %v1221_v52 }
0x131e   :  { %4443 = vmatprep.mubr.msk.f32.mxu1 %vm4954_vm1, %v4953_v3 }
0x13dd   :  { %v1290_v38 = vpop.f32.mrf.mxu1 }
0x13de   :  { %v1294_v40 = vadd.f32 %v1290_v38, %v5227_v54  ;;  %v5410_v54 = vld [vmem:[%s6051_s6 + $0x18] sm:$0xff] }
0x13df   :  { %v4423_v45 = vpop.f32.mrf.mxu1  ;;  %4425 = vmatpush3.msra.mxu0 %v5410_v54  ;;  %4436 = vmatpush3.msra.mxu1 %v5410_v54 }
0x13e0   :  { %4749 = vtanh.f32 %v1294_v40  ;;  %v3993_v9 = vmul.f32 -1.442695, %v1294_v40  ;;  %4426 = vmatprep.subr.mxu0 %v4953_v3  ;;  %4437 = vmatprep.subr.mxu1 %v4953_v3 }
0x13e1   :  { %4427 = vmatpush3.msra.mxu0 %v5415_v15  ;;  %4438 = vmatpush3.msra.mxu1 %v5415_v15 }
0x13e2   :  { %4751 = vpow2.f32 %v3993_v9  ;;  %4428 = vmatprep.subr.mxu0 %v4953_v3  ;;  %4439 = vmatprep.subr.mxu1 %v4953_v3 }
0x13e3   :  { %4429 = vmatpush3.msra.mxu0 %v5423_v1  ;;  %4440 = vmatpush3.msra.mxu1 %v5423_v1 }
0x13e4   :  { %4430 = vmatprep.subr.mxu0 %v4953_v3  ;;  %4441 = vmatprep.subr.mxu1 %v4953_v3 }
0x13e5   :  { %4431 = vmatpush3.msra.mxu0 %v5432_v4  ;;  %4442 = vmatpush3.msra.mxu1 %v5432_v4 }
0x13e6   :  { %4446 = vmatprep.subr.mxu0 %v4953_v3  ;;  %4457 = vmatprep.subr.mxu1 %v4953_v3 }
0x13ed   :  { %v4750_v49 = vpop.eup %4749 }
0x13ee   :  { %1304 = vrot.lane.b32.xlu0 %v4750_v49, %s4955_s7 }
0x13ef   :  { %v4752_v51 = vpop.eup %4751 }
0x13f0   :  { %v1298_v55 = vadd.f32 1.0, %v4752_v51 }
0x13f2   :  { %4753 = vrcp.f32 %v1298_v55 }
0x13ff   :  { %v4754_v58 = vpop.eup %4753 }
0x1400   :  { %v1302_v14 = vmul.f32 %v4754_v58, %v1211_v32 }
0x1460   :  { %v1305_v11 = vpop.permute.xlu0 %1304 }
0x1461   :  { %v1307_v61 = vmul.f32 %v4754_v58, %v1305_v11 }
0x1463   :  { %1309 = vrot.lane.b32.xlu1 %v1307_v61, %s4956_s3 }
0x14d5   :  { %v1310_v43 = vpop.permute.xlu1 %1309 }
0x14d6   :  { %v1312_v63 = vadd.f32 %v1310_v43, %v1302_v14 }
0x14d8   :  { %4755 = vtanh.f32 %v1312_v63 }
0x14e5   :  { %v4756_v50 = vpop.eup %4755 }
0x14e6   :  { %1315 = vrot.lane.b32.xlu0 %v4756_v50, %s4955_s7 }
0x1558   :  { %v1316_v6 = vpop.permute.xlu0 %1315 }
0x1559   :  { %v1318_v46 = vmul.f32 %v4754_v58, %v1316_v6 }
0x155b   :  { %1321 = vrot.lane.b32.xlu1 %v1318_v46, %s4956_s3 }
0x15cd   :  { %v1322_v8 = vpop.permute.xlu1 %1321 }
0x15ce   :  { %4433 = vmatmul.mubr.msk.f32.vlgmr.msra.gmra.mxu0 %vm513_vm2, %v1322_v8 }
0x15cf   :  { %4447 = vmatpush3.msra.mxu0 %v5410_v54  ;;  %4454 = vmatprep.mubr.msk.f32.mxu0 %vm4954_vm1, %v4953_v3 }
0x15d0   :  { %4448 = vmatprep.subr.mxu0 %v4953_v3 }
0x15d1   :  { %4449 = vmatpush3.msra.mxu0 %v5415_v15 }
0x15d2   :  { %4450 = vmatprep.subr.mxu0 %v4953_v3 }
0x15d3   :  { %4451 = vmatpush3.msra.mxu0 %v5423_v1 }
0x15d4   :  { %4452 = vmatprep.subr.mxu0 %v4953_v3 }
0x15d5   :  { %4453 = vmatpush3.msra.mxu0 %v5432_v4 }
0x15d6   :  { %4468 = vmatprep.subr.mxu0 %v4953_v3 }
0x168e   :  { %v1391_v16 = vpop.f32.mrf.mxu0 }
0x168f   :  { %v1395_v41 = vadd.f32 %v1391_v16, %v362_v12 }
0x1690   :  { %v4434_v44 = vpop.f32.mrf.mxu0 }
0x1691   :  { %4757 = vtanh.f32 %v1395_v41  ;;  %v3995_v20 = vmul.f32 -1.442695, %v1395_v41 }
0x1693   :  { %4759 = vpow2.f32 %v3995_v20 }
0x169e   :  { %v4758_v18 = vpop.eup %4757 }
0x169f   :  { %1405 = vrot.lane.b32.xlu0 %v4758_v18, %s4955_s7 }
0x16a0   :  { %v4760_v22 = vpop.eup %4759 }
0x16a1   :  { %v1399_v24 = vadd.f32 1.0, %v4760_v22 }
0x16a3   :  { %4761 = vrcp.f32 %v1399_v24 }
0x16b0   :  { %v4762_v26 = vpop.eup %4761 }
0x16b1   :  { %v1403_v48 = vmul.f32 %v4762_v26, %v1312_v63 }
0x1711   :  { %v1406_v28 = vpop.permute.xlu0 %1405 }
0x1712   :  { %v1408_v30 = vmul.f32 %v4762_v26, %v1406_v28 }
0x1714   :  { %1410 = vrot.lane.b32.xlu1 %v1408_v30, %s4956_s3 }
0x1786   :  { %v1411_v32 = vpop.permute.xlu1 %1410 }
0x1787   :  { %v1413_v56 = vadd.f32 %v1411_v32, %v1403_v48 }
0x1789   :  { %4763 = vtanh.f32 %v1413_v56 }
0x1796   :  { %v4764_v60 = vpop.eup %4763 }
0x1797   :  { %1416 = vrot.lane.b32.xlu0 %v4764_v60, %s4955_s7 }
0x1809   :  { %v1417_v57 = vpop.permute.xlu0 %1416 }
0x180a   :  { %v1419_v34 = vmul.f32 %v4762_v26, %v1417_v57 }
0x180c   :  { %1421 = vrot.lane.b32.xlu1 %v1419_v34, %s4956_s3 }
0x187e   :  { %v1422_v36 = vpop.permute.xlu1 %1421 }
0x187f   :  { %1424 = vst.msk [vmem:[#allocation4] sm:$0xff] %vm513_vm2, %v1422_v36  ;;  %4444 = vmatmul.mubr.msk.f32.vlgmr.msra.gmra.mxu1 %vm513_vm2, %v1422_v36 }
0x1880   :  { %4458 = vmatpush3.msra.mxu1 %v5410_v54  ;;  %4465 = vmatprep.mubr.msk.f32.mxu1 %vm4954_vm1, %v4953_v3 }
0x1881   :  { %4459 = vmatprep.subr.mxu1 %v4953_v3 }
0x1882   :  { %4460 = vmatpush3.msra.mxu1 %v5415_v15 }
0x1883   :  { %4461 = vmatprep.subr.mxu1 %v4953_v3 }
0x1884   :  { %4462 = vmatpush3.msra.mxu1 %v5423_v1 }
0x1885   :  { %4463 = vmatprep.subr.mxu1 %v4953_v3 }
0x1886   :  { %4464 = vmatpush3.msra.mxu1 %v5432_v4 }
0x1887   :  { %4479 = vmatprep.subr.mxu1 %v4953_v3 }
0x193f   :  { %v1494_v52 = vpop.f32.mrf.mxu1 }
0x1940   :  { %v1498_v38 = vadd.f32 %v1494_v52, %v5238_v59 }
0x1941   :  { %v4445_v40 = vpop.f32.mrf.mxu1 }
0x1942   :  { %4765 = vtanh.f32 %v1498_v38  ;;  %v3997_v49 = vmul.f32 -1.442695, %v1498_v38 }
0x1944   :  { %4767 = vpow2.f32 %v3997_v49 }
0x194f   :  { %v4766_v45 = vpop.eup %4765 }
0x1950   :  { %1508 = vrot.lane.b32.xlu0 %v4766_v45, %s4955_s7 }
0x1951   :  { %v4768_v9 = vpop.eup %4767 }
0x1952   :  { %v1502_v51 = vadd.f32 1.0, %v4768_v9 }
0x1954   :  { %4769 = vrcp.f32 %v1502_v51 }
0x1961   :  { %v4770_v55 = vpop.eup %4769 }
0x1962   :  { %v1506_v61 = vmul.f32 %v4770_v55, %v1413_v56 }
0x19c2   :  { %v1509_v58 = vpop.permute.xlu0 %1508 }
0x19c3   :  { %v1511_v11 = vmul.f32 %v4770_v55, %v1509_v58 }
0x19c5   :  { %1513 = vrot.lane.b32.xlu1 %v1511_v11, %s4956_s3 }
0x1a37   :  { %v1514_v14 = vpop.permute.xlu1 %1513 }
0x1a38   :  { %v1516_v43 = vadd.f32 %v1514_v14, %v1506_v61 }
0x1a3a   :  { %4771 = vtanh.f32 %v1516_v43 }
0x1a47   :  { %v4772_v59 = vpop.eup %4771 }
0x1a48   :  { %1519 = vrot.lane.b32.xlu0 %v4772_v59, %s4955_s7 }
0x1aba   :  { %v1520_v63 = vpop.permute.xlu0 %1519 }
0x1abb   :  { %v5478_v50 = vmul.f32 %v4770_v55, %v1520_v63 }
0x1abd   :  { %1530 = vrot.lane.b32.xlu1 %v5478_v50, %s4956_s3 }
0x1b2f   :  { %v1531_v6 = vpop.permute.xlu1 %1530 }
0x1b30   :  { %4455 = vmatmul.mubr.msk.f32.vlgmr.msra.gmra.mxu0 %vm513_vm2, %v1531_v6 }
0x1b31   :  { %4469 = vmatpush3.msra.mxu0 %v5410_v54  ;;  %4476 = vmatprep.mubr.msk.f32.mxu0 %vm4954_vm1, %v4953_v3 }
0x1b32   :  { %4470 = vmatprep.subr.mxu0 %v4953_v3 }
0x1b33   :  { %4471 = vmatpush3.msra.mxu0 %v5415_v15 }
0x1b34   :  { %4472 = vmatprep.subr.mxu0 %v4953_v3 }
0x1b35   :  { %4473 = vmatpush3.msra.mxu0 %v5423_v1 }
0x1b36   :  { %4474 = vmatprep.subr.mxu0 %v4953_v3 }
0x1b37   :  { %4475 = vmatpush3.msra.mxu0 %v5432_v4 }
0x1b38   :  { %4490 = vmatprep.subr.mxu0 %v4953_v3 }
0x1bf0   :  { %v1600_v46 = vpop.f32.mrf.mxu0 }
0x1bf1   :  { %v1604_v8 = vadd.f32 %v1600_v46, %v5246_v0 }
0x1bf2   :  { %v4456_v12 = vpop.f32.mrf.mxu0 }
0x1bf3   :  { %4773 = vtanh.f32 %v1604_v8  ;;  %v3999_v41 = vmul.f32 -1.442695, %v1604_v8 }
0x1bf5   :  { %4775 = vpow2.f32 %v3999_v41 }
0x1c00   :  { %v4774_v16 = vpop.eup %4773 }
0x1c01   :  { %1614 = vrot.lane.b32.xlu0 %v4774_v16, %s4955_s7 }
0x1c02   :  { %v4776_v44 = vpop.eup %4775 }
0x1c03   :  { %v1608_v18 = vadd.f32 1.0, %v4776_v44 }
0x1c05   :  { %4777 = vrcp.f32 %v1608_v18 }
0x1c12   :  { %v4778_v20 = vpop.eup %4777 }
0x1c13   :  { %v1612_v26 = vmul.f32 %v4778_v20, %v1516_v43 }
0x1c73   :  { %v1615_v22 = vpop.permute.xlu0 %1614 }
0x1c74   :  { %v1617_v24 = vmul.f32 %v4778_v20, %v1615_v22 }
0x1c76   :  { %1619 = vrot.lane.b32.xlu1 %v1617_v24, %s4956_s3 }
0x1ce8   :  { %v1620_v28 = vpop.permute.xlu1 %1619 }
0x1ce9   :  { %v1622_v30 = vadd.f32 %v1620_v28, %v1612_v26 }
0x1ceb   :  { %4779 = vtanh.f32 %v1622_v30 }
0x1cf8   :  { %v4780_v0 = vpop.eup %4779 }
0x1cf9   :  { %1625 = vrot.lane.b32.xlu0 %v4780_v0, %s4955_s7 }
0x1d6b   :  { %v1626_v48 = vpop.permute.xlu0 %1625 }
0x1d6c   :  { %v5497_v32 = vmul.f32 %v4778_v20, %v1626_v48 }
0x1d6e   :  { %1636 = vrot.lane.b32.xlu1 %v5497_v32, %s4956_s3 }
0x1de0   :  { %v1637_v56 = vpop.permute.xlu1 %1636 }
0x1de1   :  { %4466 = vmatmul.mubr.msk.f32.vlgmr.msra.gmra.mxu1 %vm513_vm2, %v1637_v56 }
0x1de2   :  { %4480 = vmatpush3.msra.mxu1 %v5410_v54  ;;  %4487 = vmatprep.mubr.msk.f32.mxu1 %vm4954_vm1, %v4953_v3 }
0x1de3   :  { %4481 = vmatprep.subr.mxu1 %v4953_v3 }
0x1de4   :  { %4482 = vmatpush3.msra.mxu1 %v5415_v15 }
0x1de5   :  { %4483 = vmatprep.subr.mxu1 %v4953_v3 }
0x1de6   :  { %4484 = vmatpush3.msra.mxu1 %v5423_v1 }
0x1de7   :  { %4485 = vmatprep.subr.mxu1 %v4953_v3 }
0x1de8   :  { %4486 = vmatpush3.msra.mxu1 %v5432_v4 }
0x1de9   :  { %4501 = vmatprep.subr.mxu1 %v4953_v3 }
0x1ea1   :  { %v1706_v60 = vpop.f32.mrf.mxu1 }
0x1ea2   :  { %v1710_v57 = vadd.f32 %v1706_v60, %v5243_v62 }
0x1ea3   :  { %v4467_v34 = vpop.f32.mrf.mxu1 }
0x1ea4   :  { %4781 = vtanh.f32 %v1710_v57  ;;  %v4001_v52 = vmul.f32 -1.442695, %v1710_v57 }
0x1ea6   :  { %4783 = vpow2.f32 %v4001_v52 }
0x1eb1   :  { %v4782_v36 = vpop.eup %4781 }
0x1eb2   :  { %1720 = vrot.lane.b32.xlu0 %v4782_v36, %s4955_s7 }
0x1eb3   :  { %v4784_v38 = vpop.eup %4783 }
0x1eb4   :  { %v1714_v40 = vadd.f32 1.0, %v4784_v38 }
0x1eb6   :  { %4785 = vrcp.f32 %v1714_v40 }
0x1ec3   :  { %v4786_v45 = vpop.eup %4785 }
0x1ec4   :  { %v1718_v51 = vmul.f32 %v4786_v45, %v1622_v30 }
0x1f24   :  { %v1721_v49 = vpop.permute.xlu0 %1720 }
0x1f25   :  { %v1723_v9 = vmul.f32 %v4786_v45, %v1721_v49 }
0x1f27   :  { %1725 = vrot.lane.b32.xlu1 %v1723_v9, %s4956_s3 }
0x1f99   :  { %v1726_v55 = vpop.permute.xlu1 %1725 }
0x1f9a   :  { %v1728_v58 = vadd.f32 %v1726_v55, %v1718_v51 }
0x1f9c   :  { %4787 = vtanh.f32 %v1728_v58 }
0x1fa9   :  { %v4788_v62 = vpop.eup %4787 }
0x1faa   :  { %1731 = vrot.lane.b32.xlu0 %v4788_v62, %s4955_s7 }
0x201c   :  { %v1732_v11 = vpop.permute.xlu0 %1731 }
0x201d   :  { %v5516_v61 = vmul.f32 %v4786_v45, %v1732_v11 }
0x201f   :  { %1739 = vrot.lane.b32.xlu1 %v5516_v61, %s4956_s3 }
0x2091   :  { %v1740_v14 = vpop.permute.xlu1 %1739 }
0x2092   :  { %4477 = vmatmul.mubr.msk.f32.vlgmr.msra.gmra.mxu0 %vm513_vm2, %v1740_v14 }
0x2093   :  { %4491 = vmatpush3.msra.mxu0 %v5410_v54  ;;  %4498 = vmatprep.mubr.msk.f32.mxu0 %vm4954_vm1, %v4953_v3 }
0x2094   :  { %4492 = vmatprep.subr.mxu0 %v4953_v3 }
0x2095   :  { %4493 = vmatpush3.msra.mxu0 %v5415_v15 }
0x2096   :  { %4494 = vmatprep.subr.mxu0 %v4953_v3 }
0x2097   :  { %4495 = vmatpush3.msra.mxu0 %v5423_v1 }
0x2098   :  { %4496 = vmatprep.subr.mxu0 %v4953_v3 }
0x2099   :  { %4497 = vmatpush3.msra.mxu0 %v5432_v4 }
0x209a   :  { %4512 = vmatprep.subr.mxu0 %v4953_v3 }
0x2152   :  { %v1809_v43 = vpop.f32.mrf.mxu0 }
0x2153   :  { %v1813_v59 = vadd.f32 %v1809_v43, %v5252_v5 }
0x2154   :  { %v4478_v63 = vpop.f32.mrf.mxu0 }
0x2155   :  { %4789 = vtanh.f32 %v1813_v59  ;;  %v4003_v46 = vmul.f32 -1.442695, %v1813_v59 }
0x2157   :  { %4791 = vpow2.f32 %v4003_v46 }
0x2162   :  { %v4790_v6 = vpop.eup %4789 }
0x2163   :  { %1823 = vrot.lane.b32.xlu0 %v4790_v6, %s4955_s7 }
0x2164   :  { %v4792_v8 = vpop.eup %4791 }
0x2165   :  { %v1817_v12 = vadd.f32 1.0, %v4792_v8 }
0x2167   :  { %4793 = vrcp.f32 %v1817_v12 }
0x2174   :  { %v4794_v16 = vpop.eup %4793 }
0x2175   :  { %v1821_v18 = vmul.f32 %v4794_v16, %v1728_v58 }
0x21d5   :  { %v1824_v41 = vpop.permute.xlu0 %1823 }
0x21d6   :  { %v1826_v44 = vmul.f32 %v4794_v16, %v1824_v41 }
0x21d8   :  { %1828 = vrot.lane.b32.xlu1 %v1826_v44, %s4956_s3 }
0x224a   :  { %v1829_v20 = vpop.permute.xlu1 %1828 }
0x224b   :  { %v1831_v22 = vadd.f32 %v1829_v20, %v1821_v18 }
0x224d   :  { %4795 = vtanh.f32 %v1831_v22 }
0x225a   :  { %v4796_v5 = vpop.eup %4795 }
0x225b   :  { %1834 = vrot.lane.b32.xlu0 %v4796_v5, %s4955_s7 }
0x22cd   :  { %v1835_v24 = vpop.permute.xlu0 %1834 }
0x22ce   :  { %v1837_v26 = vmul.f32 %v4794_v16, %v1835_v24 }
0x22d0   :  { %1839 = vrot.lane.b32.xlu1 %v1837_v26, %s4956_s3 }
0x2342   :  { %v1840_v28 = vpop.permute.xlu1 %1839 }
0x2343   :  { %1842 = vst.msk [vmem:[#allocation4 + $0x8] sm:$0xff] %vm513_vm2, %v1840_v28  ;;  %4488 = vmatmul.mubr.msk.f32.vlgmr.msra.gmra.mxu1 %vm513_vm2, %v1840_v28 }
0x2344   :  { %4502 = vmatpush3.msra.mxu1 %v5410_v54  ;;  %4509 = vmatprep.mubr.msk.f32.mxu1 %vm4954_vm1, %v4953_v3 }
0x2345   :  { %4503 = vmatprep.subr.mxu1 %v4953_v3 }
0x2346   :  { %4504 = vmatpush3.msra.mxu1 %v5415_v15 }
0x2347   :  { %4505 = vmatprep.subr.mxu1 %v4953_v3 }
0x2348   :  { %4506 = vmatpush3.msra.mxu1 %v5423_v1 }
0x2349   :  { %4507 = vmatprep.subr.mxu1 %v4953_v3 }
0x234a   :  { %4508 = vmatpush3.msra.mxu1 %v5432_v4 }
0x234b   :  { %4523 = vmatprep.subr.mxu1 %v4953_v3 }
0x2403   :  { %v1912_v30 = vpop.f32.mrf.mxu1 }
0x2404   :  { %v1916_v0 = vadd.f32 %v1912_v30, %v5249_v2 }
0x2405   :  { %v4489_v48 = vpop.f32.mrf.mxu1 }
0x2406   :  { %4797 = vtanh.f32 %v1916_v0  ;;  %v4005_v60 = vmul.f32 -1.442695, %v1916_v0 }
0x2408   :  { %4799 = vpow2.f32 %v4005_v60 }
0x2413   :  { %v4798_v56 = vpop.eup %4797 }
0x2414   :  { %1926 = vrot.lane.b32.xlu0 %v4798_v56, %s4955_s7 }
0x2415   :  { %v4800_v57 = vpop.eup %4799 }
0x2416   :  { %v1920_v34 = vadd.f32 1.0, %v4800_v57 }
0x2418   :  { %4801 = vrcp.f32 %v1920_v34 }
0x2425   :  { %v4802_v36 = vpop.eup %4801 }
0x2426   :  { %v1924_v40 = vmul.f32 %v4802_v36, %v1831_v22 }
0x2486   :  { %v1927_v52 = vpop.permute.xlu0 %1926 }
0x2487   :  { %v1929_v38 = vmul.f32 %v4802_v36, %v1927_v52 }
0x2489   :  { %1931 = vrot.lane.b32.xlu1 %v1929_v38, %s4956_s3 }
0x24fb   :  { %v1932_v45 = vpop.permute.xlu1 %1931 }
0x24fc   :  { %v1934_v49 = vadd.f32 %v1932_v45, %v1924_v40 }
0x24fe   :  { %4803 = vtanh.f32 %v1934_v49 }
0x250b   :  { %v4804_v2 = vpop.eup %4803 }
0x250c   :  { %1937 = vrot.lane.b32.xlu0 %v4804_v2, %s4955_s7 }
0x257e   :  { %v1938_v9 = vpop.permute.xlu0 %1937 }
0x257f   :  { %v5552_v51 = vmul.f32 %v4802_v36, %v1938_v9 }
0x2581   :  { %1947 = vrot.lane.b32.xlu1 %v5552_v51, %s4956_s3 }
0x25f3   :  { %v1948_v55 = vpop.permute.xlu1 %1947 }
0x25f4   :  { %4499 = vmatmul.mubr.msk.f32.vlgmr.msra.gmra.mxu0 %vm513_vm2, %v1948_v55 }
0x25f5   :  { %4513 = vmatpush3.msra.mxu0 %v5410_v54  ;;  %4520 = vmatprep.mubr.msk.f32.mxu0 %vm4954_vm1, %v4953_v3 }
0x25f6   :  { %4514 = vmatprep.subr.mxu0 %v4953_v3 }
0x25f7   :  { %4515 = vmatpush3.msra.mxu0 %v5415_v15 }
0x25f8   :  { %4516 = vmatprep.subr.mxu0 %v4953_v3 }
0x25f9   :  { %4517 = vmatpush3.msra.mxu0 %v5423_v1 }
0x25fa   :  { %4518 = vmatprep.subr.mxu0 %v4953_v3 }
0x25fb   :  { %4519 = vmatpush3.msra.mxu0 %v5432_v4 }
0x25fc   :  { %4534 = vmatprep.subr.mxu0 %v4953_v3 }
0x26b4   :  { %v2017_v58 = vpop.f32.mrf.mxu0 }
0x26b5   :  { %v2021_v62 = vadd.f32 %v2017_v58, %v5258_v10 }
0x26b6   :  { %v4500_v11 = vpop.f32.mrf.mxu0 }
0x26b7   :  { %4805 = vtanh.f32 %v2021_v62  ;;  %v4007_v43 = vmul.f32 -1.442695, %v2021_v62 }
0x26b9   :  { %4807 = vpow2.f32 %v4007_v43 }
0x26c4   :  { %v4806_v14 = vpop.eup %4805 }
0x26c5   :  { %2031 = vrot.lane.b32.xlu0 %v4806_v14, %s4955_s7 }
0x26c6   :  { %v4808_v59 = vpop.eup %4807 }
0x26c7   :  { %v2025_v63 = vadd.f32 1.0, %v4808_v59 }
0x26c9   :  { %4809 = vrcp.f32 %v2025_v63 }
0x26d6   :  { %v4810_v6 = vpop.eup %4809 }
0x26d7   :  { %v2029_v12 = vmul.f32 %v4810_v6, %v1934_v49 }
0x2737   :  { %v2032_v46 = vpop.permute.xlu0 %2031 }
0x2738   :  { %v2034_v8 = vmul.f32 %v4810_v6, %v2032_v46 }
0x273a   :  { %2036 = vrot.lane.b32.xlu1 %v2034_v8, %s4956_s3 }
0x27ac   :  { %v2037_v16 = vpop.permute.xlu1 %2036 }
0x27ad   :  { %v2039_v41 = vadd.f32 %v2037_v16, %v2029_v12 }
0x27af   :  { %4811 = vtanh.f32 %v2039_v41 }
0x27bc   :  { %v4812_v10 = vpop.eup %4811 }
0x27bd   :  { %2042 = vrot.lane.b32.xlu0 %v4812_v10, %s4955_s7 }
0x282f   :  { %v2043_v44 = vpop.permute.xlu0 %2042 }
0x2830   :  { %v5571_v18 = vmul.f32 %v4810_v6, %v2043_v44 }
0x2832   :  { %2052 = vrot.lane.b32.xlu1 %v5571_v18, %s4956_s3 }
0x28a4   :  { %v2053_v20 = vpop.permute.xlu1 %2052 }
0x28a5   :  { %4510 = vmatmul.mubr.msk.f32.vlgmr.msra.gmra.mxu1 %vm513_vm2, %v2053_v20 }
0x28a6   :  { %4524 = vmatpush3.msra.mxu1 %v5410_v54  ;;  %4531 = vmatprep.mubr.msk.f32.mxu1 %vm4954_vm1, %v4953_v3 }
0x28a7   :  { %4525 = vmatprep.subr.mxu1 %v4953_v3 }
0x28a8   :  { %4526 = vmatpush3.msra.mxu1 %v5415_v15 }
0x28a9   :  { %4527 = vmatprep.subr.mxu1 %v4953_v3 }
0x28aa   :  { %4528 = vmatpush3.msra.mxu1 %v5423_v1 }
0x28ab   :  { %4529 = vmatprep.subr.mxu1 %v4953_v3 }
0x28ac   :  { %4530 = vmatpush3.msra.mxu1 %v5432_v4 }
0x28ad   :  { %4545 = vmatprep.subr.mxu1 %v4953_v3 }
0x2965   :  { %v2122_v22 = vpop.f32.mrf.mxu1 }
0x2966   :  { %v2126_v5 = vadd.f32 %v2122_v22, %v5255_v7 }
0x2967   :  { %v4511_v24 = vpop.f32.mrf.mxu1 }
0x2968   :  { %4813 = vtanh.f32 %v2126_v5  ;;  %v4009_v28 = vmul.f32 -1.442695, %v2126_v5 }
0x296a   :  { %4815 = vpow2.f32 %v4009_v28 }
0x2975   :  { %v4814_v26 = vpop.eup %4813 }
0x2976   :  { %2136 = vrot.lane.b32.xlu0 %v4814_v26, %s4955_s7 }
0x2977   :  { %v4816_v30 = vpop.eup %4815 }
0x2978   :  { %v2130_v0 = vadd.f32 1.0, %v4816_v30 }
0x297a   :  { %4817 = vrcp.f32 %v2130_v0 }
0x2987   :  { %v4818_v48 = vpop.eup %4817 }
0x2988   :  { %v2134_v57 = vmul.f32 %v4818_v48, %v2039_v41 }
0x29e8   :  { %v2137_v56 = vpop.permute.xlu0 %2136 }
0x29e9   :  { %v2139_v60 = vmul.f32 %v4818_v48, %v2137_v56 }
0x29eb   :  { %2141 = vrot.lane.b32.xlu1 %v2139_v60, %s4956_s3 }
0x2a5d   :  { %v2142_v34 = vpop.permute.xlu1 %2141 }
0x2a5e   :  { %v2144_v36 = vadd.f32 %v2142_v34, %v2134_v57 }
0x2a60   :  { %4819 = vtanh.f32 %v2144_v36 }
0x2a6d   :  { %v4820_v7 = vpop.eup %4819 }
0x2a6e   :  { %2147 = vrot.lane.b32.xlu0 %v4820_v7, %s4955_s7 }
0x2ae0   :  { %v2148_v52 = vpop.permute.xlu0 %2147 }
0x2ae1   :  { %v5590_v38 = vmul.f32 %v4818_v48, %v2148_v52 }
0x2ae3   :  { %2154 = vrot.lane.b32.xlu1 %v5590_v38, %s4956_s3 }
0x2b55   :  { %v2155_v40 = vpop.permute.xlu1 %2154 }
0x2b56   :  { %4521 = vmatmul.mubr.msk.f32.vlgmr.msra.gmra.mxu0 %vm513_vm2, %v2155_v40 }
0x2b57   :  { %4535 = vmatpush3.msra.mxu0 %v5410_v54  ;;  %4542 = vmatprep.mubr.msk.f32.mxu0 %vm4954_vm1, %v4953_v3 }
0x2b58   :  { %4536 = vmatprep.subr.mxu0 %v4953_v3 }
0x2b59   :  { %4537 = vmatpush3.msra.mxu0 %v5415_v15 }
0x2b5a   :  { %4538 = vmatprep.subr.mxu0 %v4953_v3 }
0x2b5b   :  { %4539 = vmatpush3.msra.mxu0 %v5423_v1 }
0x2b5c   :  { %4540 = vmatprep.subr.mxu0 %v4953_v3 }
0x2b5d   :  { %4541 = vmatpush3.msra.mxu0 %v5432_v4 }
0x2b5e   :  { %4556 = vmatprep.subr.mxu0 %v4953_v3 }
0x2c16   :  { %v2224_v45 = vpop.f32.mrf.mxu0 }
0x2c17   :  { %v2228_v49 = vadd.f32 %v2224_v45, %v5264_v17 }
0x2c18   :  { %v4522_v2 = vpop.f32.mrf.mxu0 }
0x2c19   :  { %4821 = vtanh.f32 %v2228_v49  ;;  %v4011_v55 = vmul.f32 -1.442695, %v2228_v49 }
0x2c1b   :  { %4823 = vpow2.f32 %v4011_v55 }
0x2c26   :  { %v4822_v9 = vpop.eup %4821 }
0x2c27   :  { %2238 = vrot.lane.b32.xlu0 %v4822_v9, %s4955_s7 }
0x2c28   :  { %v4824_v58 = vpop.eup %4823 }
0x2c29   :  { %v2232_v62 = vadd.f32 1.0, %v4824_v58 }
0x2c2b   :  { %4825 = vrcp.f32 %v2232_v62 }
0x2c38   :  { %v4826_v11 = vpop.eup %4825 }
0x2c39   :  { %v2236_v59 = vmul.f32 %v4826_v11, %v2144_v36 }
0x2c99   :  { %v2239_v14 = vpop.permute.xlu0 %2238 }
0x2c9a   :  { %v2241_v43 = vmul.f32 %v4826_v11, %v2239_v14 }
0x2c9c   :  { %2243 = vrot.lane.b32.xlu1 %v2241_v43, %s4956_s3 }
0x2d0e   :  { %v2244_v63 = vpop.permute.xlu1 %2243 }
0x2d0f   :  { %v2246_v6 = vadd.f32 %v2244_v63, %v2236_v59 }
0x2d11   :  { %4827 = vtanh.f32 %v2246_v6 }
0x2d1e   :  { %v4828_v17 = vpop.eup %4827 }
0x2d1f   :  { %2249 = vrot.lane.b32.xlu0 %v4828_v17, %s4955_s7 }
0x2d91   :  { %v2250_v46 = vpop.permute.xlu0 %2249 }
0x2d92   :  { %v2252_v8 = vmul.f32 %v4826_v11, %v2250_v46 }
0x2d94   :  { %2254 = vrot.lane.b32.xlu1 %v2252_v8, %s4956_s3 }
0x2e06   :  { %v2255_v12 = vpop.permute.xlu1 %2254 }
0x2e07   :  { %2257 = vst.msk [vmem:[#allocation4 + $0x10] sm:$0xff] %vm513_vm2, %v2255_v12  ;;  %4532 = vmatmul.mubr.msk.f32.vlgmr.msra.gmra.mxu1 %vm513_vm2, %v2255_v12 }
0x2e08   :  { %4546 = vmatpush3.msra.mxu1 %v5410_v54  ;;  %4553 = vmatprep.mubr.msk.f32.mxu1 %vm4954_vm1, %v4953_v3 }
0x2e09   :  { %4547 = vmatprep.subr.mxu1 %v4953_v3 }
0x2e0a   :  { %4548 = vmatpush3.msra.mxu1 %v5415_v15 }
0x2e0b   :  { %4549 = vmatprep.subr.mxu1 %v4953_v3 }
0x2e0c   :  { %4550 = vmatpush3.msra.mxu1 %v5423_v1 }
0x2e0d   :  { %4551 = vmatprep.subr.mxu1 %v4953_v3 }
0x2e0e   :  { %4552 = vmatpush3.msra.mxu1 %v5432_v4 }
0x2e0f   :  { %4567 = vmatprep.subr.mxu1 %v4953_v3 }
0x2ec7   :  { %v2327_v16 = vpop.f32.mrf.mxu1 }
0x2ec8   :  { %v2331_v41 = vadd.f32 %v2327_v16, %v5261_v13 }
0x2ec9   :  { %v4533_v10 = vpop.f32.mrf.mxu1 }
0x2eca   :  { %4829 = vtanh.f32 %v2331_v41  ;;  %v4013_v20 = vmul.f32 -1.442695, %v2331_v41 }
0x2ecc   :  { %4831 = vpow2.f32 %v4013_v20 }
0x2ed7   :  { %v4830_v44 = vpop.eup %4829 }
0x2ed8   :  { %2341 = vrot.lane.b32.xlu0 %v4830_v44, %s4955_s7 }
0x2ed9   :  { %v4832_v22 = vpop.eup %4831 }
0x2eda   :  { %v2335_v5 = vadd.f32 1.0, %v4832_v22 }
0x2edc   :  { %4833 = vrcp.f32 %v2335_v5 }
0x2ee9   :  { %v4834_v24 = vpop.eup %4833 }
0x2eea   :  { %v2339_v30 = vmul.f32 %v4834_v24, %v2246_v6 }
0x2f4a   :  { %v2342_v26 = vpop.permute.xlu0 %2341 }
0x2f4b   :  { %v2344_v28 = vmul.f32 %v4834_v24, %v2342_v26 }
0x2f4d   :  { %2346 = vrot.lane.b32.xlu1 %v2344_v28, %s4956_s3 }
0x2fbf   :  { %v2347_v0 = vpop.permute.xlu1 %2346 }
0x2fc0   :  { %v2349_v48 = vadd.f32 %v2347_v0, %v2339_v30 }
0x2fc2   :  { %4835 = vtanh.f32 %v2349_v48 }
0x2fcf   :  { %v4836_v13 = vpop.eup %4835 }
0x2fd0   :  { %2352 = vrot.lane.b32.xlu0 %v4836_v13, %s4955_s7 }
0x3042   :  { %v2353_v56 = vpop.permute.xlu0 %2352 }
0x3043   :  { %v5626_v60 = vmul.f32 %v4834_v24, %v2353_v56 }
0x3045   :  { %2362 = vrot.lane.b32.xlu1 %v5626_v60, %s4956_s3 }
0x30b7   :  { %v2363_v57 = vpop.permute.xlu1 %2362 }
0x30b8   :  { %4543 = vmatmul.mubr.msk.f32.vlgmr.msra.gmra.mxu0 %vm513_vm2, %v2363_v57 }
0x30b9   :  { %4557 = vmatpush3.msra.mxu0 %v5410_v54  ;;  %4564 = vmatprep.mubr.msk.f32.mxu0 %vm4954_vm1, %v4953_v3 }
0x30ba   :  { %4558 = vmatprep.subr.mxu0 %v4953_v3 }
0x30bb   :  { %4559 = vmatpush3.msra.mxu0 %v5415_v15 }
0x30bc   :  { %4560 = vmatprep.subr.mxu0 %v4953_v3 }
0x30bd   :  { %4561 = vmatpush3.msra.mxu0 %v5423_v1 }
0x30be   :  { %4562 = vmatprep.subr.mxu0 %v4953_v3 }
0x30bf   :  { %4563 = vmatpush3.msra.mxu0 %v5432_v4 }
0x30c0   :  { %4578 = vmatprep.subr.mxu0 %v4953_v3 }
0x3178   :  { %v2432_v34 = vpop.f32.mrf.mxu0 }
0x3179   :  { %v2436_v36 = vadd.f32 %v2432_v34, %v5270_v21 }
0x317a   :  { %v4544_v7 = vpop.f32.mrf.mxu0 }
0x317b   :  { %4837 = vtanh.f32 %v2436_v36  ;;  %v4015_v40 = vmul.f32 -1.442695, %v2436_v36 }
0x317d   :  { %4839 = vpow2.f32 %v4015_v40 }
0x3188   :  { %v4838_v52 = vpop.eup %4837 }
0x3189   :  { %2446 = vrot.lane.b32.xlu0 %v4838_v52, %s4955_s7 }
0x318a   :  { %v4840_v45 = vpop.eup %4839 }
0x318b   :  { %v2440_v49 = vadd.f32 1.0, %v4840_v45 }
0x318d   :  { %4841 = vrcp.f32 %v2440_v49 }
0x319a   :  { %v4842_v2 = vpop.eup %4841 }
0x319b   :  { %v2444_v58 = vmul.f32 %v4842_v2, %v2349_v48 }
0x31fb   :  { %v2447_v9 = vpop.permute.xlu0 %2446 }
0x31fc   :  { %v2449_v55 = vmul.f32 %v4842_v2, %v2447_v9 }
0x31fe   :  { %2451 = vrot.lane.b32.xlu1 %v2449_v55, %s4956_s3 }
0x3270   :  { %v2452_v62 = vpop.permute.xlu1 %2451 }
0x3271   :  { %v2454_v11 = vadd.f32 %v2452_v62, %v2444_v58 }
0x3273   :  { %4843 = vtanh.f32 %v2454_v11 }
0x3280   :  { %v4844_v21 = vpop.eup %4843 }
0x3281   :  { %2457 = vrot.lane.b32.xlu0 %v4844_v21, %s4955_s7 }
0x32f3   :  { %v2458_v14 = vpop.permute.xlu0 %2457 }
0x32f4   :  { %v5645_v43 = vmul.f32 %v4842_v2, %v2458_v14 }
0x32f6   :  { %2467 = vrot.lane.b32.xlu1 %v5645_v43, %s4956_s3 }
0x3368   :  { %v2468_v59 = vpop.permute.xlu1 %2467 }
0x3369   :  { %4554 = vmatmul.mubr.msk.f32.vlgmr.msra.gmra.mxu1 %vm513_vm2, %v2468_v59 }
0x336a   :  { %4568 = vmatpush3.msra.mxu1 %v5410_v54  ;;  %4575 = vmatprep.mubr.msk.f32.mxu1 %vm4954_vm1, %v4953_v3 }
0x336b   :  { %4569 = vmatprep.subr.mxu1 %v4953_v3 }
0x336c   :  { %4570 = vmatpush3.msra.mxu1 %v5415_v15 }
0x336d   :  { %4571 = vmatprep.subr.mxu1 %v4953_v3 }
0x336e   :  { %4572 = vmatpush3.msra.mxu1 %v5423_v1 }
0x336f   :  { %4573 = vmatprep.subr.mxu1 %v4953_v3 }
0x3370   :  { %4574 = vmatpush3.msra.mxu1 %v5432_v4 }
0x3371   :  { %4589 = vmatprep.subr.mxu1 %v4953_v3 }
0x3429   :  { %v2537_v63 = vpop.f32.mrf.mxu1 }
0x342a   :  { %v2541_v6 = vadd.f32 %v2537_v63, %v5267_v19 }
0x342b   :  { %v4555_v17 = vpop.f32.mrf.mxu1 }
0x342c   :  { %4845 = vtanh.f32 %v2541_v6  ;;  %v4017_v8 = vmul.f32 -1.442695, %v2541_v6 }
0x342e   :  { %4847 = vpow2.f32 %v4017_v8 }
0x3439   :  { %v4846_v46 = vpop.eup %4845 }
0x343a   :  { %2551 = vrot.lane.b32.xlu0 %v4846_v46, %s4955_s7 }
0x343b   :  { %v4848_v12 = vpop.eup %4847 }
0x343c   :  { %v2545_v16 = vadd.f32 1.0, %v4848_v12 }
0x343e   :  { %4849 = vrcp.f32 %v2545_v16  ;;  %v5708_v16 = vld [vmem:[%s6051_s6 + $0x18] sm:$0xff] }
0x344b   :  { %v4850_v41 = vpop.eup %4849 }
0x344c   :  { %v2549_v20 = vmul.f32 %v4850_v41, %v2454_v11 }
0x34ac   :  { %v2552_v10 = vpop.permute.xlu0 %2551 }
0x34ad   :  { %v2554_v44 = vmul.f32 %v4850_v41, %v2552_v10  ;;  %v5724_v10 = vld [vmem:[%s6051_s6 + $0x8] sm:$0xff] }
0x34af   :  { %2556 = vrot.lane.b32.xlu1 %v2554_v44, %s4956_s3  ;;  %v5731_v44 = vld [vmem:[%s6051_s6] sm:$0xff] }
0x3521   :  { %v2557_v22 = vpop.permute.xlu1 %2556 }
0x3522   :  { %v2559_v5 = vadd.f32 %v2557_v22, %v2549_v20 }
0x3524   :  { %4851 = vtanh.f32 %v2559_v5 }
0x3531   :  { %v4852_v19 = vpop.eup %4851 }
0x3532   :  { %2562 = vrot.lane.b32.xlu0 %v4852_v19, %s4955_s7 }
0x35a4   :  { %v2563_v24 = vpop.permute.xlu0 %2562 }
0x35a5   :  { %v5664_v26 = vmul.f32 %v4850_v41, %v2563_v24  ;;  %v5717_v41 = vld [vmem:[%s6051_s6 + $0x10] sm:$0xff]  ;;  %s4957_s6 = smov 96  }
0x35a7   :  { %2569 = vrot.lane.b32.xlu1 %v5664_v26, %s4956_s3 }
0x3619   :  { %v2570_v28 = vpop.permute.xlu1 %2569 }
0x361a   :  { %4565 = vmatmul.mubr.msk.f32.vlgmr.msra.gmra.mxu0 %vm513_vm2, %v2570_v28 }
0x361b   :  { %4579 = vmatpush3.msra.mxu0 %v5410_v54  ;;  %4586 = vmatprep.mubr.msk.f32.mxu0 %vm4954_vm1, %v4953_v3 }
0x361c   :  { %4580 = vmatprep.subr.mxu0 %v4953_v3 }
0x361d   :  { %4581 = vmatpush3.msra.mxu0 %v5415_v15 }
0x361e   :  { %4582 = vmatprep.subr.mxu0 %v4953_v3 }
0x361f   :  { %4583 = vmatpush3.msra.mxu0 %v5423_v1 }
0x3620   :  { %4584 = vmatprep.subr.mxu0 %v4953_v3 }
0x3621   :  { %4585 = vmatpush3.msra.mxu0 %v5432_v4 }
0x3622   :  { %4600 = vmatprep.subr.mxu0 %v4953_v3 }
0x36da   :  { %v2639_v30 = vpop.f32.mrf.mxu0 }
0x36db   :  { %v2643_v0 = vadd.f32 %v2639_v30, %v5276_v25 }
0x36dc   :  { %v4566_v48 = vpop.f32.mrf.mxu0 }
0x36dd   :  { %4853 = vtanh.f32 %v2643_v0  ;;  %v4019_v56 = vmul.f32 -1.442695, %v2643_v0 }
0x36df   :  { %4855 = vpow2.f32 %v4019_v56 }
0x36ea   :  { %v4854_v13 = vpop.eup %4853 }
0x36eb   :  { %2653 = vrot.lane.b32.xlu0 %v4854_v13, %s4955_s7 }
0x36ec   :  { %v4856_v57 = vpop.eup %4855 }
0x36ed   :  { %v2647_v34 = vadd.f32 1.0, %v4856_v57 }
0x36ef   :  { %4857 = vrcp.f32 %v2647_v34 }
0x36fc   :  { %v4858_v36 = vpop.eup %4857 }
0x36fd   :  { %v2651_v40 = vmul.f32 %v4858_v36, %v2559_v5 }
0x375d   :  { %v2654_v7 = vpop.permute.xlu0 %2653 }
0x375e   :  { %v2656_v52 = vmul.f32 %v4858_v36, %v2654_v7 }
0x3760   :  { %2658 = vrot.lane.b32.xlu1 %v2656_v52, %s4956_s3 }
0x37d2   :  { %v2659_v45 = vpop.permute.xlu1 %2658 }
0x37d3   :  { %v2661_v49 = vadd.f32 %v2659_v45, %v2651_v40 }
0x37d5   :  { %4859 = vtanh.f32 %v2661_v49 }
0x37e2   :  { %v4860_v25 = vpop.eup %4859 }
0x37e3   :  { %2664 = vrot.lane.b32.xlu0 %v4860_v25, %s4955_s7 }
0x3855   :  { %v2665_v2 = vpop.permute.xlu0 %2664 }
0x3856   :  { %v2667_v9 = vmul.f32 %v4858_v36, %v2665_v2 }
0x3858   :  { %2669 = vrot.lane.b32.xlu1 %v2667_v9, %s4956_s3 }
0x38ca   :  { %v2670_v55 = vpop.permute.xlu1 %2669 }
0x38cb   :  { %2672 = vst.msk [vmem:[#allocation4 + $0x18] sm:$0xff] %vm513_vm2, %v2670_v55  ;;  %4576 = vmatmul.mubr.msk.f32.vlgmr.msra.gmra.mxu1 %vm513_vm2, %v2670_v55 }
0x38cc   :  { %4590 = vmatpush3.msra.mxu1 %v5410_v54  ;;  %4597 = vmatprep.mubr.msk.f32.mxu1 %vm4954_vm1, %v4953_v3 }
0x38cd   :  { %4591 = vmatprep.subr.mxu1 %v4953_v3 }
0x38ce   :  { %4592 = vmatpush3.msra.mxu1 %v5415_v15 }
0x38cf   :  { %4593 = vmatprep.subr.mxu1 %v4953_v3 }
0x38d0   :  { %4594 = vmatpush3.msra.mxu1 %v5423_v1 }
0x38d1   :  { %4595 = vmatprep.subr.mxu1 %v4953_v3 }
0x38d2   :  { %4596 = vmatpush3.msra.mxu1 %v5432_v4 }
0x38d3   :  { %4611 = vmatprep.subr.mxu1 %v4953_v3 }
0x398b   :  { %v2742_v58 = vpop.f32.mrf.mxu1 }
0x398c   :  { %v2746_v54 = vadd.f32 %v2742_v58, %v5273_v23 }
0x398d   :  { %v4577_v62 = vpop.f32.mrf.mxu1 }
0x398e   :  { %4861 = vtanh.f32 %v2746_v54  ;;  %v4021_v21 = vmul.f32 -1.442695, %v2746_v54 }
0x3990   :  { %4863 = vpow2.f32 %v4021_v21 }
0x399b   :  { %v4862_v11 = vpop.eup %4861 }
0x399c   :  { %2756 = vrot.lane.b32.xlu0 %v4862_v11, %s4955_s7 }
0x399d   :  { %v4864_v15 = vpop.eup %4863 }
0x399e   :  { %v2750_v14 = vadd.f32 1.0, %v4864_v15 }
0x39a0   :  { %4865 = vrcp.f32 %v2750_v14 }
0x39ad   :  { %v4866_v1 = vpop.eup %4865 }
0x39ae   :  { %v2754_v4 = vmul.f32 %v4866_v1, %v2661_v49 }
0x3a0e   :  { %v2757_v59 = vpop.permute.xlu0 %2756 }
0x3a0f   :  { %v2759_v63 = vmul.f32 %v4866_v1, %v2757_v59 }
0x3a11   :  { %2761 = vrot.lane.b32.xlu1 %v2759_v63, %s4956_s3 }
0x3a83   :  { %v2762_v6 = vpop.permute.xlu1 %2761 }
0x3a84   :  { %v2764_v17 = vadd.f32 %v2762_v6, %v2754_v4 }
0x3a86   :  { %4867 = vtanh.f32 %v2764_v17 }
0x3a93   :  { %v4868_v23 = vpop.eup %4867 }
0x3a94   :  { %2767 = vrot.lane.b32.xlu0 %v4868_v23, %s4955_s7 }
0x3b06   :  { %v2768_v46 = vpop.permute.xlu0 %2767 }
0x3b07   :  { %v5700_v8 = vmul.f32 %v4866_v1, %v2768_v46 }
0x3b09   :  { %2777 = vrot.lane.b32.xlu1 %v5700_v8, %s4956_s3 }
0x3b7b   :  { %v2778_v12 = vpop.permute.xlu1 %2777 }
0x3b7c   :  { %4587 = vmatmul.mubr.msk.f32.vlgmr.msra.gmra.mxu0 %vm513_vm2, %v2778_v12 }
0x3b7d   :  { %4601 = vmatpush3.msra.mxu0 %v5708_v16  ;;  %4608 = vmatprep.mubr.msk.f32.mxu0 %vm4954_vm1, %v4953_v3 }
0x3b7e   :  { %4602 = vmatprep.subr.mxu0 %v4953_v3 }
0x3b7f   :  { %4603 = vmatpush3.msra.mxu0 %v5717_v41 }
0x3b80   :  { %4604 = vmatprep.subr.mxu0 %v4953_v3 }
0x3b81   :  { %4605 = vmatpush3.msra.mxu0 %v5724_v10 }
0x3b82   :  { %4606 = vmatprep.subr.mxu0 %v4953_v3 }
0x3b83   :  { %4607 = vmatpush3.msra.mxu0 %v5731_v44 }
0x3b84   :  { %4622 = vmatprep.subr.mxu0 %v4953_v3 }
0x3c3c   :  { %v2847_v20 = vpop.f32.mrf.mxu0 }
0x3c3d   :  { %v2851_v22 = vadd.f32 %v2847_v20, %v5282_v29 }
0x3c3e   :  { %v4588_v5 = vpop.f32.mrf.mxu0 }
0x3c3f   :  { %4869 = vtanh.f32 %v2851_v22  ;;  %v4023_v24 = vmul.f32 -1.442695, %v2851_v22 }
0x3c41   :  { %4871 = vpow2.f32 %v4023_v24 }
0x3c4c   :  { %v4870_v19 = vpop.eup %4869 }
0x3c4d   :  { %2861 = vrot.lane.b32.xlu0 %v4870_v19, %s4955_s7 }
0x3c4e   :  { %v4872_v28 = vpop.eup %4871 }
0x3c4f   :  { %v2855_v30 = vadd.f32 1.0, %v4872_v28 }
0x3c51   :  { %4873 = vrcp.f32 %v2855_v30 }
0x3c5e   :  { %v4874_v0 = vpop.eup %4873 }
0x3c5f   :  { %v2859_v56 = vmul.f32 %v4874_v0, %v2764_v17 }
0x3cbf   :  { %v2862_v48 = vpop.permute.xlu0 %2861 }
0x3cc0   :  { %v2864_v13 = vmul.f32 %v4874_v0, %v2862_v48 }
0x3cc2   :  { %2866 = vrot.lane.b32.xlu1 %v2864_v13, %s4956_s3 }
0x3d34   :  { %v2867_v57 = vpop.permute.xlu1 %2866 }
0x3d35   :  { %v2869_v34 = vadd.f32 %v2867_v57, %v2859_v56 }
0x3d37   :  { %4875 = vtanh.f32 %v2869_v34 }
0x3d44   :  { %v4876_v29 = vpop.eup %4875 }
0x3d45   :  { %2872 = vrot.lane.b32.xlu0 %v4876_v29, %s4955_s7 }
0x3db7   :  { %v2873_v36 = vpop.permute.xlu0 %2872 }
0x3db8   :  { %v5739_v7 = vmul.f32 %v4874_v0, %v2873_v36 }
0x3dba   :  { %2882 = vrot.lane.b32.xlu1 %v5739_v7, %s4956_s3 }
0x3e2c   :  { %v2883_v52 = vpop.permute.xlu1 %2882 }
0x3e2d   :  { %4598 = vmatmul.mubr.msk.f32.vlgmr.msra.gmra.mxu1 %vm513_vm2, %v2883_v52 }
0x3e2e   :  { %4612 = vmatpush3.msra.mxu1 %v5708_v16  ;;  %4619 = vmatprep.mubr.msk.f32.mxu1 %vm4954_vm1, %v4953_v3 }
0x3e2f   :  { %4613 = vmatprep.subr.mxu1 %v4953_v3 }
0x3e30   :  { %4614 = vmatpush3.msra.mxu1 %v5717_v41 }
0x3e31   :  { %4615 = vmatprep.subr.mxu1 %v4953_v3 }
0x3e32   :  { %4616 = vmatpush3.msra.mxu1 %v5724_v10 }
0x3e33   :  { %4617 = vmatprep.subr.mxu1 %v4953_v3 }
0x3e34   :  { %4618 = vmatpush3.msra.mxu1 %v5731_v44 }
0x3e35   :  { %4633 = vmatprep.subr.mxu1 %v4953_v3 }
0x3eed   :  { %v2952_v40 = vpop.f32.mrf.mxu1 }
0x3eee   :  { %v2956_v45 = vadd.f32 %v2952_v40, %v5279_v27 }
0x3eef   :  { %v4599_v49 = vpop.f32.mrf.mxu1 }
0x3ef0   :  { %4877 = vtanh.f32 %v2956_v45  ;;  %v4025_v2 = vmul.f32 -1.442695, %v2956_v45 }
0x3ef2   :  { %4879 = vpow2.f32 %v4025_v2 }
0x3efd   :  { %v4878_v25 = vpop.eup %4877 }
0x3efe   :  { %2966 = vrot.lane.b32.xlu0 %v4878_v25, %s4955_s7 }
0x3eff   :  { %v4880_v9 = vpop.eup %4879 }
0x3f00   :  { %v2960_v55 = vadd.f32 1.0, %v4880_v9 }
0x3f02   :  { %4881 = vrcp.f32 %v2960_v55 }
0x3f0f   :  { %v4882_v58 = vpop.eup %4881 }
0x3f10   :  { %v2964_v11 = vmul.f32 %v4882_v58, %v2869_v34 }
0x3f70   :  { %v2967_v54 = vpop.permute.xlu0 %2966 }
0x3f71   :  { %v2969_v62 = vmul.f32 %v4882_v58, %v2967_v54 }
0x3f73   :  { %2971 = vrot.lane.b32.xlu1 %v2969_v62, %s4956_s3 }
0x3fe5   :  { %v2972_v21 = vpop.permute.xlu1 %2971 }
0x3fe6   :  { %v2974_v15 = vadd.f32 %v2972_v21, %v2964_v11 }
0x3fe8   :  { %4883 = vtanh.f32 %v2974_v15 }
0x3ff5   :  { %v4884_v27 = vpop.eup %4883 }
0x3ff6   :  { %2977 = vrot.lane.b32.xlu0 %v4884_v27, %s4955_s7 }
0x4068   :  { %v2978_v14 = vpop.permute.xlu0 %2977 }
0x4069   :  { %v5758_v1 = vmul.f32 %v4882_v58, %v2978_v14 }
0x406b   :  { %2984 = vrot.lane.b32.xlu1 %v5758_v1, %s4956_s3 }
0x40dd   :  { %v2985_v59 = vpop.permute.xlu1 %2984 }
0x40de   :  { %4609 = vmatmul.mubr.msk.f32.vlgmr.msra.gmra.mxu0 %vm513_vm2, %v2985_v59 }
0x40df   :  { %4623 = vmatpush3.msra.mxu0 %v5708_v16  ;;  %4630 = vmatprep.mubr.msk.f32.mxu0 %vm4954_vm1, %v4953_v3 }
0x40e0   :  { %4624 = vmatprep.subr.mxu0 %v4953_v3 }
0x40e1   :  { %4625 = vmatpush3.msra.mxu0 %v5717_v41 }
0x40e2   :  { %4626 = vmatprep.subr.mxu0 %v4953_v3 }
0x40e3   :  { %4627 = vmatpush3.msra.mxu0 %v5724_v10 }
0x40e4   :  { %4628 = vmatprep.subr.mxu0 %v4953_v3 }
0x40e5   :  { %4629 = vmatpush3.msra.mxu0 %v5731_v44 }
0x40e6   :  { %4644 = vmatprep.subr.mxu0 %v4953_v3 }
0x419e   :  { %v3054_v63 = vpop.f32.mrf.mxu0 }
0x419f   :  { %v3058_v4 = vadd.f32 %v3054_v63, %v5288_v33 }
0x41a0   :  { %v4610_v6 = vpop.f32.mrf.mxu0 }
0x41a1   :  { %4885 = vtanh.f32 %v3058_v4  ;;  %v4027_v23 = vmul.f32 -1.442695, %v3058_v4 }
0x41a3   :  { %4887 = vpow2.f32 %v4027_v23 }
0x41ae   :  { %v4886_v17 = vpop.eup %4885 }
0x41af   :  { %3068 = vrot.lane.b32.xlu0 %v4886_v17, %s4955_s7 }
0x41b0   :  { %v4888_v46 = vpop.eup %4887 }
0x41b1   :  { %v3062_v12 = vadd.f32 1.0, %v4888_v46 }
0x41b3   :  { %4889 = vrcp.f32 %v3062_v12 }
0x41c0   :  { %v4890_v20 = vpop.eup %4889 }
0x41c1   :  { %v3066_v19 = vmul.f32 %v4890_v20, %v2974_v15 }
0x4221   :  { %v3069_v22 = vpop.permute.xlu0 %3068 }
0x4222   :  { %v3071_v5 = vmul.f32 %v4890_v20, %v3069_v22 }
0x4224   :  { %3073 = vrot.lane.b32.xlu1 %v3071_v5, %s4956_s3 }
0x4296   :  { %v3074_v24 = vpop.permute.xlu1 %3073 }
0x4297   :  { %v3076_v28 = vadd.f32 %v3074_v24, %v3066_v19 }
0x4299   :  { %4891 = vtanh.f32 %v3076_v28 }
0x42a6   :  { %v4892_v33 = vpop.eup %4891 }
0x42a7   :  { %3079 = vrot.lane.b32.xlu0 %v4892_v33, %s4955_s7 }
0x4319   :  { %v3080_v30 = vpop.permute.xlu0 %3079 }
0x431a   :  { %v3082_v0 = vmul.f32 %v4890_v20, %v3080_v30 }
0x431c   :  { %3084 = vrot.lane.b32.xlu1 %v3082_v0, %s4956_s3 }
0x438e   :  { %v3085_v48 = vpop.permute.xlu1 %3084 }
0x438f   :  { %3087 = vst.msk [vmem:[#allocation4 + $0x20] sm:$0xff] %vm513_vm2, %v3085_v48  ;;  %4620 = vmatmul.mubr.msk.f32.vlgmr.msra.gmra.mxu1 %vm513_vm2, %v3085_v48 }
0x4390   :  { %4634 = vmatpush3.msra.mxu1 %v5708_v16  ;;  %4641 = vmatprep.mubr.msk.f32.mxu1 %vm4954_vm1, %v4953_v3 }
0x4391   :  { %4635 = vmatprep.subr.mxu1 %v4953_v3 }
0x4392   :  { %4636 = vmatpush3.msra.mxu1 %v5717_v41 }
0x4393   :  { %4637 = vmatprep.subr.mxu1 %v4953_v3 }
0x4394   :  { %4638 = vmatpush3.msra.mxu1 %v5724_v10 }
0x4395   :  { %4639 = vmatprep.subr.mxu1 %v4953_v3 }
0x4396   :  { %4640 = vmatpush3.msra.mxu1 %v5731_v44 }
0x4397   :  { %4655 = vmatprep.subr.mxu1 %v4953_v3 }
0x444f   :  { %v3157_v13 = vpop.f32.mrf.mxu1 }
0x4450   :  { %v3161_v56 = vadd.f32 %v3157_v13, %v5285_v31 }
0x4451   :  { %v4621_v57 = vpop.f32.mrf.mxu1 }
0x4452   :  { %4893 = vtanh.f32 %v3161_v56  ;;  %v4029_v29 = vmul.f32 -1.442695, %v3161_v56 }
0x4454   :  { %4895 = vpow2.f32 %v4029_v29 }
0x445f   :  { %v4894_v34 = vpop.eup %4893 }
0x4460   :  { %3171 = vrot.lane.b32.xlu0 %v4894_v34, %s4955_s7 }
0x4461   :  { %v4896_v36 = vpop.eup %4895 }
0x4462   :  { %v3165_v52 = vadd.f32 1.0, %v4896_v36 }
0x4464   :  { %4897 = vrcp.f32 %v3165_v52 }
0x4471   :  { %v4898_v40 = vpop.eup %4897 }
0x4472   :  { %v3169_v25 = vmul.f32 %v4898_v40, %v3076_v28 }
0x44d2   :  { %v3172_v45 = vpop.permute.xlu0 %3171 }
0x44d3   :  { %v3174_v49 = vmul.f32 %v4898_v40, %v3172_v45 }
0x44d5   :  { %3176 = vrot.lane.b32.xlu1 %v3174_v49, %s4956_s3 }
0x4547   :  { %v3177_v2 = vpop.permute.xlu1 %3176 }
0x4548   :  { %v3179_v9 = vadd.f32 %v3177_v2, %v3169_v25 }
0x454a   :  { %4899 = vtanh.f32 %v3179_v9 }
0x4557   :  { %v4900_v31 = vpop.eup %4899 }
0x4558   :  { %3182 = vrot.lane.b32.xlu0 %v4900_v31, %s4955_s7 }
0x45ca   :  { %v3183_v55 = vpop.permute.xlu0 %3182 }
0x45cb   :  { %v5794_v58 = vmul.f32 %v4898_v40, %v3183_v55 }
0x45cd   :  { %3192 = vrot.lane.b32.xlu1 %v5794_v58, %s4956_s3 }
0x463f   :  { %v3193_v54 = vpop.permute.xlu1 %3192 }
0x4640   :  { %4631 = vmatmul.mubr.msk.f32.vlgmr.msra.gmra.mxu0 %vm513_vm2, %v3193_v54 }
0x4641   :  { %4645 = vmatpush3.msra.mxu0 %v5708_v16  ;;  %4652 = vmatprep.mubr.msk.f32.mxu0 %vm4954_vm1, %v4953_v3 }
0x4642   :  { %4646 = vmatprep.subr.mxu0 %v4953_v3 }
0x4643   :  { %4647 = vmatpush3.msra.mxu0 %v5717_v41 }
0x4644   :  { %4648 = vmatprep.subr.mxu0 %v4953_v3 }
0x4645   :  { %4649 = vmatpush3.msra.mxu0 %v5724_v10 }
0x4646   :  { %4650 = vmatprep.subr.mxu0 %v4953_v3 }
0x4647   :  { %4651 = vmatpush3.msra.mxu0 %v5731_v44 }
0x4648   :  { %4666 = vmatprep.subr.mxu0 %v4953_v3 }
0x4700   :  { %v3262_v62 = vpop.f32.mrf.mxu0 }
0x4701   :  { %v3266_v11 = vadd.f32 %v3262_v62, %v5294_v37 }
0x4702   :  { %v4632_v21 = vpop.f32.mrf.mxu0 }
0x4703   :  { %4901 = vtanh.f32 %v3266_v11  ;;  %v4031_v27 = vmul.f32 -1.442695, %v3266_v11 }
0x4705   :  { %4903 = vpow2.f32 %v4031_v27 }
0x4710   :  { %v4902_v15 = vpop.eup %4901 }
0x4711   :  { %3276 = vrot.lane.b32.xlu0 %v4902_v15, %s4955_s7 }
0x4712   :  { %v4904_v14 = vpop.eup %4903 }
0x4713   :  { %v3270_v59 = vadd.f32 1.0, %v4904_v14 }
0x4715   :  { %4905 = vrcp.f32 %v3270_v59 }
0x4722   :  { %v4906_v63 = vpop.eup %4905 }
0x4723   :  { %v3274_v17 = vmul.f32 %v4906_v63, %v3179_v9 }
0x4783   :  { %v3277_v4 = vpop.permute.xlu0 %3276 }
0x4784   :  { %v3279_v6 = vmul.f32 %v4906_v63, %v3277_v4 }
0x4786   :  { %3281 = vrot.lane.b32.xlu1 %v3279_v6, %s4956_s3 }
0x47f8   :  { %v3282_v23 = vpop.permute.xlu1 %3281 }
0x47f9   :  { %v3284_v46 = vadd.f32 %v3282_v23, %v3274_v17 }
0x47fb   :  { %4907 = vtanh.f32 %v3284_v46 }
0x4808   :  { %v4908_v37 = vpop.eup %4907 }
0x4809   :  { %3287 = vrot.lane.b32.xlu0 %v4908_v37, %s4955_s7 }
0x487b   :  { %v3288_v12 = vpop.permute.xlu0 %3287 }
0x487c   :  { %v5813_v20 = vmul.f32 %v4906_v63, %v3288_v12 }
0x487e   :  { %3297 = vrot.lane.b32.xlu1 %v5813_v20, %s4956_s3 }
0x48f0   :  { %v3298_v22 = vpop.permute.xlu1 %3297 }
0x48f1   :  { %4642 = vmatmul.mubr.msk.f32.vlgmr.msra.gmra.mxu1 %vm513_vm2, %v3298_v22 }
0x48f2   :  { %4656 = vmatpush3.msra.mxu1 %v5708_v16  ;;  %4663 = vmatprep.mubr.msk.f32.mxu1 %vm4954_vm1, %v4953_v3 }
0x48f3   :  { %4657 = vmatprep.subr.mxu1 %v4953_v3 }
0x48f4   :  { %4658 = vmatpush3.msra.mxu1 %v5717_v41 }
0x48f5   :  { %4659 = vmatprep.subr.mxu1 %v4953_v3 }
0x48f6   :  { %4660 = vmatpush3.msra.mxu1 %v5724_v10 }
0x48f7   :  { %4661 = vmatprep.subr.mxu1 %v4953_v3 }
0x48f8   :  { %4662 = vmatpush3.msra.mxu1 %v5731_v44 }
0x48f9   :  { %4677 = vmatprep.subr.mxu1 %v4953_v3 }
0x49b1   :  { %v3367_v5 = vpop.f32.mrf.mxu1 }
0x49b2   :  { %v3371_v19 = vadd.f32 %v3367_v5, %v5291_v35 }
0x49b3   :  { %v4643_v24 = vpop.f32.mrf.mxu1 }
0x49b4   :  { %4909 = vtanh.f32 %v3371_v19  ;;  %v4033_v33 = vmul.f32 -1.442695, %v3371_v19 }
0x49b6   :  { %4911 = vpow2.f32 %v4033_v33 }
0x49c1   :  { %v4910_v28 = vpop.eup %4909 }
0x49c2   :  { %3381 = vrot.lane.b32.xlu0 %v4910_v28, %s4955_s7 }
0x49c3   :  { %v4912_v30 = vpop.eup %4911 }
0x49c4   :  { %v3375_v0 = vadd.f32 1.0, %v4912_v30 }
0x49c6   :  { %4913 = vrcp.f32 %v3375_v0 }
0x49d3   :  { %v4914_v48 = vpop.eup %4913 }
0x49d4   :  { %v3379_v57 = vmul.f32 %v4914_v48, %v3284_v46 }
0x4a34   :  { %v3382_v13 = vpop.permute.xlu0 %3381 }
0x4a35   :  { %v3384_v56 = vmul.f32 %v4914_v48, %v3382_v13 }
0x4a37   :  { %3386 = vrot.lane.b32.xlu1 %v3384_v56, %s4956_s3 }
0x4aa9   :  { %v3387_v34 = vpop.permute.xlu1 %3386 }
0x4aaa   :  { %v3389_v29 = vadd.f32 %v3387_v34, %v3379_v57 }
0x4aac   :  { %4915 = vtanh.f32 %v3389_v29 }
0x4ab9   :  { %v4916_v35 = vpop.eup %4915 }
0x4aba   :  { %3392 = vrot.lane.b32.xlu0 %v4916_v35, %s4955_s7 }
0x4b2c   :  { %v3393_v36 = vpop.permute.xlu0 %3392 }
0x4b2d   :  { %v5832_v52 = vmul.f32 %v4914_v48, %v3393_v36 }
0x4b2f   :  { %3399 = vrot.lane.b32.xlu1 %v5832_v52, %s4956_s3 }
0x4ba1   :  { %v3400_v40 = vpop.permute.xlu1 %3399 }
0x4ba2   :  { %4653 = vmatmul.mubr.msk.f32.vlgmr.msra.gmra.mxu0 %vm513_vm2, %v3400_v40 }
0x4ba3   :  { %4667 = vmatpush3.msra.mxu0 %v5708_v16  ;;  %4674 = vmatprep.mubr.msk.f32.mxu0 %vm4954_vm1, %v4953_v3 }
0x4ba4   :  { %4668 = vmatprep.subr.mxu0 %v4953_v3 }
0x4ba5   :  { %4669 = vmatpush3.msra.mxu0 %v5717_v41 }
0x4ba6   :  { %4670 = vmatprep.subr.mxu0 %v4953_v3 }
0x4ba7   :  { %4671 = vmatpush3.msra.mxu0 %v5724_v10 }
0x4ba8   :  { %4672 = vmatprep.subr.mxu0 %v4953_v3 }
0x4ba9   :  { %4673 = vmatpush3.msra.mxu0 %v5731_v44 }
0x4c62   :  { %v3469_v45 = vpop.f32.mrf.mxu0 }
0x4c63   :  { %v3473_v49 = vadd.f32 %v3469_v45, %v5300_v42 }
0x4c64   :  { %v4654_v25 = vpop.f32.mrf.mxu0 }
0x4c65   :  { %4917 = vtanh.f32 %v3473_v49  ;;  %v4035_v9 = vmul.f32 -1.442695, %v3473_v49 }
0x4c67   :  { %4919 = vpow2.f32 %v4035_v9 }
0x4c72   :  { %v4918_v2 = vpop.eup %4917 }
0x4c73   :  { %3483 = vrot.lane.b32.xlu0 %v4918_v2, %s4955_s7 }
0x4c74   :  { %v4920_v31 = vpop.eup %4919 }
0x4c75   :  { %v3477_v55 = vadd.f32 1.0, %v4920_v31 }
0x4c77   :  { %4921 = vrcp.f32 %v3477_v55 }
0x4c84   :  { %v4922_v54 = vpop.eup %4921 }
0x4c85   :  { %v3481_v21 = vmul.f32 %v4922_v54, %v3389_v29 }
0x4ce5   :  { %v3484_v62 = vpop.permute.xlu0 %3483 }
0x4ce6   :  { %v3486_v11 = vmul.f32 %v4922_v54, %v3484_v62  ;;  %v3846_v62 = vld [vmem:[%s6052_s8 + $0xe0] sm:$0xff] }
0x4ce8   :  { %3488 = vrot.lane.b32.xlu1 %v3486_v11, %s4956_s3  ;;  %v3830_v11 = vld [vmem:[%s6052_s8 + $0x60] sm:$0xff] }
0x4d5a   :  { %v3489_v15 = vpop.permute.xlu1 %3488 }
0x4d5b   :  { %v3491_v27 = vadd.f32 %v3489_v15, %v3481_v21  ;;  %v3845_v21 = vld [vmem:[%s6052_s8 + $0xd8] sm:$0xff] }
0x4d5c   :  { %v3829_v15 = vld [vmem:[%s6052_s8 + $0x58] sm:$0xff] }
0x4d5d   :  { %4923 = vtanh.f32 %v3491_v27 }
0x4d6a   :  { %v4924_v42 = vpop.eup %4923 }
0x4d6b   :  { %3494 = vrot.lane.b32.xlu0 %v4924_v42, %s4955_s7  ;;  %v3828_v42 = vld [vmem:[%s6052_s8 + $0x50] sm:$0xff] }
0x4ddd   :  { %v3495_v14 = vpop.permute.xlu0 %3494 }
0x4dde   :  { %v3497_v59 = vmul.f32 %v4922_v54, %v3495_v14  ;;  %v3833_v54 = vld [vmem:[%s6052_s8 + $0x78] sm:$0xff]  ;;  %v3827_v14 = vld [vmem:[%s6052_s8 + $0x48] sm:$0xff] }
0x4de0   :  { %3499 = vrot.lane.b32.xlu1 %v3497_v59, %s4956_s3  ;;  %v3842_v59 = vld [vmem:[%s6052_s8 + $0xc0] sm:$0xff] }
0x4e52   :  { %v3500_v63 = vpop.permute.xlu1 %3499 }
0x4e53   :  { %3502 = vst.msk [vmem:[#allocation4 + $0x28] sm:$0xff] %vm513_vm2, %v3500_v63  ;;  %4664 = vmatmul.mubr.msk.f32.vlgmr.msra.gmra.mxu1 %vm513_vm2, %v3500_v63 }
0x4e54   :  { %4678 = vmatpush3.msra.mxu1 %v5708_v16  ;;  %4685 = vmatprep.mubr.msk.f32.mxu1 %vm4954_vm1, %v4953_v3 }
0x4e55   :  { %4679 = vmatprep.subr.mxu1 %v4953_v3 }
0x4e56   :  { %4680 = vmatpush3.msra.mxu1 %v5717_v41 }
0x4e57   :  { %4681 = vmatprep.subr.mxu1 %v4953_v3 }
0x4e58   :  { %4682 = vmatpush3.msra.mxu1 %v5724_v10 }
0x4e59   :  { %4683 = vmatprep.subr.mxu1 %v4953_v3 }
0x4e5a   :  { %4684 = vmatpush3.msra.mxu1 %v5731_v44 }
0x4f13   :  { %v3572_v4 = vpop.f32.mrf.mxu1 }
0x4f14   :  { %v3576_v6 = vadd.f32 %v3572_v4, %v5297_v39 }
0x4f15   :  { %v4665_v17 = vpop.f32.mrf.mxu1 }
0x4f16   :  { %4925 = vtanh.f32 %v3576_v6  ;;  %v4037_v23 = vmul.f32 -1.442695, %v3576_v6  ;;  %v3841_v17 = vld [vmem:[%s6052_s8 + $0xb8] sm:$0xff] }
0x4f18   :  { %4927 = vpow2.f32 %v4037_v23  ;;  %v3840_v23 = vld [vmem:[%s6052_s8 + $0xb0] sm:$0xff] }
0x4f23   :  { %v4926_v16 = vpop.eup %4925 }
0x4f24   :  { %3586 = vrot.lane.b32.xlu0 %v4926_v16, %s4955_s7  ;;  %v3825_v16 = vld [vmem:[%s6052_s8 + $0x38] sm:$0xff] }
0x4f25   :  { %v4928_v46 = vpop.eup %4927 }
0x4f26   :  { %v3580_v41 = vadd.f32 1.0, %v4928_v46  ;;  %v3824_v46 = vld [vmem:[%s6052_s8 + $0x30] sm:$0xff] }
0x4f28   :  { %4929 = vrcp.f32 %v3580_v41  ;;  %v3839_v41 = vld [vmem:[%s6052_s8 + $0xa8] sm:$0xff] }
0x4f35   :  { %v4930_v37 = vpop.eup %4929 }
0x4f36   :  { %v3584_v3 = vmul.f32 %v4930_v37, %v3491_v27  ;;  %v3844_v27 = vld [vmem:[%s6052_s8 + $0xd0] sm:$0xff] }
0x4f96   :  { %v3587_v12 = vpop.permute.xlu0 %3586 }
0x4f97   :  { %v3589_v10 = vmul.f32 %v4930_v37, %v3587_v12  ;;  %v3838_v12 = vld [vmem:[%s6052_s8 + $0xa0] sm:$0xff] }
0x4f99   :  { %3591 = vrot.lane.b32.xlu1 %v3589_v10, %s4956_s3  ;;  %v3822_v10 = vld [vmem:[%s6052_s8 + $0x20] sm:$0xff] }
0x500b   :  { %v3592_v44 = vpop.permute.xlu1 %3591 }
0x500c   :  { %v3594_v22 = vadd.f32 %v3592_v44, %v3584_v3  ;;  %v3837_v3 = vld [vmem:[%s6052_s8 + $0x98] sm:$0xff] }
0x500d   :  { %v3821_v44 = vld [vmem:[%s6052_s8 + $0x18] sm:$0xff] }
0x500e   :  { %4931 = vtanh.f32 %v3594_v22 }
0x501b   :  { %v4932_v39 = vpop.eup %4931 }
0x501c   :  { %3597 = vrot.lane.b32.xlu0 %v4932_v39, %s4955_s7 }
0x508e   :  { %v3598_v5 = vpop.permute.xlu0 %3597 }
0x508f   :  { %v3600_v19 = vmul.f32 %v4930_v37, %v3598_v5  ;;  %v3823_v37 = vld [vmem:[%s6052_s8 + $0x28] sm:$0xff] }
0x5091   :  { %3607 = vrot.lane.b32.xlu1 %v3600_v19, %s4956_s3 }
0x5103   :  { %v3608_v24 = vpop.permute.xlu1 %3607 }
0x5104   :  { %4675 = vmatmul.mubr.msk.f32.vlgmr.msra.gmra.mxu0 %vm513_vm2, %v3608_v24  ;;  %v3820_v24 = vld [vmem:[%s6052_s8 + $0x10] sm:$0xff] }
0x51c4   :  { %v3677_v28 = vpop.f32.mrf.mxu0 }
0x51c5   :  { %v3681_v33 = vadd.f32 %v3677_v28, %v5307_v53  ;;  %v3835_v28 = vld [vmem:[%s6052_s8 + $0x88] sm:$0xff] }
0x51c6   :  { %v4676_v30 = vpop.f32.mrf.mxu0 }
0x51c7   :  { %4933 = vtanh.f32 %v3681_v33  ;;  %v4039_v48 = vmul.f32 -1.442695, %v3681_v33  ;;  %v3819_v33 = vld [vmem:[%s6052_s8 + $0x8] sm:$0xff]  ;;  %v3834_v30 = vld [vmem:[%s6052_s8 + $0x80] sm:$0xff] }
0x51c9   :  { %4935 = vpow2.f32 %v4039_v48  ;;  %v3818_v48 = vld [vmem:[%s6052_s8] sm:$0xff] }
0x51d4   :  { %v4934_v0 = vpop.eup %4933 }
0x51d5   :  { %3691 = vrot.lane.b32.xlu0 %v4934_v0, %s4955_s7 }
0x51d6   :  { %v4936_v13 = vpop.eup %4935 }
0x51d7   :  { %v3685_v56 = vadd.f32 1.0, %v4936_v13 }
0x51d9   :  { %4937 = vrcp.f32 %v3685_v56 }
0x51e6   :  { %v4938_v57 = vpop.eup %4937 }
0x51e7   :  { %v3689_v35 = vmul.f32 %v4938_v57, %v3594_v22  ;;  %v3836_v22 = vld [vmem:[%s6052_s8 + $0x90] sm:$0xff] }
0x5247   :  { %v3692_v34 = vpop.permute.xlu0 %3691 }
0x5248   :  { %v3694_v29 = vmul.f32 %v4938_v57, %v3692_v34 }
0x524a   :  { %3696 = vrot.lane.b32.xlu1 %v3694_v29, %s4956_s3 }
0x52bc   :  { %v3697_v36 = vpop.permute.xlu1 %3696 }
0x52bd   :  { %v5871_v40 = vadd.f32 %v3697_v36, %v3689_v35 }
0x52bf   :  { %4939 = vtanh.f32 %v5871_v40 }
0x52cc   :  { %v4940_v53 = vpop.eup %4939 }
0x52cd   :  { %3702 = vrot.lane.b32.xlu0 %v4940_v53, %s4955_s7 }
0x533f   :  { %v3703_v45 = vpop.permute.xlu0 %3702 }
0x5340   :  { %v5875_v49 = vmul.f32 %v4938_v57, %v3703_v45 }
0x5342   :  { %3712 = vrot.lane.b32.xlu1 %v5875_v49, %s4956_s3 }
0x53b4   :  { %v3713_v25 = vpop.permute.xlu1 %3712 }
0x53b5   :  { %4686 = vmatmul.mubr.msk.f32.vlgmr.msra.gmra.mxu1 %vm513_vm2, %v3713_v25 }
0x5475   :  { %v3782_v2 = vpop.f32.mrf.mxu1 }
0x5476   :  { %v3786_v9 = vadd.f32 %v3782_v2, %v5303_v47  ;;  %v3849_v47 = vld [vmem:[%s6052_s8 + $0xf8] sm:$0xff] }
0x5477   :  { %v4687_v31 = vpop.f32.mrf.mxu1  ;;  %4239 = vmatprep.subr.mxu0 %v3849_v47  ;;  %v4042_v47 = vld [vmem:[%s6053_s9] ss:$0 sm:$0xff] }
0x5478   :  { %4941 = vtanh.f32 %v3786_v9  ;;  %4240 = vmatpush3.msra.mxu0 %v3833_v54  ;;  %v4041_v63 = vmul.f32 -1.442695, %v3786_v9 }
0x547a   :  { %4943 = vpow2.f32 %v4041_v63 }
0x5485   :  { %v4942_v55 = vpop.eup %4941 }
0x5486   :  { %3796 = vrot.lane.b32.xlu0 %v4942_v55, %s4955_s7 }
0x5487   :  { %v4944_v4 = vpop.eup %4943 }
0x5488   :  { %v3790_v6 = vadd.f32 1.0, %v4944_v4 }
0x548a   :  { %1942 = vrot.lane.b32.xlu0 %v5552_v51, %s4955_s7  ;;  %v3848_v51 = vld [vmem:[%s6052_s8 + $0xf0] sm:$0xff]  ;;  %4945 = vrcp.f32 %v3790_v6 }
0x548b   :  { %4241 = vmatprep.subr.mxu0 %v3848_v51 }
0x548e   :  { %2047 = vrot.lane.b32.xlu0 %v5571_v18, %s4957_s6  ;;  %v3832_v18 = vld [vmem:[%s6052_s8 + $0x70] sm:$0xff] }
0x548f   :  { %4242 = vmatpush3.msra.mxu0 %v3832_v18 }
0x5492   :  { %2772 = vrot.lane.b32.xlu0 %v5700_v8, %s4955_s7  ;;  %v3847_v8 = vld [vmem:[%s6052_s8 + $0xe8] sm:$0xff] }
0x5493   :  { %4243 = vmatprep.subr.mxu0 %v3847_v8 }
0x5496   :  { %2877 = vrot.lane.b32.xlu0 %v5739_v7, %s4957_s6  ;;  %v3831_v7 = vld [vmem:[%s6052_s8 + $0x68] sm:$0xff] }
0x5497   :  { %4244 = vmatpush3.msra.mxu0 %v3831_v7  ;;  %v5976_v39 = vpop.eup %4945 }
0x5498   :  { %4245 = vmatprep.subr.mxu0 %v3846_v62 }
0x5499   :  { %4246 = vmatpush3.msra.mxu0 %v3830_v11 }
0x549a   :  { %3602 = vrot.lane.b32.xlu0 %v3600_v19, %s4955_s7  ;;  %4247 = vmatprep.subr.mxu0 %v3845_v21 }
0x549b   :  { %4248 = vmatpush3.msra.mxu0 %v3829_v15 }
0x549c   :  { %4249 = vmatprep.subr.mxu0 %v3844_v27 }
0x549d   :  { %4250 = vmatpush3.msra.mxu0 %v3828_v42 }
0x549e   :  { %3187 = vrot.lane.b32.xlu0 %v5794_v58, %s4955_s7  ;;  %v3843_v58 = vld [vmem:[%s6052_s8 + $0xc8] sm:$0xff] }
0x549f   :  { %4251 = vmatprep.subr.mxu0 %v3843_v58 }
0x54a0   :  { %4252 = vmatpush3.msra.mxu0 %v3827_v14 }
0x54a1   :  { %4253 = vmatprep.subr.mxu0 %v3842_v59 }
0x54a2   :  { %3292 = vrot.lane.b32.xlu0 %v5813_v20, %s4957_s6  ;;  %v3826_v20 = vld [vmem:[%s6052_s8 + $0x40] sm:$0xff] }
0x54a3   :  { %4254 = vmatpush3.msra.mxu0 %v3826_v20 }
0x54a4   :  { %4255 = vmatprep.subr.mxu0 %v3841_v17 }
0x54a5   :  { %4256 = vmatpush3.msra.mxu0 %v3825_v16 }
0x54a6   :  { %4257 = vmatprep.subr.mxu0 %v3840_v23 }
0x54a7   :  { %4258 = vmatpush3.msra.mxu0 %v3824_v46 }
0x54a8   :  { %4259 = vmatprep.subr.mxu0 %v3839_v41 }
0x54a9   :  { %4260 = vmatpush3.msra.mxu0 %v3823_v37 }
0x54aa   :  { %4261 = vmatprep.subr.mxu0 %v3838_v12 }
0x54ab   :  { %4262 = vmatpush3.msra.mxu0 %v3822_v10 }
0x54ac   :  { %4263 = vmatprep.subr.mxu0 %v3837_v3 }
0x54ad   :  { %4264 = vmatpush3.msra.mxu0 %v3821_v44 }
0x54ae   :  { %4265 = vmatprep.subr.mxu0 %v3836_v22 }
0x54af   :  { %4266 = vmatpush3.msra.mxu0 %v3820_v24 }
0x54b0   :  { %4267 = vmatprep.subr.mxu0 %v3835_v28 }
0x54b1   :  { %4268 = vmatpush3.msra.mxu0 %v3819_v33 }
0x54b2   :  { %4269 = vmatprep.subr.mxu0 %v3834_v30 }
0x54b3   :  { %4270 = vmatpush3.msra.mxu0 %v3818_v48 }
0x54f8   :  { %v3797_v5 = vpop.permute.xlu0 %3796 }
0x54f9   :  { %v3799_v19 = vmul.f32 %v5976_v39, %v3797_v5 }
0x54fb   :  { %3801 = vrot.lane.b32.xlu1 %v3799_v19, %s4956_s3 }
0x54fc   :  { %v1943_v0 = vpop.permute.xlu0 %1942 }
0x54fd   :  { %1945 = vst.msk [vmem:[#allocation4 + $0x8] sm:$0xff] %vm1527_vm3, %v1943_v0 }
0x54ff   :  { %1524 = vrot.lane.b32.xlu1 %v5478_v50, %s4955_s7 }
0x5500   :  { %v2048_v13 = vpop.permute.xlu0 %2047 }
0x5501   :  { %2050 = vst.msk [vmem:[#allocation4 + $0x8] sm:$0xff] %vm1633_vm4, %v2048_v13 }
0x5502   :  { %2151 = vst.msk [vmem:[#allocation4 + $0x8] sm:$0xff] %vm1735_vm5, %v5590_v38 }
0x5503   :  { %1630 = vrot.lane.b32.xlu1 %v5497_v32, %s4957_s6 }
0x5504   :  { %v2773_v56 = vpop.permute.xlu0 %2772 }
0x5505   :  { %2775 = vst.msk [vmem:[#allocation4 + $0x18] sm:$0xff] %vm1527_vm3, %v2773_v56 }
0x5507   :  { %2357 = vrot.lane.b32.xlu1 %v5626_v60, %s4955_s7  ;;  %v3794_v60 = vmul.f32 %v5976_v39, %v5871_v40 }
0x5508   :  { %v2878_v57 = vpop.permute.xlu0 %2877 }
0x5509   :  { %2880 = vst.msk [vmem:[#allocation4 + $0x18] sm:$0xff] %vm1633_vm4, %v2878_v57  ;;  %v3813_v50 = vld [vmem:[#allocation4 + $0x8] sm:$0xff] }
0x550a   :  { %2981 = vst.msk [vmem:[#allocation4 + $0x18] sm:$0xff] %vm1735_vm5, %v5758_v1  ;;  %3921 = vmatprep.mubr.f32.mxu0 %v3813_v50 }
0x550b   :  { %2462 = vrot.lane.b32.xlu1 %v5645_v43, %s4957_s6 }
0x550c   :  { %v3603_v38 = vpop.permute.xlu0 %3602 }
0x550d   :  { %3605 = vst.msk [vmem:[#allocation4 + $0x28] sm:$0xff] %vm1527_vm3, %v3603_v38 }
0x5510   :  { %v3188_v32 = vpop.permute.xlu0 %3187 }
0x5511   :  { %3190 = vst.msk [vmem:[#allocation4 + $0x20] sm:$0xff] %vm1527_vm3, %v3188_v32  ;;  %v3815_v45 = vld [vmem:[#allocation4 + $0x18] sm:$0xff] }
0x5514   :  { %v3293_v34 = vpop.permute.xlu0 %3292 }
0x5515   :  { %3295 = vst.msk [vmem:[#allocation4 + $0x20] sm:$0xff] %vm1633_vm4, %v3293_v34 }
0x5516   :  { %3396 = vst.msk [vmem:[#allocation4 + $0x20] sm:$0xff] %vm1735_vm5, %v5832_v52 }
0x551d   :  { %v3816_v55 = vld [vmem:[#allocation4 + $0x20] sm:$0xff] }
0x556d   :  { %v3802_v1 = vpop.permute.xlu1 %3801 }
0x556e   :  { %v3804_v29 = vadd.f32 %v3802_v1, %v3794_v60 }
0x5570   :  { %4947 = vtanh.f32 %v3804_v29 }
0x5571   :  { %v1525_v35 = vpop.permute.xlu1 %1524 }
0x5572   :  { %1528 = vst.msk [vmem:[#allocation4] sm:$0xff] %vm1527_vm3, %v1525_v35 }
0x5575   :  { %v1631_v43 = vpop.permute.xlu1 %1630 }
0x5576   :  { %1634 = vst.msk [vmem:[#allocation4] sm:$0xff] %vm1633_vm4, %v1631_v43 }
0x5577   :  { %1736 = vst.msk [vmem:[#allocation4] sm:$0xff] %vm1735_vm5, %v5516_v61 }
0x5579   :  { %v2358_v36 = vpop.permute.xlu1 %2357 }
0x557a   :  { %2360 = vst.msk [vmem:[#allocation4 + $0x10] sm:$0xff] %vm1527_vm3, %v2358_v36 }
0x557d   :  { %v4948_v53 = vpop.eup %4947  ;;  %v2463_v52 = vpop.permute.xlu1 %2462 }
0x557e   :  { %2465 = vst.msk [vmem:[#allocation4 + $0x10] sm:$0xff] %vm1633_vm4, %v2463_v52  ;;  %3807 = vrot.lane.b32.xlu1 %v4948_v53, %s4955_s7  ;;  %v3812_v40 = vld [vmem:[#allocation4] sm:$0xff] }
0x557f   :  { %2566 = vst.msk [vmem:[#allocation4 + $0x10] sm:$0xff] %vm1735_vm5, %v5664_v26  ;;  %3922 = vmatmul.mubr.f32.vlgmr.msra.gmra.mxu0 %v3812_v40 }
0x5580   :  { %3926 = vmatprep.mubr.f32.mxu0 %v3815_v45 }
0x5582   :  { %3707 = vrot.lane.b32.xlu1 %v5875_v49, %s4957_s6 }
0x5586   :  { %v3814_v61 = vld [vmem:[#allocation4 + $0x10] sm:$0xff] }
0x5587   :  { %3927 = vmatmul.mubr.f32.gmra.mxu0 %v3814_v61 }
0x55f0   :  { %v3808_v25 = vpop.permute.xlu1 %3807 }
0x55f1   :  { %v3810_v2 = vmul.f32 %v5976_v39, %v3808_v25 }
0x55f4   :  { %v3708_v9 = vpop.permute.xlu1 %3707 }
0x55f5   :  { %3710 = vst.msk [vmem:[#allocation4 + $0x28] sm:$0xff] %vm1633_vm4, %v3708_v9 }
0x55f6   :  { %3811 = vst.msk [vmem:[#allocation4 + $0x28] sm:$0xff] %vm1735_vm5, %v3810_v2 }
0x55fd   :  { %v3817_v31 = vld [vmem:[#allocation4 + $0x28] sm:$0xff] }
0x55fe   :  { %3931 = vmatprep.mubr.f32.mxu0 %v3817_v31 }
0x55ff   :  { %3932 = vmatmul.mubr.f32.gmra.mxu0 %v3816_v55 }
0x563f   :  { %v4271_v26 = vpop.f32.mrf.mxu0 }
0x5641   :  { %v4272_v49 = vpop.f32.mrf.mxu0 }
0x5642   :  { %v4273_v54 = vadd.f32 %v4272_v49, %v4271_v26 }
0x5644   :  { %v3924_v51 = vadd.f32 %v4273_v54, %v4042_v47 }
0x5646   :  { %3938 = vst.msk [vmem:[%s6054_s10] sm:$0xff] %vm3937_vm6, %v3924_v51 }
0x5647   :  { %v4274_v18 = vpop.f32.mrf.mxu0 }
0x5649   :  { %v4275_v8 = vpop.f32.mrf.mxu0 }
0x564a   :  { %v4276_v7 = vadd.f32 %v4275_v8, %v4274_v18 }
0x564c   :  { %v3929_v62 = vadd.f32 %v4276_v7, %v4042_v47 }
0x564e   :  { %3939 = vst.msk [vmem:[%s6054_s10 + $0x8] sm:$0xff] %vm3937_vm6, %v3929_v62 }
0x56bf   :  { %v4277_v11 = vpop.f32.mrf.mxu0 }
0x56c1   :  { %v4278_v21 = vpop.f32.mrf.mxu0 }
0x56c2   :  { %v4279_v15 = vadd.f32 %v4278_v21, %v4277_v11 }
0x56c4   :  { %v3934_v27 = vadd.f32 %v4279_v15, %v4042_v47 }
0x56c6   :  { %3940 = vst.msk [vmem:[%s6054_s10 + $0x10] sm:$0xff] %vm3937_vm6, %v3934_v27 }

</bundles_post_ra>
